<compile_context>
chip_gen: v5e
topology: v5e:2x2
jax: 0.10.0
libtpu: 0.0.40
codegen_flags: <defaults>
</compile_context>

<pallas_src>
import functools
import math

import jax
import jax.numpy as jnp
from jax.experimental import pallas as pl
from jax.experimental.pallas import tpu as pltpu

_VMEM_LIMIT = 32 * 1024 * 1024  # safe scoped-VMEM limit on v5e/v6e/v7x


# ------------------------- fused forward kernel -------------------------

def _fused_forward_kernel(x_ref, mask_ref, emb_g_ref, emb_b_ref,
                          wqkv_ref, bqkv_ref, wo_ref, bo_ref,
                          ln1g_ref, ln1b_ref, w1_ref, b1_ref, w2_ref, b2_ref,
                          ln2g_ref, ln2b_ref,
                          pool_w_ref, pool_b_ref,
                          cls_w1_ref, cls_b1_ref, cls_w2_ref, cls_b2_ref,
                          logits_ref, *,
                          batch, seq, num_heads, num_layers, scale, eps):
    H = x_ref.shape[1]
    Dh = H // num_heads

    def ln(y, g, b):
        mean = jnp.mean(y, axis=-1, keepdims=True)
        var = jnp.mean(jnp.square(y - mean), axis=-1, keepdims=True)
        return (y - mean) * jax.lax.rsqrt(var + eps) * g + b

    # --- embedding LayerNorm (fused; no standalone kernel) ---
    x = ln(x_ref[...].astype(jnp.float32), emb_g_ref[...], emb_b_ref[...])   # (M, H)

    # --- additive key mask built on the VPU from the raw int32 mask ---
    bias_all = (1.0 - mask_ref[...].astype(jnp.float32)) * -1e9              # (B, S)

    # --- transformer encoder layers (static loop; weights stacked on axis 0) ---
    for l in range(num_layers):
        wo_l = wo_ref[l]                                                     # (H, H) bf16

        # Fused QKV projection over ALL B*S rows at once (one MXU pass).
        qkv = jnp.dot(x.astype(jnp.bfloat16), wqkv_ref[l],
                      preferred_element_type=jnp.float32) + bqkv_ref[l]      # (M, 3H)
        qkv_bf = qkv.astype(jnp.bfloat16)                                    # cast once

        attn_rows = []
        for b in range(batch):
            rows = qkv_bf[b * seq:(b + 1) * seq, :]                          # (S, 3H)
            bias_b = bias_all[b:b + 1, :]                                    # (1, S)
            acc_b = jnp.zeros((seq, H), jnp.float32)
            for h in range(num_heads):
                qh = rows[:, h * Dh:(h + 1) * Dh]
                kh = rows[:, H + h * Dh:H + (h + 1) * Dh]
                vh = rows[:, 2 * H + h * Dh:2 * H + (h + 1) * Dh]
                # q @ k^T without materializing a transpose.
                s = jax.lax.dot_general(
                    qh, kh, (((1,), (1,)), ((), ())),
                    preferred_element_type=jnp.float32) * scale + bias_b     # (S, S)
                s = s - jnp.max(s, axis=-1, keepdims=True)
                p = jnp.exp(s)
                p = p * pl.reciprocal(jnp.sum(p, axis=-1, keepdims=True), approx=True)
                ctx_h = jnp.dot(p.astype(jnp.bfloat16), vh,
                                preferred_element_type=jnp.float32)          # (S, Dh)
                # Accumulate output projection per head (no lane concat).
                acc_b = acc_b + jnp.dot(ctx_h.astype(jnp.bfloat16),
                                        wo_l[h * Dh:(h + 1) * Dh, :],
                                        preferred_element_type=jnp.float32)  # (S, H)
            attn_rows.append(acc_b)
        attn_out = jnp.concatenate(attn_rows, axis=0) + bo_ref[l]            # (M, H)

        x1 = ln(x + attn_out, ln1g_ref[l], ln1b_ref[l])

        # FFN over all rows (dropout is identity in eval mode).
        ff = jnp.dot(x1.astype(jnp.bfloat16), w1_ref[l],
                     preferred_element_type=jnp.float32) + b1_ref[l]
        # TODO(synk): HF/PyTorch RoBERTa uses exact erf GELU; tanh approx used here.
        ff = jax.nn.gelu(ff, approximate=True)
        ff = jnp.dot(ff.astype(jnp.bfloat16), w2_ref[l],
                     preferred_element_type=jnp.float32) + b2_ref[l]
        x = ln(x1 + ff, ln2g_ref[l], ln2b_ref[l])

    # --- pooler (first token, Linear + tanh) fused in ---
    first = jnp.concatenate([x[b * seq:b * seq + 1, :] for b in range(batch)], axis=0)
    pooled = jnp.tanh(jnp.dot(first.astype(jnp.bfloat16), pool_w_ref[...],
                              preferred_element_type=jnp.float32) + pool_b_ref[...])

    # --- classifier: Linear -> ReLU -> Dropout(eval: identity) -> Linear (lane-padded) ---
    hcls = jnp.dot(pooled.astype(jnp.bfloat16), cls_w1_ref[...],
                   preferred_element_type=jnp.float32) + cls_b1_ref[...]
    hcls = jnp.maximum(hcls, 0.0)
    logits_ref[...] = jnp.dot(hcls.astype(jnp.bfloat16), cls_w2_ref[...],
                              preferred_element_type=jnp.float32) + cls_b2_ref[...]


def _full_block(shape):
    """Whole-array VMEM block for a grid-less pallas_call."""
    return pl.BlockSpec(shape, lambda s=len(shape): (0,) * s)


def fused_forward(x_emb, attn_mask, params, *, batch, seq, num_heads,
                  num_layers, eps=1e-5):
    """x_emb: (B*S, H) f32 word+pos embeddings; attn_mask: (B, S) int32 -> (B, 128) padded logits."""
    H = x_emb.shape[1]
    Np = params["cls_w2p"].shape[-1]
    scale = 1.0 / math.sqrt(H // num_heads)

    args = (x_emb, attn_mask,
            params["emb_ln_g"], params["emb_ln_b"],
            params["wqkv"], params["bqkv"], params["wo"], params["bo"],
            params["ln1_g"], params["ln1_b"],
            params["w1"], params["b1"], params["w2"], params["b2"],
            params["ln2_g"], params["ln2_b"],
            params["pool_w"], params["pool_b"],
            params["cls_w1"], params["cls_b1"],
            params["cls_w2p"], params["cls_b2p"])

    return pl.pallas_call(
        functools.partial(_fused_forward_kernel,
                          batch=batch, seq=seq, num_heads=num_heads,
                          num_layers=num_layers, scale=scale, eps=eps),
        out_shape=jax.ShapeDtypeStruct((batch, Np), jnp.float32),
        in_specs=[_full_block(a.shape) for a in args],
        out_specs=pl.BlockSpec((batch, Np), lambda: (0, 0)),
        compiler_params=pltpu.CompilerParams(vmem_limit_bytes=_VMEM_LIMIT),
    )(*args)


# ------------------------- parameter init (deterministic) -------------------------

def init_params(key, *, vocab=100, max_pos=16, hidden=128, heads=2,
                ffn=256, num_layers=2, num_labels=2, logits_pad=128):
    keys = iter(jax.random.split(key, 32))

    def w(shape, dtype=jnp.bfloat16):
        return (jax.random.normal(next(keys), shape, jnp.float32) * 0.02).astype(dtype)

    L = num_layers
    params = {
        "word_emb": w((vocab, hidden), jnp.float32),
        "pos_emb": w((max_pos, hidden), jnp.float32),
        "emb_ln_g": jnp.ones((1, hidden), jnp.float32),
        "emb_ln_b": jnp.zeros((1, hidden), jnp.float32),
        # stacked per-layer weights (L, ...)
        "wqkv": w((L, hidden, 3 * hidden)),
        "bqkv": jnp.zeros((L, 1, 3 * hidden), jnp.float32),
        "wo": w((L, hidden, hidden)),
        "bo": jnp.zeros((L, 1, hidden), jnp.float32),
        "ln1_g": jnp.ones((L, 1, hidden), jnp.float32),
        "ln1_b": jnp.zeros((L, 1, hidden), jnp.float32),
        "w1": w((L, hidden, ffn)),
        "b1": jnp.zeros((L, 1, ffn), jnp.float32),
        "w2": w((L, ffn, hidden)),
        "b2": jnp.zeros((L, 1, hidden), jnp.float32),
        "ln2_g": jnp.ones((L, 1, hidden), jnp.float32),
        "ln2_b": jnp.zeros((L, 1, hidden), jnp.float32),
        # pooler: Linear(hidden, hidden) + tanh
        "pool_w": w((hidden, hidden)),
        "pool_b": jnp.zeros((1, hidden), jnp.float32),
        # classifier: Linear(hidden, 256) -> ReLU -> Dropout -> Linear(256, num_labels)
        "cls_w1": w((hidden, 256)),
        "cls_b1": jnp.zeros((1, 256), jnp.float32),
    }
    # Final classifier weight padded to lane-dense (256, logits_pad); real logits live in
    # the first num_labels columns (zeros elsewhere) and are sliced in the wrapper.
    cls_w2 = jax.random.normal(next(keys), (256, num_labels), jnp.float32) * 0.02
    params["cls_w2p"] = (jnp.zeros((256, logits_pad), jnp.float32)
                         .at[:, :num_labels].set(cls_w2).astype(jnp.bfloat16))
    params["cls_b2p"] = jnp.zeros((1, logits_pad), jnp.float32)

    cfg = dict(hidden=hidden, heads=heads, num_labels=num_labels, num_layers=num_layers)
    return params, cfg


# ------------------------- forward pass -------------------------

def classification_roberta_forward(params, cfg, input_ids, attention_mask):
    B, S = input_ids.shape
    H = cfg["hidden"]

    # Embedding gather stays as XLA glue; everything after it is one Pallas kernel.
    # TODO(synk): real RoBERTa offsets position ids by padding_idx+1; synthetic encoder uses 0..S-1.
    word = jnp.take(params["word_emb"], input_ids, axis=0)           # (B, S, H)
    pos = params["pos_emb"][:S][None, :, :]                          # (1, S, H)
    x = (word + pos).reshape(B * S, H).astype(jnp.float32)

    logits_padded = fused_forward(
        x, attention_mask.astype(jnp.int32), params,
        batch=B, seq=S, num_heads=cfg["heads"], num_layers=cfg["num_layers"])
    return logits_padded[:, :cfg["num_labels"]]


# ------------------------- main -------------------------

if __name__ == "__main__":
    B, S = 2, 8
    VOCAB, HIDDEN, HEADS, FFN, LAYERS, NUM_LABELS = 100, 128, 2, 256, 2, 2

    key = jax.random.PRNGKey(0)
    k_params, k_ids = jax.random.split(key)
    params, cfg = init_params(k_params, vocab=VOCAB, max_pos=S, hidden=HIDDEN,
                              heads=HEADS, ffn=FFN, num_layers=LAYERS,
                              num_labels=NUM_LABELS)

    input_ids = jax.random.randint(k_ids, (B, S), 0, VOCAB, dtype=jnp.int32)
    attention_mask = jnp.array(
        [[1, 1, 1, 1, 1, 1, 1, 1],
         [1, 1, 1, 1, 1, 0, 0, 0]], dtype=jnp.int32)

    @jax.jit
    def run(ids, mask):
        return classification_roberta_forward(params, cfg, ids, mask)

    logits = run(input_ids, attention_mask)
    logits = jax.block_until_ready(logits)
    assert logits.shape == (B, NUM_LABELS) and logits.dtype == jnp.float32
    print("KERNEL_OK")
</pallas_src>

<mosaic_0001>
module attributes {stable_mosaic.version = 11 : i64} {
  func.func @_fused_forward_kernel(%arg0: memref<16x128xf32, #tpu.memory_space<vmem>>, %arg1: memref<2x8xi32, #tpu.memory_space<vmem>>, %arg2: memref<1x128xf32, #tpu.memory_space<vmem>>, %arg3: memref<1x128xf32, #tpu.memory_space<vmem>>, %arg4: memref<2x128x384xbf16, #tpu.memory_space<vmem>>, %arg5: memref<2x1x384xf32, #tpu.memory_space<vmem>>, %arg6: memref<2x128x128xbf16, #tpu.memory_space<vmem>>, %arg7: memref<2x1x128xf32, #tpu.memory_space<vmem>>, %arg8: memref<2x1x128xf32, #tpu.memory_space<vmem>>, %arg9: memref<2x1x128xf32, #tpu.memory_space<vmem>>, %arg10: memref<2x128x256xbf16, #tpu.memory_space<vmem>>, %arg11: memref<2x1x256xf32, #tpu.memory_space<vmem>>, %arg12: memref<2x256x128xbf16, #tpu.memory_space<vmem>>, %arg13: memref<2x1x128xf32, #tpu.memory_space<vmem>>, %arg14: memref<2x1x128xf32, #tpu.memory_space<vmem>>, %arg15: memref<2x1x128xf32, #tpu.memory_space<vmem>>, %arg16: memref<128x128xbf16, #tpu.memory_space<vmem>>, %arg17: memref<1x128xf32, #tpu.memory_space<vmem>>, %arg18: memref<128x256xbf16, #tpu.memory_space<vmem>>, %arg19: memref<1x256xf32, #tpu.memory_space<vmem>>, %arg20: memref<256x128xbf16, #tpu.memory_space<vmem>>, %arg21: memref<1x128xf32, #tpu.memory_space<vmem>>, %arg22: memref<2x128xf32, #tpu.memory_space<vmem>>) attributes {dimension_semantics = [], scalar_prefetch = 0 : i64, scratch_operands = 0 : i64, tpu.core_type = #tpu.core_type<tc>} {
    %c0 = arith.constant 0 : index
    %c0_0 = arith.constant 0 : index
    %0 = vector.load %arg0[%c0, %c0_0] : memref<16x128xf32, #tpu.memory_space<vmem>>, vector<16x128xf32>
    %c0_1 = arith.constant 0 : index
    %c0_2 = arith.constant 0 : index
    %1 = vector.load %arg2[%c0_1, %c0_2] : memref<1x128xf32, #tpu.memory_space<vmem>>, vector<1x128xf32>
    %c0_3 = arith.constant 0 : index
    %c0_4 = arith.constant 0 : index
    %2 = vector.load %arg3[%c0_3, %c0_4] : memref<1x128xf32, #tpu.memory_space<vmem>>, vector<1x128xf32>
    %cst = arith.constant dense<0.000000e+00> : vector<16xf32>
    %3 = vector.multi_reduction <add>, %0, %cst [1] : vector<16x128xf32> to vector<16xf32>
    %4 = vector.shape_cast %3 : vector<16xf32> to vector<16x1xf32>
    %cst_5 = arith.constant 1.280000e+02 : f32
    %5 = vector.broadcast %cst_5 : f32 to vector<16x1xf32>
    %6 = arith.divf %4, %5 : vector<16x1xf32>
    %7 = vector.broadcast %6 : vector<16x1xf32> to vector<16x128xf32>
    %8 = arith.subf %0, %7 : vector<16x128xf32>
    %9 = arith.mulf %8, %8 : vector<16x128xf32>
    %cst_6 = arith.constant dense<0.000000e+00> : vector<16xf32>
    %10 = vector.multi_reduction <add>, %9, %cst_6 [1] : vector<16x128xf32> to vector<16xf32>
    %11 = vector.shape_cast %10 : vector<16xf32> to vector<16x1xf32>
    %cst_7 = arith.constant 1.280000e+02 : f32
    %12 = vector.broadcast %cst_7 : f32 to vector<16x1xf32>
    %13 = arith.divf %11, %12 : vector<16x1xf32>
    %14 = vector.broadcast %6 : vector<16x1xf32> to vector<16x128xf32>
    %15 = arith.subf %0, %14 : vector<16x128xf32>
    %cst_8 = arith.constant 9.99999974E-6 : f32
    %16 = vector.broadcast %cst_8 : f32 to vector<16x1xf32>
    %17 = arith.addf %13, %16 : vector<16x1xf32>
    %18 = math.rsqrt %17 : vector<16x1xf32>
    %19 = vector.broadcast %18 : vector<16x1xf32> to vector<16x128xf32>
    %20 = arith.mulf %15, %19 : vector<16x128xf32>
    %21 = vector.broadcast %1 : vector<1x128xf32> to vector<16x128xf32>
    %22 = arith.mulf %20, %21 : vector<16x128xf32>
    %23 = vector.broadcast %2 : vector<1x128xf32> to vector<16x128xf32>
    %24 = arith.addf %22, %23 : vector<16x128xf32>
    %c0_9 = arith.constant 0 : index
    %c0_10 = arith.constant 0 : index
    %25 = vector.load %arg1[%c0_9, %c0_10] : memref<2x8xi32, #tpu.memory_space<vmem>>, vector<2x8xi32>
    %26 = arith.sitofp %25 : vector<2x8xi32> to vector<2x8xf32>
    %cst_11 = arith.constant 1.000000e+00 : f32
    %27 = vector.broadcast %cst_11 : f32 to vector<2x8xf32>
    %28 = arith.subf %27, %26 : vector<2x8xf32>
    %cst_12 = arith.constant -1.000000e+09 : f32
    %29 = vector.broadcast %cst_12 : f32 to vector<2x8xf32>
    %30 = arith.mulf %28, %29 : vector<2x8xf32>
    %c0_13 = arith.constant 0 : index
    %c0_14 = arith.constant 0 : index
    %c0_15 = arith.constant 0 : index
    %31 = vector.load %arg6[%c0_13, %c0_14, %c0_15] : memref<2x128x128xbf16, #tpu.memory_space<vmem>>, vector<1x128x128xbf16>
    %32 = vector.shape_cast %31 : vector<1x128x128xbf16> to vector<128x128xbf16>
    %33 = arith.truncf %24 : vector<16x128xf32> to vector<16x128xbf16>
    %c0_16 = arith.constant 0 : index
    %c0_17 = arith.constant 0 : index
    %c0_18 = arith.constant 0 : index
    %34 = vector.load %arg4[%c0_16, %c0_17, %c0_18] : memref<2x128x384xbf16, #tpu.memory_space<vmem>>, vector<1x128x384xbf16>
    %35 = vector.shape_cast %34 : vector<1x128x384xbf16> to vector<128x384xbf16>
    %cst_19 = arith.constant dense<0.000000e+00> : vector<16x384xf32>
    %36 = tpu.matmul %33, %35, %cst_19 {dimension_numbers = #tpu.dot_dimension_numbers<[1], [0], [0], [1], [0, 0, 1, 1], [], []>} : vector<16x128xbf16>, vector<128x384xbf16>, vector<16x384xf32> -> vector<16x384xf32>
    %c0_20 = arith.constant 0 : index
    %c0_21 = arith.constant 0 : index
    %c0_22 = arith.constant 0 : index
    %37 = vector.load %arg5[%c0_20, %c0_21, %c0_22] : memref<2x1x384xf32, #tpu.memory_space<vmem>>, vector<1x1x384xf32>
    %38 = vector.shape_cast %37 : vector<1x1x384xf32> to vector<1x384xf32>
    %39 = vector.broadcast %38 : vector<1x384xf32> to vector<16x384xf32>
    %40 = arith.addf %36, %39 : vector<16x384xf32>
    %41 = arith.truncf %40 : vector<16x384xf32> to vector<16x384xbf16>
    %42 = vector.extract_strided_slice %41 {offsets = [0, 0], sizes = [8, 384], strides = [1, 1]} : vector<16x384xbf16> to vector<8x384xbf16>
    %43 = vector.extract_strided_slice %30 {offsets = [0, 0], sizes = [1, 8], strides = [1, 1]} : vector<2x8xf32> to vector<1x8xf32>
    %cst_23 = arith.constant 0.000000e+00 : f32
    %44 = vector.broadcast %cst_23 : f32 to vector<8x128xf32>
    %45 = vector.extract_strided_slice %42 {offsets = [0, 0], sizes = [8, 64], strides = [1, 1]} : vector<8x384xbf16> to vector<8x64xbf16>
    %46 = vector.extract_strided_slice %42 {offsets = [0, 128], sizes = [8, 64], strides = [1, 1]} : vector<8x384xbf16> to vector<8x64xbf16>
    %47 = vector.extract_strided_slice %42 {offsets = [0, 256], sizes = [8, 64], strides = [1, 1]} : vector<8x384xbf16> to vector<8x64xbf16>
    %cst_24 = arith.constant dense<0.000000e+00> : vector<8x8xf32>
    %48 = tpu.matmul %45, %46, %cst_24 {dimension_numbers = #tpu.dot_dimension_numbers<[1], [1], [0], [0], [0, 0, 1, 0], [], []>} : vector<8x64xbf16>, vector<8x64xbf16>, vector<8x8xf32> -> vector<8x8xf32>
    %cst_25 = arith.constant 1.250000e-01 : f32
    %49 = vector.broadcast %cst_25 : f32 to vector<8x8xf32>
    %50 = arith.mulf %48, %49 : vector<8x8xf32>
    %51 = vector.broadcast %43 : vector<1x8xf32> to vector<8x8xf32>
    %52 = arith.addf %50, %51 : vector<8x8xf32>
    %cst_26 = arith.constant dense<0xFF800000> : vector<8xf32>
    %53 = vector.multi_reduction <maximumf>, %52, %cst_26 [1] : vector<8x8xf32> to vector<8xf32>
    %54 = vector.shape_cast %53 : vector<8xf32> to vector<8x1xf32>
    %55 = vector.broadcast %54 : vector<8x1xf32> to vector<8x8xf32>
    %56 = arith.subf %52, %55 : vector<8x8xf32>
    %57 = math.exp %56 : vector<8x8xf32>
    %cst_27 = arith.constant dense<0.000000e+00> : vector<8xf32>
    %58 = vector.multi_reduction <add>, %57, %cst_27 [1] : vector<8x8xf32> to vector<8xf32>
    %59 = vector.shape_cast %58 : vector<8xf32> to vector<8x1xf32>
    %60 = tpu.reciprocal %59 {approx = true} : vector<8x1xf32> -> vector<8x1xf32>
    %61 = vector.broadcast %60 : vector<8x1xf32> to vector<8x8xf32>
    %62 = arith.mulf %57, %61 : vector<8x8xf32>
    %63 = arith.truncf %62 : vector<8x8xf32> to vector<8x8xbf16>
    %cst_28 = arith.constant dense<0.000000e+00> : vector<8x64xf32>
    %64 = tpu.matmul %63, %47, %cst_28 {dimension_numbers = #tpu.dot_dimension_numbers<[1], [0], [0], [1], [0, 0, 1, 1], [], []>} : vector<8x8xbf16>, vector<8x64xbf16>, vector<8x64xf32> -> vector<8x64xf32>
    %65 = arith.truncf %64 : vector<8x64xf32> to vector<8x64xbf16>
    %66 = vector.extract_strided_slice %32 {offsets = [0, 0], sizes = [64, 128], strides = [1, 1]} : vector<128x128xbf16> to vector<64x128xbf16>
    %cst_29 = arith.constant dense<0.000000e+00> : vector<8x128xf32>
    %67 = tpu.matmul %65, %66, %cst_29 {dimension_numbers = #tpu.dot_dimension_numbers<[1], [0], [0], [1], [0, 0, 1, 1], [], []>} : vector<8x64xbf16>, vector<64x128xbf16>, vector<8x128xf32> -> vector<8x128xf32>
    %68 = arith.addf %44, %67 : vector<8x128xf32>
    %69 = vector.extract_strided_slice %42 {offsets = [0, 64], sizes = [8, 64], strides = [1, 1]} : vector<8x384xbf16> to vector<8x64xbf16>
    %70 = vector.extract_strided_slice %42 {offsets = [0, 192], sizes = [8, 64], strides = [1, 1]} : vector<8x384xbf16> to vector<8x64xbf16>
    %71 = vector.extract_strided_slice %42 {offsets = [0, 320], sizes = [8, 64], strides = [1, 1]} : vector<8x384xbf16> to vector<8x64xbf16>
    %cst_30 = arith.constant dense<0.000000e+00> : vector<8x8xf32>
    %72 = tpu.matmul %69, %70, %cst_30 {dimension_numbers = #tpu.dot_dimension_numbers<[1], [1], [0], [0], [0, 0, 1, 0], [], []>} : vector<8x64xbf16>, vector<8x64xbf16>, vector<8x8xf32> -> vector<8x8xf32>
    %cst_31 = arith.constant 1.250000e-01 : f32
    %73 = vector.broadcast %cst_31 : f32 to vector<8x8xf32>
    %74 = arith.mulf %72, %73 : vector<8x8xf32>
    %75 = vector.broadcast %43 : vector<1x8xf32> to vector<8x8xf32>
    %76 = arith.addf %74, %75 : vector<8x8xf32>
    %cst_32 = arith.constant dense<0xFF800000> : vector<8xf32>
    %77 = vector.multi_reduction <maximumf>, %76, %cst_32 [1] : vector<8x8xf32> to vector<8xf32>
    %78 = vector.shape_cast %77 : vector<8xf32> to vector<8x1xf32>
    %79 = vector.broadcast %78 : vector<8x1xf32> to vector<8x8xf32>
    %80 = arith.subf %76, %79 : vector<8x8xf32>
    %81 = math.exp %80 : vector<8x8xf32>
    %cst_33 = arith.constant dense<0.000000e+00> : vector<8xf32>
    %82 = vector.multi_reduction <add>, %81, %cst_33 [1] : vector<8x8xf32> to vector<8xf32>
    %83 = vector.shape_cast %82 : vector<8xf32> to vector<8x1xf32>
    %84 = tpu.reciprocal %83 {approx = true} : vector<8x1xf32> -> vector<8x1xf32>
    %85 = vector.broadcast %84 : vector<8x1xf32> to vector<8x8xf32>
    %86 = arith.mulf %81, %85 : vector<8x8xf32>
    %87 = arith.truncf %86 : vector<8x8xf32> to vector<8x8xbf16>
    %cst_34 = arith.constant dense<0.000000e+00> : vector<8x64xf32>
    %88 = tpu.matmul %87, %71, %cst_34 {dimension_numbers = #tpu.dot_dimension_numbers<[1], [0], [0], [1], [0, 0, 1, 1], [], []>} : vector<8x8xbf16>, vector<8x64xbf16>, vector<8x64xf32> -> vector<8x64xf32>
    %89 = arith.truncf %88 : vector<8x64xf32> to vector<8x64xbf16>
    %90 = vector.extract_strided_slice %32 {offsets = [64, 0], sizes = [64, 128], strides = [1, 1]} : vector<128x128xbf16> to vector<64x128xbf16>
    %cst_35 = arith.constant dense<0.000000e+00> : vector<8x128xf32>
    %91 = tpu.matmul %89, %90, %cst_35 {dimension_numbers = #tpu.dot_dimension_numbers<[1], [0], [0], [1], [0, 0, 1, 1], [], []>} : vector<8x64xbf16>, vector<64x128xbf16>, vector<8x128xf32> -> vector<8x128xf32>
    %92 = arith.addf %68, %91 : vector<8x128xf32>
    %93 = vector.extract_strided_slice %41 {offsets = [8, 0], sizes = [8, 384], strides = [1, 1]} : vector<16x384xbf16> to vector<8x384xbf16>
    %94 = vector.extract_strided_slice %30 {offsets = [1, 0], sizes = [1, 8], strides = [1, 1]} : vector<2x8xf32> to vector<1x8xf32>
    %cst_36 = arith.constant 0.000000e+00 : f32
    %95 = vector.broadcast %cst_36 : f32 to vector<8x128xf32>
    %96 = vector.extract_strided_slice %93 {offsets = [0, 0], sizes = [8, 64], strides = [1, 1]} : vector<8x384xbf16> to vector<8x64xbf16>
    %97 = vector.extract_strided_slice %93 {offsets = [0, 128], sizes = [8, 64], strides = [1, 1]} : vector<8x384xbf16> to vector<8x64xbf16>
    %98 = vector.extract_strided_slice %93 {offsets = [0, 256], sizes = [8, 64], strides = [1, 1]} : vector<8x384xbf16> to vector<8x64xbf16>
    %cst_37 = arith.constant dense<0.000000e+00> : vector<8x8xf32>
    %99 = tpu.matmul %96, %97, %cst_37 {dimension_numbers = #tpu.dot_dimension_numbers<[1], [1], [0], [0], [0, 0, 1, 0], [], []>} : vector<8x64xbf16>, vector<8x64xbf16>, vector<8x8xf32> -> vector<8x8xf32>
    %cst_38 = arith.constant 1.250000e-01 : f32
    %100 = vector.broadcast %cst_38 : f32 to vector<8x8xf32>
    %101 = arith.mulf %99, %100 : vector<8x8xf32>
    %102 = vector.broadcast %94 : vector<1x8xf32> to vector<8x8xf32>
    %103 = arith.addf %101, %102 : vector<8x8xf32>
    %cst_39 = arith.constant dense<0xFF800000> : vector<8xf32>
    %104 = vector.multi_reduction <maximumf>, %103, %cst_39 [1] : vector<8x8xf32> to vector<8xf32>
    %105 = vector.shape_cast %104 : vector<8xf32> to vector<8x1xf32>
    %106 = vector.broadcast %105 : vector<8x1xf32> to vector<8x8xf32>
    %107 = arith.subf %103, %106 : vector<8x8xf32>
    %108 = math.exp %107 : vector<8x8xf32>
    %cst_40 = arith.constant dense<0.000000e+00> : vector<8xf32>
    %109 = vector.multi_reduction <add>, %108, %cst_40 [1] : vector<8x8xf32> to vector<8xf32>
    %110 = vector.shape_cast %109 : vector<8xf32> to vector<8x1xf32>
    %111 = tpu.reciprocal %110 {approx = true} : vector<8x1xf32> -> vector<8x1xf32>
    %112 = vector.broadcast %111 : vector<8x1xf32> to vector<8x8xf32>
    %113 = arith.mulf %108, %112 : vector<8x8xf32>
    %114 = arith.truncf %113 : vector<8x8xf32> to vector<8x8xbf16>
    %cst_41 = arith.constant dense<0.000000e+00> : vector<8x64xf32>
    %115 = tpu.matmul %114, %98, %cst_41 {dimension_numbers = #tpu.dot_dimension_numbers<[1], [0], [0], [1], [0, 0, 1, 1], [], []>} : vector<8x8xbf16>, vector<8x64xbf16>, vector<8x64xf32> -> vector<8x64xf32>
    %116 = arith.truncf %115 : vector<8x64xf32> to vector<8x64xbf16>
    %117 = vector.extract_strided_slice %32 {offsets = [0, 0], sizes = [64, 128], strides = [1, 1]} : vector<128x128xbf16> to vector<64x128xbf16>
    %cst_42 = arith.constant dense<0.000000e+00> : vector<8x128xf32>
    %118 = tpu.matmul %116, %117, %cst_42 {dimension_numbers = #tpu.dot_dimension_numbers<[1], [0], [0], [1], [0, 0, 1, 1], [], []>} : vector<8x64xbf16>, vector<64x128xbf16>, vector<8x128xf32> -> vector<8x128xf32>
    %119 = arith.addf %95, %118 : vector<8x128xf32>
    %120 = vector.extract_strided_slice %93 {offsets = [0, 64], sizes = [8, 64], strides = [1, 1]} : vector<8x384xbf16> to vector<8x64xbf16>
    %121 = vector.extract_strided_slice %93 {offsets = [0, 192], sizes = [8, 64], strides = [1, 1]} : vector<8x384xbf16> to vector<8x64xbf16>
    %122 = vector.extract_strided_slice %93 {offsets = [0, 320], sizes = [8, 64], strides = [1, 1]} : vector<8x384xbf16> to vector<8x64xbf16>
    %cst_43 = arith.constant dense<0.000000e+00> : vector<8x8xf32>
    %123 = tpu.matmul %120, %121, %cst_43 {dimension_numbers = #tpu.dot_dimension_numbers<[1], [1], [0], [0], [0, 0, 1, 0], [], []>} : vector<8x64xbf16>, vector<8x64xbf16>, vector<8x8xf32> -> vector<8x8xf32>
    %cst_44 = arith.constant 1.250000e-01 : f32
    %124 = vector.broadcast %cst_44 : f32 to vector<8x8xf32>
    %125 = arith.mulf %123, %124 : vector<8x8xf32>
    %126 = vector.broadcast %94 : vector<1x8xf32> to vector<8x8xf32>
    %127 = arith.addf %125, %126 : vector<8x8xf32>
    %cst_45 = arith.constant dense<0xFF800000> : vector<8xf32>
    %128 = vector.multi_reduction <maximumf>, %127, %cst_45 [1] : vector<8x8xf32> to vector<8xf32>
    %129 = vector.shape_cast %128 : vector<8xf32> to vector<8x1xf32>
    %130 = vector.broadcast %129 : vector<8x1xf32> to vector<8x8xf32>
    %131 = arith.subf %127, %130 : vector<8x8xf32>
    %132 = math.exp %131 : vector<8x8xf32>
    %cst_46 = arith.constant dense<0.000000e+00> : vector<8xf32>
    %133 = vector.multi_reduction <add>, %132, %cst_46 [1] : vector<8x8xf32> to vector<8xf32>
    %134 = vector.shape_cast %133 : vector<8xf32> to vector<8x1xf32>
    %135 = tpu.reciprocal %134 {approx = true} : vector<8x1xf32> -> vector<8x1xf32>
    %136 = vector.broadcast %135 : vector<8x1xf32> to vector<8x8xf32>
    %137 = arith.mulf %132, %136 : vector<8x8xf32>
    %138 = arith.truncf %137 : vector<8x8xf32> to vector<8x8xbf16>
    %cst_47 = arith.constant dense<0.000000e+00> : vector<8x64xf32>
    %139 = tpu.matmul %138, %122, %cst_47 {dimension_numbers = #tpu.dot_dimension_numbers<[1], [0], [0], [1], [0, 0, 1, 1], [], []>} : vector<8x8xbf16>, vector<8x64xbf16>, vector<8x64xf32> -> vector<8x64xf32>
    %140 = arith.truncf %139 : vector<8x64xf32> to vector<8x64xbf16>
    %141 = vector.extract_strided_slice %32 {offsets = [64, 0], sizes = [64, 128], strides = [1, 1]} : vector<128x128xbf16> to vector<64x128xbf16>
    %cst_48 = arith.constant dense<0.000000e+00> : vector<8x128xf32>
    %142 = tpu.matmul %140, %141, %cst_48 {dimension_numbers = #tpu.dot_dimension_numbers<[1], [0], [0], [1], [0, 0, 1, 1], [], []>} : vector<8x64xbf16>, vector<64x128xbf16>, vector<8x128xf32> -> vector<8x128xf32>
    %143 = arith.addf %119, %142 : vector<8x128xf32>
    %144 = tpu.concatenate %92, %143 in 0 : vector<8x128xf32>, vector<8x128xf32> -> vector<16x128xf32>
    %c0_49 = arith.constant 0 : index
    %c0_50 = arith.constant 0 : index
    %c0_51 = arith.constant 0 : index
    %145 = vector.load %arg7[%c0_49, %c0_50, %c0_51] : memref<2x1x128xf32, #tpu.memory_space<vmem>>, vector<1x1x128xf32>
    %146 = vector.shape_cast %145 : vector<1x1x128xf32> to vector<1x128xf32>
    %147 = vector.broadcast %146 : vector<1x128xf32> to vector<16x128xf32>
    %148 = arith.addf %144, %147 : vector<16x128xf32>
    %149 = arith.addf %24, %148 : vector<16x128xf32>
    %c0_52 = arith.constant 0 : index
    %c0_53 = arith.constant 0 : index
    %c0_54 = arith.constant 0 : index
    %150 = vector.load %arg8[%c0_52, %c0_53, %c0_54] : memref<2x1x128xf32, #tpu.memory_space<vmem>>, vector<1x1x128xf32>
    %151 = vector.shape_cast %150 : vector<1x1x128xf32> to vector<1x128xf32>
    %c0_55 = arith.constant 0 : index
    %c0_56 = arith.constant 0 : index
    %c0_57 = arith.constant 0 : index
    %152 = vector.load %arg9[%c0_55, %c0_56, %c0_57] : memref<2x1x128xf32, #tpu.memory_space<vmem>>, vector<1x1x128xf32>
    %153 = vector.shape_cast %152 : vector<1x1x128xf32> to vector<1x128xf32>
    %cst_58 = arith.constant dense<0.000000e+00> : vector<16xf32>
    %154 = vector.multi_reduction <add>, %149, %cst_58 [1] : vector<16x128xf32> to vector<16xf32>
    %155 = vector.shape_cast %154 : vector<16xf32> to vector<16x1xf32>
    %cst_59 = arith.constant 1.280000e+02 : f32
    %156 = vector.broadcast %cst_59 : f32 to vector<16x1xf32>
    %157 = arith.divf %155, %156 : vector<16x1xf32>
    %158 = vector.broadcast %157 : vector<16x1xf32> to vector<16x128xf32>
    %159 = arith.subf %149, %158 : vector<16x128xf32>
    %160 = arith.mulf %159, %159 : vector<16x128xf32>
    %cst_60 = arith.constant dense<0.000000e+00> : vector<16xf32>
    %161 = vector.multi_reduction <add>, %160, %cst_60 [1] : vector<16x128xf32> to vector<16xf32>
    %162 = vector.shape_cast %161 : vector<16xf32> to vector<16x1xf32>
    %cst_61 = arith.constant 1.280000e+02 : f32
    %163 = vector.broadcast %cst_61 : f32 to vector<16x1xf32>
    %164 = arith.divf %162, %163 : vector<16x1xf32>
    %165 = vector.broadcast %157 : vector<16x1xf32> to vector<16x128xf32>
    %166 = arith.subf %149, %165 : vector<16x128xf32>
    %cst_62 = arith.constant 9.99999974E-6 : f32
    %167 = vector.broadcast %cst_62 : f32 to vector<16x1xf32>
    %168 = arith.addf %164, %167 : vector<16x1xf32>
    %169 = math.rsqrt %168 : vector<16x1xf32>
    %170 = vector.broadcast %169 : vector<16x1xf32> to vector<16x128xf32>
    %171 = arith.mulf %166, %170 : vector<16x128xf32>
    %172 = vector.broadcast %151 : vector<1x128xf32> to vector<16x128xf32>
    %173 = arith.mulf %171, %172 : vector<16x128xf32>
    %174 = vector.broadcast %153 : vector<1x128xf32> to vector<16x128xf32>
    %175 = arith.addf %173, %174 : vector<16x128xf32>
    %176 = arith.truncf %175 : vector<16x128xf32> to vector<16x128xbf16>
    %c0_63 = arith.constant 0 : index
    %c0_64 = arith.constant 0 : index
    %c0_65 = arith.constant 0 : index
    %177 = vector.load %arg10[%c0_63, %c0_64, %c0_65] : memref<2x128x256xbf16, #tpu.memory_space<vmem>>, vector<1x128x256xbf16>
    %178 = vector.shape_cast %177 : vector<1x128x256xbf16> to vector<128x256xbf16>
    %cst_66 = arith.constant dense<0.000000e+00> : vector<16x256xf32>
    %179 = tpu.matmul %176, %178, %cst_66 {dimension_numbers = #tpu.dot_dimension_numbers<[1], [0], [0], [1], [0, 0, 1, 1], [], []>} : vector<16x128xbf16>, vector<128x256xbf16>, vector<16x256xf32> -> vector<16x256xf32>
    %c0_67 = arith.constant 0 : index
    %c0_68 = arith.constant 0 : index
    %c0_69 = arith.constant 0 : index
    %180 = vector.load %arg11[%c0_67, %c0_68, %c0_69] : memref<2x1x256xf32, #tpu.memory_space<vmem>>, vector<1x1x256xf32>
    %181 = vector.shape_cast %180 : vector<1x1x256xf32> to vector<1x256xf32>
    %182 = vector.broadcast %181 : vector<1x256xf32> to vector<16x256xf32>
    %183 = arith.addf %179, %182 : vector<16x256xf32>
    %184 = arith.mulf %183, %183 : vector<16x256xf32>
    %185 = arith.mulf %183, %184 : vector<16x256xf32>
    %cst_70 = arith.constant 4.471500e-02 : f32
    %186 = vector.broadcast %cst_70 : f32 to vector<16x256xf32>
    %187 = arith.mulf %186, %185 : vector<16x256xf32>
    %188 = arith.addf %183, %187 : vector<16x256xf32>
    %cst_71 = arith.constant 0.797884583 : f32
    %189 = vector.broadcast %cst_71 : f32 to vector<16x256xf32>
    %190 = arith.mulf %189, %188 : vector<16x256xf32>
    %191 = math.tanh %190 : vector<16x256xf32>
    %cst_72 = arith.constant 1.000000e+00 : f32
    %192 = vector.broadcast %cst_72 : f32 to vector<16x256xf32>
    %193 = arith.addf %192, %191 : vector<16x256xf32>
    %cst_73 = arith.constant 5.000000e-01 : f32
    %194 = vector.broadcast %cst_73 : f32 to vector<16x256xf32>
    %195 = arith.mulf %194, %193 : vector<16x256xf32>
    %196 = arith.mulf %183, %195 : vector<16x256xf32>
    %197 = arith.truncf %196 : vector<16x256xf32> to vector<16x256xbf16>
    %c0_74 = arith.constant 0 : index
    %c0_75 = arith.constant 0 : index
    %c0_76 = arith.constant 0 : index
    %198 = vector.load %arg12[%c0_74, %c0_75, %c0_76] : memref<2x256x128xbf16, #tpu.memory_space<vmem>>, vector<1x256x128xbf16>
    %199 = vector.shape_cast %198 : vector<1x256x128xbf16> to vector<256x128xbf16>
    %cst_77 = arith.constant dense<0.000000e+00> : vector<16x128xf32>
    %200 = tpu.matmul %197, %199, %cst_77 {dimension_numbers = #tpu.dot_dimension_numbers<[1], [0], [0], [1], [0, 0, 1, 1], [], []>} : vector<16x256xbf16>, vector<256x128xbf16>, vector<16x128xf32> -> vector<16x128xf32>
    %c0_78 = arith.constant 0 : index
    %c0_79 = arith.constant 0 : index
    %c0_80 = arith.constant 0 : index
    %201 = vector.load %arg13[%c0_78, %c0_79, %c0_80] : memref<2x1x128xf32, #tpu.memory_space<vmem>>, vector<1x1x128xf32>
    %202 = vector.shape_cast %201 : vector<1x1x128xf32> to vector<1x128xf32>
    %203 = vector.broadcast %202 : vector<1x128xf32> to vector<16x128xf32>
    %204 = arith.addf %200, %203 : vector<16x128xf32>
    %205 = arith.addf %175, %204 : vector<16x128xf32>
    %c0_81 = arith.constant 0 : index
    %c0_82 = arith.constant 0 : index
    %c0_83 = arith.constant 0 : index
    %206 = vector.load %arg14[%c0_81, %c0_82, %c0_83] : memref<2x1x128xf32, #tpu.memory_space<vmem>>, vector<1x1x128xf32>
    %207 = vector.shape_cast %206 : vector<1x1x128xf32> to vector<1x128xf32>
    %c0_84 = arith.constant 0 : index
    %c0_85 = arith.constant 0 : index
    %c0_86 = arith.constant 0 : index
    %208 = vector.load %arg15[%c0_84, %c0_85, %c0_86] : memref<2x1x128xf32, #tpu.memory_space<vmem>>, vector<1x1x128xf32>
    %209 = vector.shape_cast %208 : vector<1x1x128xf32> to vector<1x128xf32>
    %cst_87 = arith.constant dense<0.000000e+00> : vector<16xf32>
    %210 = vector.multi_reduction <add>, %205, %cst_87 [1] : vector<16x128xf32> to vector<16xf32>
    %211 = vector.shape_cast %210 : vector<16xf32> to vector<16x1xf32>
    %cst_88 = arith.constant 1.280000e+02 : f32
    %212 = vector.broadcast %cst_88 : f32 to vector<16x1xf32>
    %213 = arith.divf %211, %212 : vector<16x1xf32>
    %214 = vector.broadcast %213 : vector<16x1xf32> to vector<16x128xf32>
    %215 = arith.subf %205, %214 : vector<16x128xf32>
    %216 = arith.mulf %215, %215 : vector<16x128xf32>
    %cst_89 = arith.constant dense<0.000000e+00> : vector<16xf32>
    %217 = vector.multi_reduction <add>, %216, %cst_89 [1] : vector<16x128xf32> to vector<16xf32>
    %218 = vector.shape_cast %217 : vector<16xf32> to vector<16x1xf32>
    %cst_90 = arith.constant 1.280000e+02 : f32
    %219 = vector.broadcast %cst_90 : f32 to vector<16x1xf32>
    %220 = arith.divf %218, %219 : vector<16x1xf32>
    %221 = vector.broadcast %213 : vector<16x1xf32> to vector<16x128xf32>
    %222 = arith.subf %205, %221 : vector<16x128xf32>
    %cst_91 = arith.constant 9.99999974E-6 : f32
    %223 = vector.broadcast %cst_91 : f32 to vector<16x1xf32>
    %224 = arith.addf %220, %223 : vector<16x1xf32>
    %225 = math.rsqrt %224 : vector<16x1xf32>
    %226 = vector.broadcast %225 : vector<16x1xf32> to vector<16x128xf32>
    %227 = arith.mulf %222, %226 : vector<16x128xf32>
    %228 = vector.broadcast %207 : vector<1x128xf32> to vector<16x128xf32>
    %229 = arith.mulf %227, %228 : vector<16x128xf32>
    %230 = vector.broadcast %209 : vector<1x128xf32> to vector<16x128xf32>
    %231 = arith.addf %229, %230 : vector<16x128xf32>
    %c1 = arith.constant 1 : index
    %c0_92 = arith.constant 0 : index
    %c0_93 = arith.constant 0 : index
    %232 = vector.load %arg6[%c1, %c0_92, %c0_93] : memref<2x128x128xbf16, #tpu.memory_space<vmem>>, vector<1x128x128xbf16>
    %233 = vector.shape_cast %232 : vector<1x128x128xbf16> to vector<128x128xbf16>
    %234 = arith.truncf %231 : vector<16x128xf32> to vector<16x128xbf16>
    %c1_94 = arith.constant 1 : index
    %c0_95 = arith.constant 0 : index
    %c0_96 = arith.constant 0 : index
    %235 = vector.load %arg4[%c1_94, %c0_95, %c0_96] : memref<2x128x384xbf16, #tpu.memory_space<vmem>>, vector<1x128x384xbf16>
    %236 = vector.shape_cast %235 : vector<1x128x384xbf16> to vector<128x384xbf16>
    %cst_97 = arith.constant dense<0.000000e+00> : vector<16x384xf32>
    %237 = tpu.matmul %234, %236, %cst_97 {dimension_numbers = #tpu.dot_dimension_numbers<[1], [0], [0], [1], [0, 0, 1, 1], [], []>} : vector<16x128xbf16>, vector<128x384xbf16>, vector<16x384xf32> -> vector<16x384xf32>
    %c1_98 = arith.constant 1 : index
    %c0_99 = arith.constant 0 : index
    %c0_100 = arith.constant 0 : index
    %238 = vector.load %arg5[%c1_98, %c0_99, %c0_100] : memref<2x1x384xf32, #tpu.memory_space<vmem>>, vector<1x1x384xf32>
    %239 = vector.shape_cast %238 : vector<1x1x384xf32> to vector<1x384xf32>
    %240 = vector.broadcast %239 : vector<1x384xf32> to vector<16x384xf32>
    %241 = arith.addf %237, %240 : vector<16x384xf32>
    %242 = arith.truncf %241 : vector<16x384xf32> to vector<16x384xbf16>
    %243 = vector.extract_strided_slice %242 {offsets = [0, 0], sizes = [8, 384], strides = [1, 1]} : vector<16x384xbf16> to vector<8x384xbf16>
    %244 = vector.extract_strided_slice %30 {offsets = [0, 0], sizes = [1, 8], strides = [1, 1]} : vector<2x8xf32> to vector<1x8xf32>
    %cst_101 = arith.constant 0.000000e+00 : f32
    %245 = vector.broadcast %cst_101 : f32 to vector<8x128xf32>
    %246 = vector.extract_strided_slice %243 {offsets = [0, 0], sizes = [8, 64], strides = [1, 1]} : vector<8x384xbf16> to vector<8x64xbf16>
    %247 = vector.extract_strided_slice %243 {offsets = [0, 128], sizes = [8, 64], strides = [1, 1]} : vector<8x384xbf16> to vector<8x64xbf16>
    %248 = vector.extract_strided_slice %243 {offsets = [0, 256], sizes = [8, 64], strides = [1, 1]} : vector<8x384xbf16> to vector<8x64xbf16>
    %cst_102 = arith.constant dense<0.000000e+00> : vector<8x8xf32>
    %249 = tpu.matmul %246, %247, %cst_102 {dimension_numbers = #tpu.dot_dimension_numbers<[1], [1], [0], [0], [0, 0, 1, 0], [], []>} : vector<8x64xbf16>, vector<8x64xbf16>, vector<8x8xf32> -> vector<8x8xf32>
    %cst_103 = arith.constant 1.250000e-01 : f32
    %250 = vector.broadcast %cst_103 : f32 to vector<8x8xf32>
    %251 = arith.mulf %249, %250 : vector<8x8xf32>
    %252 = vector.broadcast %244 : vector<1x8xf32> to vector<8x8xf32>
    %253 = arith.addf %251, %252 : vector<8x8xf32>
    %cst_104 = arith.constant dense<0xFF800000> : vector<8xf32>
    %254 = vector.multi_reduction <maximumf>, %253, %cst_104 [1] : vector<8x8xf32> to vector<8xf32>
    %255 = vector.shape_cast %254 : vector<8xf32> to vector<8x1xf32>
    %256 = vector.broadcast %255 : vector<8x1xf32> to vector<8x8xf32>
    %257 = arith.subf %253, %256 : vector<8x8xf32>
    %258 = math.exp %257 : vector<8x8xf32>
    %cst_105 = arith.constant dense<0.000000e+00> : vector<8xf32>
    %259 = vector.multi_reduction <add>, %258, %cst_105 [1] : vector<8x8xf32> to vector<8xf32>
    %260 = vector.shape_cast %259 : vector<8xf32> to vector<8x1xf32>
    %261 = tpu.reciprocal %260 {approx = true} : vector<8x1xf32> -> vector<8x1xf32>
    %262 = vector.broadcast %261 : vector<8x1xf32> to vector<8x8xf32>
    %263 = arith.mulf %258, %262 : vector<8x8xf32>
    %264 = arith.truncf %263 : vector<8x8xf32> to vector<8x8xbf16>
    %cst_106 = arith.constant dense<0.000000e+00> : vector<8x64xf32>
    %265 = tpu.matmul %264, %248, %cst_106 {dimension_numbers = #tpu.dot_dimension_numbers<[1], [0], [0], [1], [0, 0, 1, 1], [], []>} : vector<8x8xbf16>, vector<8x64xbf16>, vector<8x64xf32> -> vector<8x64xf32>
    %266 = arith.truncf %265 : vector<8x64xf32> to vector<8x64xbf16>
    %267 = vector.extract_strided_slice %233 {offsets = [0, 0], sizes = [64, 128], strides = [1, 1]} : vector<128x128xbf16> to vector<64x128xbf16>
    %cst_107 = arith.constant dense<0.000000e+00> : vector<8x128xf32>
    %268 = tpu.matmul %266, %267, %cst_107 {dimension_numbers = #tpu.dot_dimension_numbers<[1], [0], [0], [1], [0, 0, 1, 1], [], []>} : vector<8x64xbf16>, vector<64x128xbf16>, vector<8x128xf32> -> vector<8x128xf32>
    %269 = arith.addf %245, %268 : vector<8x128xf32>
    %270 = vector.extract_strided_slice %243 {offsets = [0, 64], sizes = [8, 64], strides = [1, 1]} : vector<8x384xbf16> to vector<8x64xbf16>
    %271 = vector.extract_strided_slice %243 {offsets = [0, 192], sizes = [8, 64], strides = [1, 1]} : vector<8x384xbf16> to vector<8x64xbf16>
    %272 = vector.extract_strided_slice %243 {offsets = [0, 320], sizes = [8, 64], strides = [1, 1]} : vector<8x384xbf16> to vector<8x64xbf16>
    %cst_108 = arith.constant dense<0.000000e+00> : vector<8x8xf32>
    %273 = tpu.matmul %270, %271, %cst_108 {dimension_numbers = #tpu.dot_dimension_numbers<[1], [1], [0], [0], [0, 0, 1, 0], [], []>} : vector<8x64xbf16>, vector<8x64xbf16>, vector<8x8xf32> -> vector<8x8xf32>
    %cst_109 = arith.constant 1.250000e-01 : f32
    %274 = vector.broadcast %cst_109 : f32 to vector<8x8xf32>
    %275 = arith.mulf %273, %274 : vector<8x8xf32>
    %276 = vector.broadcast %244 : vector<1x8xf32> to vector<8x8xf32>
    %277 = arith.addf %275, %276 : vector<8x8xf32>
    %cst_110 = arith.constant dense<0xFF800000> : vector<8xf32>
    %278 = vector.multi_reduction <maximumf>, %277, %cst_110 [1] : vector<8x8xf32> to vector<8xf32>
    %279 = vector.shape_cast %278 : vector<8xf32> to vector<8x1xf32>
    %280 = vector.broadcast %279 : vector<8x1xf32> to vector<8x8xf32>
    %281 = arith.subf %277, %280 : vector<8x8xf32>
    %282 = math.exp %281 : vector<8x8xf32>
    %cst_111 = arith.constant dense<0.000000e+00> : vector<8xf32>
    %283 = vector.multi_reduction <add>, %282, %cst_111 [1] : vector<8x8xf32> to vector<8xf32>
    %284 = vector.shape_cast %283 : vector<8xf32> to vector<8x1xf32>
    %285 = tpu.reciprocal %284 {approx = true} : vector<8x1xf32> -> vector<8x1xf32>
    %286 = vector.broadcast %285 : vector<8x1xf32> to vector<8x8xf32>
    %287 = arith.mulf %282, %286 : vector<8x8xf32>
    %288 = arith.truncf %287 : vector<8x8xf32> to vector<8x8xbf16>
    %cst_112 = arith.constant dense<0.000000e+00> : vector<8x64xf32>
    %289 = tpu.matmul %288, %272, %cst_112 {dimension_numbers = #tpu.dot_dimension_numbers<[1], [0], [0], [1], [0, 0, 1, 1], [], []>} : vector<8x8xbf16>, vector<8x64xbf16>, vector<8x64xf32> -> vector<8x64xf32>
    %290 = arith.truncf %289 : vector<8x64xf32> to vector<8x64xbf16>
    %291 = vector.extract_strided_slice %233 {offsets = [64, 0], sizes = [64, 128], strides = [1, 1]} : vector<128x128xbf16> to vector<64x128xbf16>
    %cst_113 = arith.constant dense<0.000000e+00> : vector<8x128xf32>
    %292 = tpu.matmul %290, %291, %cst_113 {dimension_numbers = #tpu.dot_dimension_numbers<[1], [0], [0], [1], [0, 0, 1, 1], [], []>} : vector<8x64xbf16>, vector<64x128xbf16>, vector<8x128xf32> -> vector<8x128xf32>
    %293 = arith.addf %269, %292 : vector<8x128xf32>
    %294 = vector.extract_strided_slice %242 {offsets = [8, 0], sizes = [8, 384], strides = [1, 1]} : vector<16x384xbf16> to vector<8x384xbf16>
    %295 = vector.extract_strided_slice %30 {offsets = [1, 0], sizes = [1, 8], strides = [1, 1]} : vector<2x8xf32> to vector<1x8xf32>
    %cst_114 = arith.constant 0.000000e+00 : f32
    %296 = vector.broadcast %cst_114 : f32 to vector<8x128xf32>
    %297 = vector.extract_strided_slice %294 {offsets = [0, 0], sizes = [8, 64], strides = [1, 1]} : vector<8x384xbf16> to vector<8x64xbf16>
    %298 = vector.extract_strided_slice %294 {offsets = [0, 128], sizes = [8, 64], strides = [1, 1]} : vector<8x384xbf16> to vector<8x64xbf16>
    %299 = vector.extract_strided_slice %294 {offsets = [0, 256], sizes = [8, 64], strides = [1, 1]} : vector<8x384xbf16> to vector<8x64xbf16>
    %cst_115 = arith.constant dense<0.000000e+00> : vector<8x8xf32>
    %300 = tpu.matmul %297, %298, %cst_115 {dimension_numbers = #tpu.dot_dimension_numbers<[1], [1], [0], [0], [0, 0, 1, 0], [], []>} : vector<8x64xbf16>, vector<8x64xbf16>, vector<8x8xf32> -> vector<8x8xf32>
    %cst_116 = arith.constant 1.250000e-01 : f32
    %301 = vector.broadcast %cst_116 : f32 to vector<8x8xf32>
    %302 = arith.mulf %300, %301 : vector<8x8xf32>
    %303 = vector.broadcast %295 : vector<1x8xf32> to vector<8x8xf32>
    %304 = arith.addf %302, %303 : vector<8x8xf32>
    %cst_117 = arith.constant dense<0xFF800000> : vector<8xf32>
    %305 = vector.multi_reduction <maximumf>, %304, %cst_117 [1] : vector<8x8xf32> to vector<8xf32>
    %306 = vector.shape_cast %305 : vector<8xf32> to vector<8x1xf32>
    %307 = vector.broadcast %306 : vector<8x1xf32> to vector<8x8xf32>
    %308 = arith.subf %304, %307 : vector<8x8xf32>
    %309 = math.exp %308 : vector<8x8xf32>
    %cst_118 = arith.constant dense<0.000000e+00> : vector<8xf32>
    %310 = vector.multi_reduction <add>, %309, %cst_118 [1] : vector<8x8xf32> to vector<8xf32>
    %311 = vector.shape_cast %310 : vector<8xf32> to vector<8x1xf32>
    %312 = tpu.reciprocal %311 {approx = true} : vector<8x1xf32> -> vector<8x1xf32>
    %313 = vector.broadcast %312 : vector<8x1xf32> to vector<8x8xf32>
    %314 = arith.mulf %309, %313 : vector<8x8xf32>
    %315 = arith.truncf %314 : vector<8x8xf32> to vector<8x8xbf16>
    %cst_119 = arith.constant dense<0.000000e+00> : vector<8x64xf32>
    %316 = tpu.matmul %315, %299, %cst_119 {dimension_numbers = #tpu.dot_dimension_numbers<[1], [0], [0], [1], [0, 0, 1, 1], [], []>} : vector<8x8xbf16>, vector<8x64xbf16>, vector<8x64xf32> -> vector<8x64xf32>
    %317 = arith.truncf %316 : vector<8x64xf32> to vector<8x64xbf16>
    %318 = vector.extract_strided_slice %233 {offsets = [0, 0], sizes = [64, 128], strides = [1, 1]} : vector<128x128xbf16> to vector<64x128xbf16>
    %cst_120 = arith.constant dense<0.000000e+00> : vector<8x128xf32>
    %319 = tpu.matmul %317, %318, %cst_120 {dimension_numbers = #tpu.dot_dimension_numbers<[1], [0], [0], [1], [0, 0, 1, 1], [], []>} : vector<8x64xbf16>, vector<64x128xbf16>, vector<8x128xf32> -> vector<8x128xf32>
    %320 = arith.addf %296, %319 : vector<8x128xf32>
    %321 = vector.extract_strided_slice %294 {offsets = [0, 64], sizes = [8, 64], strides = [1, 1]} : vector<8x384xbf16> to vector<8x64xbf16>
    %322 = vector.extract_strided_slice %294 {offsets = [0, 192], sizes = [8, 64], strides = [1, 1]} : vector<8x384xbf16> to vector<8x64xbf16>
    %323 = vector.extract_strided_slice %294 {offsets = [0, 320], sizes = [8, 64], strides = [1, 1]} : vector<8x384xbf16> to vector<8x64xbf16>
    %cst_121 = arith.constant dense<0.000000e+00> : vector<8x8xf32>
    %324 = tpu.matmul %321, %322, %cst_121 {dimension_numbers = #tpu.dot_dimension_numbers<[1], [1], [0], [0], [0, 0, 1, 0], [], []>} : vector<8x64xbf16>, vector<8x64xbf16>, vector<8x8xf32> -> vector<8x8xf32>
    %cst_122 = arith.constant 1.250000e-01 : f32
    %325 = vector.broadcast %cst_122 : f32 to vector<8x8xf32>
    %326 = arith.mulf %324, %325 : vector<8x8xf32>
    %327 = vector.broadcast %295 : vector<1x8xf32> to vector<8x8xf32>
    %328 = arith.addf %326, %327 : vector<8x8xf32>
    %cst_123 = arith.constant dense<0xFF800000> : vector<8xf32>
    %329 = vector.multi_reduction <maximumf>, %328, %cst_123 [1] : vector<8x8xf32> to vector<8xf32>
    %330 = vector.shape_cast %329 : vector<8xf32> to vector<8x1xf32>
    %331 = vector.broadcast %330 : vector<8x1xf32> to vector<8x8xf32>
    %332 = arith.subf %328, %331 : vector<8x8xf32>
    %333 = math.exp %332 : vector<8x8xf32>
    %cst_124 = arith.constant dense<0.000000e+00> : vector<8xf32>
    %334 = vector.multi_reduction <add>, %333, %cst_124 [1] : vector<8x8xf32> to vector<8xf32>
    %335 = vector.shape_cast %334 : vector<8xf32> to vector<8x1xf32>
    %336 = tpu.reciprocal %335 {approx = true} : vector<8x1xf32> -> vector<8x1xf32>
    %337 = vector.broadcast %336 : vector<8x1xf32> to vector<8x8xf32>
    %338 = arith.mulf %333, %337 : vector<8x8xf32>
    %339 = arith.truncf %338 : vector<8x8xf32> to vector<8x8xbf16>
    %cst_125 = arith.constant dense<0.000000e+00> : vector<8x64xf32>
    %340 = tpu.matmul %339, %323, %cst_125 {dimension_numbers = #tpu.dot_dimension_numbers<[1], [0], [0], [1], [0, 0, 1, 1], [], []>} : vector<8x8xbf16>, vector<8x64xbf16>, vector<8x64xf32> -> vector<8x64xf32>
    %341 = arith.truncf %340 : vector<8x64xf32> to vector<8x64xbf16>
    %342 = vector.extract_strided_slice %233 {offsets = [64, 0], sizes = [64, 128], strides = [1, 1]} : vector<128x128xbf16> to vector<64x128xbf16>
    %cst_126 = arith.constant dense<0.000000e+00> : vector<8x128xf32>
    %343 = tpu.matmul %341, %342, %cst_126 {dimension_numbers = #tpu.dot_dimension_numbers<[1], [0], [0], [1], [0, 0, 1, 1], [], []>} : vector<8x64xbf16>, vector<64x128xbf16>, vector<8x128xf32> -> vector<8x128xf32>
    %344 = arith.addf %320, %343 : vector<8x128xf32>
    %345 = tpu.concatenate %293, %344 in 0 : vector<8x128xf32>, vector<8x128xf32> -> vector<16x128xf32>
    %c1_127 = arith.constant 1 : index
    %c0_128 = arith.constant 0 : index
    %c0_129 = arith.constant 0 : index
    %346 = vector.load %arg7[%c1_127, %c0_128, %c0_129] : memref<2x1x128xf32, #tpu.memory_space<vmem>>, vector<1x1x128xf32>
    %347 = vector.shape_cast %346 : vector<1x1x128xf32> to vector<1x128xf32>
    %348 = vector.broadcast %347 : vector<1x128xf32> to vector<16x128xf32>
    %349 = arith.addf %345, %348 : vector<16x128xf32>
    %350 = arith.addf %231, %349 : vector<16x128xf32>
    %c1_130 = arith.constant 1 : index
    %c0_131 = arith.constant 0 : index
    %c0_132 = arith.constant 0 : index
    %351 = vector.load %arg8[%c1_130, %c0_131, %c0_132] : memref<2x1x128xf32, #tpu.memory_space<vmem>>, vector<1x1x128xf32>
    %352 = vector.shape_cast %351 : vector<1x1x128xf32> to vector<1x128xf32>
    %c1_133 = arith.constant 1 : index
    %c0_134 = arith.constant 0 : index
    %c0_135 = arith.constant 0 : index
    %353 = vector.load %arg9[%c1_133, %c0_134, %c0_135] : memref<2x1x128xf32, #tpu.memory_space<vmem>>, vector<1x1x128xf32>
    %354 = vector.shape_cast %353 : vector<1x1x128xf32> to vector<1x128xf32>
    %cst_136 = arith.constant dense<0.000000e+00> : vector<16xf32>
    %355 = vector.multi_reduction <add>, %350, %cst_136 [1] : vector<16x128xf32> to vector<16xf32>
    %356 = vector.shape_cast %355 : vector<16xf32> to vector<16x1xf32>
    %cst_137 = arith.constant 1.280000e+02 : f32
    %357 = vector.broadcast %cst_137 : f32 to vector<16x1xf32>
    %358 = arith.divf %356, %357 : vector<16x1xf32>
    %359 = vector.broadcast %358 : vector<16x1xf32> to vector<16x128xf32>
    %360 = arith.subf %350, %359 : vector<16x128xf32>
    %361 = arith.mulf %360, %360 : vector<16x128xf32>
    %cst_138 = arith.constant dense<0.000000e+00> : vector<16xf32>
    %362 = vector.multi_reduction <add>, %361, %cst_138 [1] : vector<16x128xf32> to vector<16xf32>
    %363 = vector.shape_cast %362 : vector<16xf32> to vector<16x1xf32>
    %cst_139 = arith.constant 1.280000e+02 : f32
    %364 = vector.broadcast %cst_139 : f32 to vector<16x1xf32>
    %365 = arith.divf %363, %364 : vector<16x1xf32>
    %366 = vector.broadcast %358 : vector<16x1xf32> to vector<16x128xf32>
    %367 = arith.subf %350, %366 : vector<16x128xf32>
    %cst_140 = arith.constant 9.99999974E-6 : f32
    %368 = vector.broadcast %cst_140 : f32 to vector<16x1xf32>
    %369 = arith.addf %365, %368 : vector<16x1xf32>
    %370 = math.rsqrt %369 : vector<16x1xf32>
    %371 = vector.broadcast %370 : vector<16x1xf32> to vector<16x128xf32>
    %372 = arith.mulf %367, %371 : vector<16x128xf32>
    %373 = vector.broadcast %352 : vector<1x128xf32> to vector<16x128xf32>
    %374 = arith.mulf %372, %373 : vector<16x128xf32>
    %375 = vector.broadcast %354 : vector<1x128xf32> to vector<16x128xf32>
    %376 = arith.addf %374, %375 : vector<16x128xf32>
    %377 = arith.truncf %376 : vector<16x128xf32> to vector<16x128xbf16>
    %c1_141 = arith.constant 1 : index
    %c0_142 = arith.constant 0 : index
    %c0_143 = arith.constant 0 : index
    %378 = vector.load %arg10[%c1_141, %c0_142, %c0_143] : memref<2x128x256xbf16, #tpu.memory_space<vmem>>, vector<1x128x256xbf16>
    %379 = vector.shape_cast %378 : vector<1x128x256xbf16> to vector<128x256xbf16>
    %cst_144 = arith.constant dense<0.000000e+00> : vector<16x256xf32>
    %380 = tpu.matmul %377, %379, %cst_144 {dimension_numbers = #tpu.dot_dimension_numbers<[1], [0], [0], [1], [0, 0, 1, 1], [], []>} : vector<16x128xbf16>, vector<128x256xbf16>, vector<16x256xf32> -> vector<16x256xf32>
    %c1_145 = arith.constant 1 : index
    %c0_146 = arith.constant 0 : index
    %c0_147 = arith.constant 0 : index
    %381 = vector.load %arg11[%c1_145, %c0_146, %c0_147] : memref<2x1x256xf32, #tpu.memory_space<vmem>>, vector<1x1x256xf32>
    %382 = vector.shape_cast %381 : vector<1x1x256xf32> to vector<1x256xf32>
    %383 = vector.broadcast %382 : vector<1x256xf32> to vector<16x256xf32>
    %384 = arith.addf %380, %383 : vector<16x256xf32>
    %385 = arith.mulf %384, %384 : vector<16x256xf32>
    %386 = arith.mulf %384, %385 : vector<16x256xf32>
    %cst_148 = arith.constant 4.471500e-02 : f32
    %387 = vector.broadcast %cst_148 : f32 to vector<16x256xf32>
    %388 = arith.mulf %387, %386 : vector<16x256xf32>
    %389 = arith.addf %384, %388 : vector<16x256xf32>
    %cst_149 = arith.constant 0.797884583 : f32
    %390 = vector.broadcast %cst_149 : f32 to vector<16x256xf32>
    %391 = arith.mulf %390, %389 : vector<16x256xf32>
    %392 = math.tanh %391 : vector<16x256xf32>
    %cst_150 = arith.constant 1.000000e+00 : f32
    %393 = vector.broadcast %cst_150 : f32 to vector<16x256xf32>
    %394 = arith.addf %393, %392 : vector<16x256xf32>
    %cst_151 = arith.constant 5.000000e-01 : f32
    %395 = vector.broadcast %cst_151 : f32 to vector<16x256xf32>
    %396 = arith.mulf %395, %394 : vector<16x256xf32>
    %397 = arith.mulf %384, %396 : vector<16x256xf32>
    %398 = arith.truncf %397 : vector<16x256xf32> to vector<16x256xbf16>
    %c1_152 = arith.constant 1 : index
    %c0_153 = arith.constant 0 : index
    %c0_154 = arith.constant 0 : index
    %399 = vector.load %arg12[%c1_152, %c0_153, %c0_154] : memref<2x256x128xbf16, #tpu.memory_space<vmem>>, vector<1x256x128xbf16>
    %400 = vector.shape_cast %399 : vector<1x256x128xbf16> to vector<256x128xbf16>
    %cst_155 = arith.constant dense<0.000000e+00> : vector<16x128xf32>
    %401 = tpu.matmul %398, %400, %cst_155 {dimension_numbers = #tpu.dot_dimension_numbers<[1], [0], [0], [1], [0, 0, 1, 1], [], []>} : vector<16x256xbf16>, vector<256x128xbf16>, vector<16x128xf32> -> vector<16x128xf32>
    %c1_156 = arith.constant 1 : index
    %c0_157 = arith.constant 0 : index
    %c0_158 = arith.constant 0 : index
    %402 = vector.load %arg13[%c1_156, %c0_157, %c0_158] : memref<2x1x128xf32, #tpu.memory_space<vmem>>, vector<1x1x128xf32>
    %403 = vector.shape_cast %402 : vector<1x1x128xf32> to vector<1x128xf32>
    %404 = vector.broadcast %403 : vector<1x128xf32> to vector<16x128xf32>
    %405 = arith.addf %401, %404 : vector<16x128xf32>
    %406 = arith.addf %376, %405 : vector<16x128xf32>
    %c1_159 = arith.constant 1 : index
    %c0_160 = arith.constant 0 : index
    %c0_161 = arith.constant 0 : index
    %407 = vector.load %arg14[%c1_159, %c0_160, %c0_161] : memref<2x1x128xf32, #tpu.memory_space<vmem>>, vector<1x1x128xf32>
    %408 = vector.shape_cast %407 : vector<1x1x128xf32> to vector<1x128xf32>
    %c1_162 = arith.constant 1 : index
    %c0_163 = arith.constant 0 : index
    %c0_164 = arith.constant 0 : index
    %409 = vector.load %arg15[%c1_162, %c0_163, %c0_164] : memref<2x1x128xf32, #tpu.memory_space<vmem>>, vector<1x1x128xf32>
    %410 = vector.shape_cast %409 : vector<1x1x128xf32> to vector<1x128xf32>
    %cst_165 = arith.constant dense<0.000000e+00> : vector<16xf32>
    %411 = vector.multi_reduction <add>, %406, %cst_165 [1] : vector<16x128xf32> to vector<16xf32>
    %412 = vector.shape_cast %411 : vector<16xf32> to vector<16x1xf32>
    %cst_166 = arith.constant 1.280000e+02 : f32
    %413 = vector.broadcast %cst_166 : f32 to vector<16x1xf32>
    %414 = arith.divf %412, %413 : vector<16x1xf32>
    %415 = vector.broadcast %414 : vector<16x1xf32> to vector<16x128xf32>
    %416 = arith.subf %406, %415 : vector<16x128xf32>
    %417 = arith.mulf %416, %416 : vector<16x128xf32>
    %cst_167 = arith.constant dense<0.000000e+00> : vector<16xf32>
    %418 = vector.multi_reduction <add>, %417, %cst_167 [1] : vector<16x128xf32> to vector<16xf32>
    %419 = vector.shape_cast %418 : vector<16xf32> to vector<16x1xf32>
    %cst_168 = arith.constant 1.280000e+02 : f32
    %420 = vector.broadcast %cst_168 : f32 to vector<16x1xf32>
    %421 = arith.divf %419, %420 : vector<16x1xf32>
    %422 = vector.broadcast %414 : vector<16x1xf32> to vector<16x128xf32>
    %423 = arith.subf %406, %422 : vector<16x128xf32>
    %cst_169 = arith.constant 9.99999974E-6 : f32
    %424 = vector.broadcast %cst_169 : f32 to vector<16x1xf32>
    %425 = arith.addf %421, %424 : vector<16x1xf32>
    %426 = math.rsqrt %425 : vector<16x1xf32>
    %427 = vector.broadcast %426 : vector<16x1xf32> to vector<16x128xf32>
    %428 = arith.mulf %423, %427 : vector<16x128xf32>
    %429 = vector.broadcast %408 : vector<1x128xf32> to vector<16x128xf32>
    %430 = arith.mulf %428, %429 : vector<16x128xf32>
    %431 = vector.broadcast %410 : vector<1x128xf32> to vector<16x128xf32>
    %432 = arith.addf %430, %431 : vector<16x128xf32>
    %433 = vector.extract_strided_slice %432 {offsets = [0, 0], sizes = [1, 128], strides = [1, 1]} : vector<16x128xf32> to vector<1x128xf32>
    %434 = vector.extract_strided_slice %432 {offsets = [8, 0], sizes = [1, 128], strides = [1, 1]} : vector<16x128xf32> to vector<1x128xf32>
    %435 = tpu.concatenate %433, %434 in 0 : vector<1x128xf32>, vector<1x128xf32> -> vector<2x128xf32>
    %436 = arith.truncf %435 : vector<2x128xf32> to vector<2x128xbf16>
    %c0_170 = arith.constant 0 : index
    %c0_171 = arith.constant 0 : index
    %437 = vector.load %arg16[%c0_170, %c0_171] : memref<128x128xbf16, #tpu.memory_space<vmem>>, vector<128x128xbf16>
    %cst_172 = arith.constant dense<0.000000e+00> : vector<2x128xf32>
    %438 = tpu.matmul %436, %437, %cst_172 {dimension_numbers = #tpu.dot_dimension_numbers<[1], [0], [0], [1], [0, 0, 1, 1], [], []>} : vector<2x128xbf16>, vector<128x128xbf16>, vector<2x128xf32> -> vector<2x128xf32>
    %c0_173 = arith.constant 0 : index
    %c0_174 = arith.constant 0 : index
    %439 = vector.load %arg17[%c0_173, %c0_174] : memref<1x128xf32, #tpu.memory_space<vmem>>, vector<1x128xf32>
    %440 = vector.broadcast %439 : vector<1x128xf32> to vector<2x128xf32>
    %441 = arith.addf %438, %440 : vector<2x128xf32>
    %442 = math.tanh %441 : vector<2x128xf32>
    %443 = arith.truncf %442 : vector<2x128xf32> to vector<2x128xbf16>
    %c0_175 = arith.constant 0 : index
    %c0_176 = arith.constant 0 : index
    %444 = vector.load %arg18[%c0_175, %c0_176] : memref<128x256xbf16, #tpu.memory_space<vmem>>, vector<128x256xbf16>
    %cst_177 = arith.constant dense<0.000000e+00> : vector<2x256xf32>
    %445 = tpu.matmul %443, %444, %cst_177 {dimension_numbers = #tpu.dot_dimension_numbers<[1], [0], [0], [1], [0, 0, 1, 1], [], []>} : vector<2x128xbf16>, vector<128x256xbf16>, vector<2x256xf32> -> vector<2x256xf32>
    %c0_178 = arith.constant 0 : index
    %c0_179 = arith.constant 0 : index
    %446 = vector.load %arg19[%c0_178, %c0_179] : memref<1x256xf32, #tpu.memory_space<vmem>>, vector<1x256xf32>
    %447 = vector.broadcast %446 : vector<1x256xf32> to vector<2x256xf32>
    %448 = arith.addf %445, %447 : vector<2x256xf32>
    %cst_180 = arith.constant 0.000000e+00 : f32
    %449 = vector.broadcast %cst_180 : f32 to vector<2x256xf32>
    %450 = arith.maximumf %448, %449 : vector<2x256xf32>
    %451 = arith.truncf %450 : vector<2x256xf32> to vector<2x256xbf16>
    %c0_181 = arith.constant 0 : index
    %c0_182 = arith.constant 0 : index
    %452 = vector.load %arg20[%c0_181, %c0_182] : memref<256x128xbf16, #tpu.memory_space<vmem>>, vector<256x128xbf16>
    %cst_183 = arith.constant dense<0.000000e+00> : vector<2x128xf32>
    %453 = tpu.matmul %451, %452, %cst_183 {dimension_numbers = #tpu.dot_dimension_numbers<[1], [0], [0], [1], [0, 0, 1, 1], [], []>} : vector<2x256xbf16>, vector<256x128xbf16>, vector<2x128xf32> -> vector<2x128xf32>
    %c0_184 = arith.constant 0 : index
    %c0_185 = arith.constant 0 : index
    %454 = vector.load %arg21[%c0_184, %c0_185] : memref<1x128xf32, #tpu.memory_space<vmem>>, vector<1x128xf32>
    %455 = vector.broadcast %454 : vector<1x128xf32> to vector<2x128xf32>
    %456 = arith.addf %453, %455 : vector<2x128xf32>
    %c0_186 = arith.constant 0 : index
    %c0_187 = arith.constant 0 : index
    %457 = vector.load %arg22[%c0_186, %c0_187] : memref<2x128xf32, #tpu.memory_space<vmem>>, vector<2x128xf32>
    tpu.vector_store %arg22[%c0_186, %c0_187], %456 {strides = array<i32>} : memref<2x128xf32, #tpu.memory_space<vmem>>, vector<2x128xf32>,
    return
  }
}

</mosaic_0001>

<bundles_post_ra>
// kernel: run.1
= control target key start
LH: loop header
LB: loop body
LE: loop exit
PB: predicated region body
PF: predicated region fallthrough
CT: control target
= control target key end

     0   :  { %s4342_s0 = inlined_call_operand.vmem [shape: f32[16,128], index: 0, kind: input, shape index: {}]   ;;  %s4343_s1 = inlined_call_operand.vmem [shape: s32[2,8], index: 1, kind: input, shape index: {}]   ;;  %s4344_s2 = inlined_call_operand.vmem [shape: f32[1,128], index: 2, kind: input, shape index: {}]   ;;  %s4345_s3 = inlined_call_operand.vmem [shape: f32[1,128], index: 3, kind: input, shape index: {}, may-alias: {3,17,21}]   ;;  %s4346_s4 = inlined_call_operand.hbm [shape: bf16[2,128,384], index: 4, kind: input, shape index: {}]   ;;  %s4347_s5 = inlined_call_operand.vmem [shape: f32[2,1,384], index: 5, kind: input, shape index: {}]   ;;  %s4348_s6 = inlined_call_operand.vmem [shape: bf16[2,128,128], index: 6, kind: input, shape index: {}]   ;;  %s4349_s7 = inlined_call_operand.vmem [shape: f32[2,1,128], index: 7, kind: input, shape index: {}, may-alias: {7,9,13,15}]   ;;  %s4350_s8 = inlined_call_operand.vmem [shape: f32[2,1,128], index: 8, kind: input, shape index: {}, may-alias: {8,14}]   ;;  %s4351_s9 = inlined_call_operand.vmem [shape: f32[2,1,128], index: 9, kind: input, shape index: {}, may-alias: {7,9,13,15}]   ;;  %s4352_s10 = inlined_call_operand.hbm [shape: bf16[2,128,256], index: 10, kind: input, shape index: {}]   ;;  %s4353_s11 = inlined_call_operand.vmem [shape: f32[2,1,256], index: 11, kind: input, shape index: {}]   ;;  %s4354_s12 = inlined_call_operand.hbm [shape: bf16[2,256,128], index: 12, kind: input, shape index: {}]   ;;  %s4355_s13 = inlined_call_operand.vmem [shape: f32[2,1,128], index: 13, kind: input, shape index: {}, may-alias: {7,9,13,15}]   ;;  %s4356_s14 = inlined_call_operand.vmem [shape: f32[2,1,128], index: 14, kind: input, shape index: {}, may-alias: {8,14}]   ;;  %s4357_s15 = inlined_call_operand.vmem [shape: f32[2,1,128], index: 15, kind: input, shape index: {}, may-alias: {7,9,13,15}]   ;;  %s4358_s16 = inlined_call_operand.vmem [shape: bf16[128,128], index: 16, kind: input, shape index: {}]   ;;  %s4359_s17 = inlined_call_operand.vmem [shape: f32[1,128], index: 17, kind: input, shape index: {}, may-alias: {3,17,21}]   ;;  %s4360_s18 = inlined_call_operand.hbm [shape: bf16[128,256], index: 18, kind: input, shape index: {}]   ;;  %s4361_s19 = inlined_call_operand.vmem [shape: f32[1,256], index: 19, kind: input, shape index: {}]   ;;  %s4362_s20 = inlined_call_operand.hbm [shape: bf16[256,128], index: 20, kind: input, shape index: {}]   ;;  %s4363_s21 = inlined_call_operand.vmem [shape: f32[1,128], index: 21, kind: input, shape index: {}, may-alias: {3,17,21}]   ;;  %s4364_s22 = inlined_call_operand.hbm [shape: f32[2,128], index: 22, kind: output, shape index: {}]  }
   0x1   :  { %4368 = sst [smem:[#allocation16_spill]] %s4342_s0 }
   0x2   :  { %4369 = sst [smem:[#allocation17_spill]] %s4343_s1 }
   0x3   :  { %4370 = sst [smem:[#allocation18_spill]] %s4344_s2 }
   0x4   :  { %4371 = sst [smem:[#allocation19_spill]] %s4345_s3 }
   0x5   :  { %4372 = sst [smem:[#allocation20_spill]] %s4346_s4 }
   0x6   :  { %4373 = sst [smem:[#allocation21_spill]] %s4347_s5 }
   0x7   :  { %4374 = sst [smem:[#allocation22_spill]] %s4348_s6 }
   0x8   :  { %4375 = sst [smem:[#allocation23_spill]] %s4364_s22 }
   0x9   :  { %27 = vsyncpa [#allocation3], 0 }
   0xa   :  { %28 = vsyncpa [#allocation6], 0 }
   0xb   :  { %29 = vsyncpa [#allocation9], 0  ;;  %s66_s29 = sshll.u32 %s4352_s10, 4  ;;  %s67_s29 = int_to_ptr.hbm [resolvable:$true] %s66_s29 }
   0xc   :  { %30 = vsyncpa [#allocation4], 0  ;;  %s3825_s30 = smov [#allocation5]   ;;  %s104_s1 = sshll.u32 %s4360_s18, 4  ;;  %s105_s1 = int_to_ptr.hbm [resolvable:$true] %s104_s1 }
   0xd   :  { %s68_s4 = sshll.u32 %s3825_s30, 4  ;;  %s3826_s5 = smov 128   ;;  %s69_s4 = int_to_ptr.vmem [resolvable:$true] %s68_s4 }
   0xe   :  { %s3827_s24 = smov 8   ;;  %s3828_s6 = smov [#allocation8]  }
   0xf   :  { %74 = dma.hbm_to_vmem [thread:$0]  %s67_s29, 4096, %s69_s4, [#allocation6], %s3826_s5, %s3826_s5, %s3827_s24  }
  0x10   :  { %s106_s25 = sshll.u32 %s3828_s6, 4  ;;  %s4376_s27 = sld [smem:[#allocation20_spill]]  ;;  %s107_s25 = int_to_ptr.vmem [resolvable:$true] %s106_s25 }
  0x11   :  { %112 = dma.hbm_to_vmem [thread:$0]  %s105_s1, 2048, %s107_s25, [#allocation9], %s3826_s5, %s3826_s5, %s3827_s24  }
  0x12   :  { %s3829_s10 = smov [#allocation2]   ;;  %s81_s18 = sshll.u32 %s4354_s12, 4  ;;  %s82_s18 = int_to_ptr.hbm [resolvable:$true] %s81_s18 }
  0x13   :  { %s45_s28 = sshll.u32 %s3829_s10, 4  ;;  %s3830_s0 = smov 192   ;;  %s46_s28 = int_to_ptr.vmem [resolvable:$true] %s45_s28 }
  0x14   :  { %s3831_s23 = smov 12   ;;  %s3832_s29 = smov [#allocation7]  }
  0x15   :  { %s83_s4 = sshll.u32 %s3832_s29, 4  ;;  %s3833_s6 = smov 64   ;;  %s84_s4 = int_to_ptr.vmem [resolvable:$true] %s83_s4 }
  0x16   :  { %s43_s3 = sshll.u32 %s4376_s27, 4  ;;  %s3834_s26 = smov 4   ;;  %s44_s3 = int_to_ptr.hbm [resolvable:$true] %s43_s3 }
  0x17   :  { %51 = dma.hbm_to_vmem [thread:$0]  %s44_s3, 6144, %s46_s28, [#allocation3], %s3830_s0, %s3830_s0, %s3831_s23  }
  0x18   :  { %89 = dma.hbm_to_vmem [thread:$0]  %s82_s18, 4096, %s84_s4, [#allocation6], %s3833_s6, %s3833_s6, %s3834_s26  }
  0x19   :  { %s119_s24 = sshll.u32 %s4362_s20, 4  ;;  %s3835_s25 = smov [#allocation10]   ;;  %s120_s24 = int_to_ptr.hbm [resolvable:$true] %s119_s24 }
  0x1a   :  { %s121_s22 = sshll.u32 %s3835_s25, 4  ;;  %s122_s22 = int_to_ptr.vmem [resolvable:$true] %s121_s22 }
  0x1b   :  { %127 = dma.hbm_to_vmem [thread:$0]  %s120_s24, 2048, %s122_s22, [#allocation9], %s3833_s6, %s3833_s6, %s3834_s26  }
  0x1c   :  { %3817 = dma.done.wait [#allocation3], 6144  }
  0x1d   :  { %3818 = vsyncadd [#allocation3], 4294961152 }
  0x1e   :  { %3819 = dma.done.wait [#allocation6], 8192  }
  0x1f   :  { %3820 = vsyncadd [#allocation6], 4294959104 }
  0x20   :  { %3821 = dma.done.wait [#allocation9], 4096  }
  0x21   :  { %3822 = vsyncadd [#allocation9], 4294963200  ;;  %s4377_s27 = sld [smem:[#allocation16_spill]]  ;;  %v3836_v2 = vmov 128.0   ;;  %v2770_v17 = vld [vmem:[#allocation2 + $0xa8] sm:$0xf] }
  0x22   :  { %3601 = vrcp.f32 %v3836_v2  ;;  %v3434_v18 = vld [vmem:[#allocation2 + $0xb0] sm:$0xf0]  ;;  %v3433_v19 = vld [vmem:[#allocation2 + $0xac] sm:$0xf]  ;;  %v2772_v21 = vld [vmem:[#allocation2 + $0xb4] sm:$0xf0] }
  0x23   :  { %v2771_v20 = vor.u32 %v3434_v18, %v2770_v17  ;;  %v2778_v22 = vld [vmem:[#allocation2 + $0xb0] sm:$0xf]  ;;  %v3435_v23 = vld [vmem:[#allocation2 + $0xb8] sm:$0xf0]  ;;  %v2775_v24 = vor.u32 %v3433_v19, %v2772_v21  ;;  %v3430_v28 = vld [vmem:[#allocation2 + $0x94] sm:$0xf] }
  0x24   :  { %v2779_v25 = vor.u32 %v3435_v23, %v2778_v22  ;;  %v2758_v26 = vld [vmem:[#allocation2 + $0x90] sm:$0xf]  ;;  %v3431_v27 = vld [vmem:[#allocation2 + $0x98] sm:$0xf0]  ;;  %v2760_v30 = vld [vmem:[#allocation2 + $0x9c] sm:$0xf0] }
  0x25   :  { %401 = vmatpush.bf16.msra.mxu0 %v2771_v20  ;;  %415 = vmatpush.bf16.msra.mxu1 %v2775_v24  ;;  %v2759_v29 = vor.u32 %v3431_v27, %v2758_v26  ;;  %v2766_v31 = vld [vmem:[#allocation2 + $0x98] sm:$0xf]  ;;  %v3432_v32 = vld [vmem:[#allocation2 + $0xa0] sm:$0xf0]  ;;  %v2763_v33 = vor.u32 %v3430_v28, %v2760_v30  ;;  %v3427_v37 = vld [vmem:[#allocation2 + $0x7c] sm:$0xf] }
  0x26   :  { %429 = vmatpush.bf16.msra.mxu2 %v2779_v25  ;;  %v2767_v34 = vor.u32 %v3432_v32, %v2766_v31  ;;  %v2746_v35 = vld [vmem:[#allocation2 + $0x78] sm:$0xf]  ;;  %v3428_v36 = vld [vmem:[#allocation2 + $0x80] sm:$0xf0]  ;;  %v2748_v39 = vld [vmem:[#allocation2 + $0x84] sm:$0xf0] }
  0x27   :  { %v151_v0 = vld [vmem:[%s4377_s27] sm:$0xff]  ;;  %v152_v1 = vld [vmem:[%s4377_s27 + $0x8] sm:$0xff]  ;;  %v2747_v38 = vor.u32 %v3428_v36, %v2746_v35  ;;  %v2751_v42 = vor.u32 %v3427_v37, %v2748_v39  ;;  %v2736_v48 = vld [vmem:[#allocation2 + $0x6c] sm:$0xf0]  ;;  %s4378_s30 = sld [smem:[#allocation18_spill]]  ;;  %vm450_vm7 = vcmask 523264  }
  0x28   :  { %155 = vadd.xlane.f32.xlu0 %v151_v0  ;;  %v3602_v3 = vpop.eup %3601  ;;  %v2754_v40 = vld [vmem:[#allocation2 + $0x80] sm:$0xf]  ;;  %v3429_v41 = vld [vmem:[#allocation2 + $0x88] sm:$0xf0]  ;;  %v3424_v46 = vld [vmem:[#allocation2 + $0x64] sm:$0xf] }
  0x29   :  { %v160_v4 = vmul.f32 128.0, %v3602_v3  ;;  %vm164_vm0 = vweird.f32 %v3602_v3  ;;  %402 = vmatpush.bf16.msra.mxu0 %v2759_v29  ;;  %416 = vmatpush.bf16.msra.mxu1 %v2763_v33  ;;  %v2755_v43 = vor.u32 %v3429_v41, %v2754_v40  ;;  %v2734_v44 = vld [vmem:[#allocation2 + $0x60] sm:$0xf]  ;;  %v3425_v45 = vld [vmem:[#allocation2 + $0x68] sm:$0xf0]  ;;  %v2739_v51 = vor.u32 %v3424_v46, %v2736_v48  ;;  %s4379_s23 = sld [smem:[#allocation19_spill]] }
  0x2a   :  { %430 = vmatpush.bf16.msra.mxu2 %v2767_v34  ;;  %v2735_v47 = vor.u32 %v3425_v45, %v2734_v44  ;;  %v2742_v49 = vld [vmem:[#allocation2 + $0x68] sm:$0xf]  ;;  %v3426_v50 = vld [vmem:[#allocation2 + $0x70] sm:$0xf0]  ;;  %v3421_v55 = vld [vmem:[#allocation2 + $0x4c] sm:$0xf] }
  0x2b   :  { %v161_v5 = vsub.f32 1.0, %v160_v4  ;;  %v2743_v52 = vor.u32 %v3426_v50, %v2742_v49  ;;  %v2722_v53 = vld [vmem:[#allocation2 + $0x48] sm:$0xf]  ;;  %v3422_v54 = vld [vmem:[#allocation2 + $0x50] sm:$0xf0]  ;;  %s4380_s26 = sld [smem:[#allocation22_spill]] }
  0x2c   :  { %v2723_v56 = vor.u32 %v3422_v54, %v2722_v53  ;;  %v2724_v57 = vld [vmem:[#allocation2 + $0x54] sm:$0xf0]  ;;  %v2730_v58 = vld [vmem:[#allocation2 + $0x50] sm:$0xf]  ;;  %v3423_v59 = vld [vmem:[#allocation2 + $0x58] sm:$0xf0] }
  0x2d   :  { %v162_v6 = vmul.f32 %v3602_v3, %v161_v5  ;;  %403 = vmatpush.bf16.msra.mxu0 %v2747_v38  ;;  %417 = vmatpush.bf16.msra.mxu1 %v2751_v42  ;;  %v2727_v60 = vor.u32 %v3421_v55, %v2724_v57  ;;  %v2731_v61 = vor.u32 %v3423_v59, %v2730_v58  ;;  %v2710_v62 = vld [vmem:[#allocation2 + $0x30] sm:$0xf]  ;;  %v3419_v63 = vld [vmem:[#allocation2 + $0x38] sm:$0xf0]  ;;  %v2712_v2 = vld [vmem:[#allocation2 + $0x3c] sm:$0xf0] }
  0x2e   :  { %431 = vmatpush.bf16.msra.mxu2 %v2755_v43  ;;  %v3420_v4 = vld [vmem:[#allocation2 + $0x40] sm:$0xf0]  ;;  %v2686_v19 = vld [vmem:[#allocation2] sm:$0xf]  ;;  %v3413_v20 = vld [vmem:[#allocation2 + $0x8] sm:$0xf0] }
  0x2f   :  { %v163_v7 = vadd.f32 %v3602_v3, %v162_v6  ;;  %v3412_v21 = vld [vmem:[#allocation2 + $0x4] sm:$0xf]  ;;  %v2687_v23 = vor.u32 %v3413_v20, %v2686_v19  ;;  %v2688_v24 = vld [vmem:[#allocation2 + $0xc] sm:$0xf0]  ;;  %v2694_v25 = vld [vmem:[#allocation2 + $0x8] sm:$0xf] }
  0x30   :  { %157 = vadd.xlane.f32.xlu0 %v152_v1  ;;  %v3414_v26 = vld [vmem:[#allocation2 + $0x10] sm:$0xf0]  ;;  %v2691_v28 = vor.u32 %v3412_v21, %v2688_v24  ;;  %s4381_s24 = sld [smem:[#allocation21_spill]]  ;;  %vm489_vm8 = vcmask 1043456   ;;  %vm473_vm9 = vcmask 64512  }
  0x31   :  { %v3978_v8 = vsel %vm164_vm0, %v3602_v3, %v163_v7  ;;  %404 = vmatpush.bf16.msra.mxu0 %v2735_v47  ;;  %418 = vmatpush.bf16.msra.mxu1 %v2739_v51  ;;  %v2718_v3 = vld [vmem:[#allocation2 + $0x38] sm:$0xf]  ;;  %v2695_v29 = vor.u32 %v3414_v26, %v2694_v25  ;;  %v3585_v47 = vld [vmem:[%s4378_s30] ss:$0 sm:$0xff]  ;;  %s4382_s28 = sld [smem:[#allocation17_spill]] }
  0x32   :  { %432 = vmatpush.bf16.msra.mxu2 %v2743_v52  ;;  %v2719_v6 = vor.u32 %v3420_v4, %v2718_v3  ;;  %v2698_v7 = vld [vmem:[#allocation2 + $0x18] sm:$0xf]  ;;  %v3586_v52 = vld [vmem:[%s4379_s23] ss:$0 sm:$0xff] }
  0x33   :  { %v3408_v24 = vld [vmem:[%s4380_s26 + $0x20] sm:$0xff] }
  0x35   :  { %405 = vmatpush.bf16.msra.mxu0 %v2723_v56  ;;  %419 = vmatpush.bf16.msra.mxu1 %v2727_v60 }
  0x36   :  { %433 = vmatpush.bf16.msra.mxu2 %v2731_v61  ;;  %v4015_v56 = vld [vmem:[%s4381_s24] sm:$0x7] }
  0x37   :  { %v267_v57 = vperm.slane %v4015_v56, 0  ;;  %v268_v58 = vperm.slane %v4015_v56, 1 }
  0x3a   :  { %434 = vmatpush.bf16.msra.mxu2 %v2719_v6 }
  0x9b   :  { %v156_v9 = vpop.xlane.xlu0 %155 }
  0x9c   :  { %v166_v10 = vmul.f32 %v3978_v8, %v156_v9  ;;  %v3416_v9 = vld [vmem:[#allocation2 + $0x20] sm:$0xf0] }
  0x9e   :  { %v3981_v11 = vsub.f32 %v151_v0, %v166_v10  ;;  %v3418_v0 = vld [vmem:[#allocation2 + $0x34] sm:$0xf]  ;;  %v3415_v10 = vld [vmem:[#allocation2 + $0x1c] sm:$0xf] }
  0x9f   :  { %v2715_v5 = vor.u32 %v3418_v0, %v2712_v2  ;;  %v269_v0 = vperm.slane %v4015_v56, 2 }
  0xa0   :  { %v170_v12 = vmul.f32 %v3981_v11, %v3981_v11 }
  0xa1   :  { %420 = vmatpush.bf16.msra.mxu1 %v2715_v5 }
  0xa2   :  { %172 = vadd.xlane.f32.xlu1 %v170_v12  ;;  %v2699_v12 = vor.u32 %v3416_v9, %v2698_v7 }
  0xa3   :  { %v158_v13 = vpop.xlane.xlu0 %157 }
  0xa4   :  { %v167_v14 = vmul.f32 %v3978_v8, %v158_v13  ;;  %v2700_v13 = vld [vmem:[#allocation2 + $0x24] sm:$0xf0] }
  0xa5   :  { %v2703_v17 = vor.u32 %v3415_v10, %v2700_v13 }
  0xa6   :  { %v3986_v15 = vsub.f32 %v152_v1, %v167_v14  ;;  %v2711_v1 = vor.u32 %v3419_v63, %v2710_v62  ;;  %v2706_v14 = vld [vmem:[#allocation2 + $0x20] sm:$0xf] }
  0xa7   :  { %421 = vmatpush.bf16.msra.mxu1 %v2703_v17 }
  0xa8   :  { %v171_v16 = vmul.f32 %v3986_v15, %v3986_v15  ;;  %406 = vmatpush.bf16.msra.mxu0 %v2711_v1 }
  0xaa   :  { %174 = vadd.xlane.f32.xlu1 %v171_v16  ;;  %v3417_v16 = vld [vmem:[#allocation2 + $0x28] sm:$0xf0] }
  0xab   :  { %v2707_v18 = vor.u32 %v3417_v16, %v2706_v14  ;;  %422 = vmatpush.bf16.msra.mxu1 %v2691_v28 }
  0xac   :  { %407 = vmatpush.bf16.msra.mxu0 %v2699_v12 }
  0xad   :  { %435 = vmatpush.bf16.msra.mxu2 %v2707_v18 }
  0xb0   :  { %408 = vmatpush.bf16.msra.mxu0 %v2687_v23  ;;  %v3409_v23 = vld [vmem:[%s4380_s26 + $0x28] sm:$0xff] }
  0xb1   :  { %436 = vmatpush.bf16.msra.mxu2 %v2695_v29 }
 0x115   :  { %v173_v22 = vpop.xlane.xlu1 %172 }
 0x116   :  { %v176_v27 = vmul.f32 %v173_v22, %v3978_v8  ;;  %v3410_v22 = vld [vmem:[%s4380_s26 + $0x30] sm:$0xff] }
 0x118   :  { %v178_v30 = vadd.f32 1e-05, %v176_v27  ;;  %v212_v27 = vld [vmem:[%s4382_s28] sm:$0x3] }
 0x119   :  { %v213_v28 = vcvt.s32.f32 %v212_v27 }
 0x11a   :  { %3603 = vrsqrt.f32 %v178_v30  ;;  %vm186_vm2 = vweird.f32 %v178_v30 }
 0x11d   :  { %v175_v31 = vpop.xlane.xlu1 %174 }
 0x11e   :  { %v177_v32 = vmul.f32 %v175_v31, %v3978_v8  ;;  %v214_v31 = vsub.f32 1.0, %v213_v28 }
 0x120   :  { %v3604_v33 = vpop.eup %3603  ;;  %v179_v34 = vadd.f32 1e-05, %v177_v32  ;;  %v215_v32 = vmul.f32 -1e+09, %v214_v31 }
 0x121   :  { %v181_v35 = vmul.f32 %v3604_v33, %v178_v30  ;;  %vm187_vm1 = vweird.f32 %v3604_v33 }
 0x122   :  { %3605 = vrsqrt.f32 %v179_v34  ;;  %vm188_vm3 = vmor %vm186_vm2, %vm187_vm1  ;;  %vm196_vm5 = vweird.f32 %v179_v34 }
 0x123   :  { %v182_v36 = vmul.f32 %v3604_v33, %v181_v35 }
 0x125   :  { %v183_v37 = vmul.f32 0.5, %v182_v36 }
 0x127   :  { %v184_v38 = vsub.f32 1.5, %v183_v37 }
 0x128   :  { %v3606_v39 = vpop.eup %3605 }
 0x129   :  { %v185_v40 = vmul.f32 %v3604_v33, %v184_v38  ;;  %v191_v41 = vmul.f32 %v3606_v39, %v179_v34  ;;  %vm197_vm4 = vweird.f32 %v3606_v39 }
 0x12a   :  { %vm198_vm6 = vmor %vm196_vm5, %vm197_vm4 }
 0x12b   :  { %v192_v42 = vmul.f32 %v3606_v39, %v191_v41  ;;  %v189_v43 = vsel %vm188_vm3, %v3604_v33, %v185_v40  ;;  %v4046_v33 = vperm.slane %v215_v32, 0 }
 0x12c   :  { %v200_v46 = vmul.f32 %v189_v43, %v3981_v11 }
 0x12d   :  { %v193_v44 = vmul.f32 0.5, %v192_v42 }
 0x12e   :  { %v205_v51 = vmul.f32 %v3585_v47, %v200_v46 }
 0x12f   :  { %v194_v45 = vsub.f32 1.5, %v193_v44 }
 0x130   :  { %v4000_v54 = vadd.f32 %v3586_v52, %v205_v51  ;;  %v4068_v51 = vld [vmem:[%s4380_s26 + $0x8] sm:$0xff] }
 0x131   :  { %v195_v48 = vmul.f32 %v3606_v39, %v194_v45 }
 0x133   :  { %v199_v49 = vsel %vm198_vm6, %v3606_v39, %v195_v48 }
 0x134   :  { %v201_v50 = vmul.f32 %v199_v49, %v3986_v15  ;;  %v4009_v15 = vld [vmem:[%s4380_s26 + $0x38] sm:$0xff] }
 0x135   :  { %602 = vmatpush.bf16.msrb.mxu1 %v4009_v15  ;;  %v4056_v49 = vld [vmem:[%s4380_s26 + $0x18] sm:$0xff] }
 0x136   :  { %v206_v53 = vmul.f32 %v3585_v47, %v201_v50  ;;  %642 = vmatpush.bf16.msrb.mxu2 %v4056_v49  ;;  %v4062_v50 = vld [vmem:[%s4380_s26 + $0x10] sm:$0xff] }
 0x138   :  { %v4002_v55 = vadd.f32 %v3586_v52, %v206_v53  ;;  %v3404_v53 = vld [vmem:[%s4380_s26] sm:$0xff] }
 0x139   :  { %603 = vmatpush.bf16.msrb.mxu1 %v3410_v22 }
 0x13a   :  { %v232_v11 = vpack.c.bf16 %v4002_v55, %v4000_v54  ;;  %643 = vmatpush.bf16.msrb.mxu2 %v4062_v50 }
 0x13c   :  { %409 = vmatmul.bf16.vlgmr.msra.gmra.mxu0 %v232_v11  ;;  %423 = vmatmul.bf16.vlgmr.msra.gmra.mxu1 %v232_v11 }
 0x13d   :  { %437 = vmatmul.bf16.vlgmr.msra.gmra.mxu2 %v232_v11  ;;  %604 = vmatpush.bf16.msrb.mxu1 %v3409_v23 }
 0x13e   :  { %644 = vmatpush.bf16.msrb.mxu2 %v4068_v51 }
 0x141   :  { %605 = vmatpush.bf16.msrb.mxu1 %v3408_v24 }
 0x142   :  { %645 = vmatpush.bf16.msrb.mxu2 %v3404_v53 }
 0x1b9   :  { %v410_v59 = vpop.f32.mrf.mxu0  ;;  %v424_v60 = vpop.f32.mrf.mxu1 }
 0x1ba   :  { %v411_v61 = vadd.f32 %v410_v59, %v267_v57  ;;  %v425_v62 = vadd.f32 %v424_v60, %v268_v58 }
 0x1bc   :  { %v443_v63 = vpack.c.bf16 %v425_v62, %v411_v61 }
 0x1be   :  { %v507_v1 = vunpack.c.l.b16 %v443_v63  ;;  %v448_v2 = vunpack.c.h.b16 %v443_v63 }
 0x1c0   :  { %v438_v3 = vpop.f32.mrf.mxu2  ;;  %v508_v4 = vpack.c.b16 %v507_v1, %v507_v1  ;;  %v449_v5 = vpack.c.b16 %v448_v2, %v448_v2 }
 0x1c1   :  { %v439_v6 = vadd.f32 %v438_v3, %v269_v0  ;;  %v412_v7 = vpop.f32.mrf.mxu0  ;;  %v426_v9 = vpop.f32.mrf.mxu1 }
 0x1c2   :  { %v413_v10 = vadd.f32 %v412_v7, %v267_v57  ;;  %v427_v12 = vadd.f32 %v426_v9, %v268_v58  ;;  %509 = vrot.lane.b32.xlu1 %v508_v4, %s3833_s6  ;;  %511 = vrot.lane.b32.xlu0 %v449_v5, %s3833_s6  ;;  %v455_v13 = vsel %vm450_vm7, %v449_v5, 0 }
 0x1c3   :  { %v4025_v14 = vpack.c.bf16 %v439_v6, %v439_v6  ;;  %464 = vmatpush.bf16.xpose.msrb.mxu0 %v455_v13 }
 0x1c4   :  { %v445_v16 = vpack.c.bf16 %v427_v12, %v413_v10 }
 0x1c5   :  { %v491_v17 = vsel %vm489_vm8, %v4025_v14, 0 }
 0x1c6   :  { %500 = vmatpush.bf16.msra.mxu3 %v491_v17  ;;  %v708_v18 = vunpack.c.l.b16 %v445_v16  ;;  %v652_v19 = vunpack.c.h.b16 %v445_v16 }
 0x1c8   :  { %v709_v20 = vpack.c.b16 %v708_v18, %v708_v18  ;;  %v653_v21 = vpack.c.b16 %v652_v19, %v652_v19  ;;  %v440_v6 = vpop.f32.mrf.mxu2 }
 0x1c9   :  { %v441_v27 = vadd.f32 %v440_v6, %v269_v0 }
 0x1ca   :  { %710 = vrot.lane.b32.xlu1 %v709_v20, %s3833_s6  ;;  %712 = vrot.lane.b32.xlu0 %v653_v21, %s3833_s6  ;;  %v658_v48 = vsel %vm450_vm7, %v653_v21, 0 }
 0x1cb   :  { %2780 = vmatmul.msk.bf16.vlgmr.msrb.gmra.mxu0 %vm450_vm7, %v443_v63  ;;  %v4080_v63 = vperm.slane %v215_v32, 1  ;;  %v446_v28 = vpack.c.bf16 %v441_v27, %v441_v27  ;;  %v2884_v27 = vld [vmem:[#allocation5 + $0x78] sm:$0xf0] }
 0x234   :  { %v512_v25 = vpop.permute.xlu0 %511  ;;  %v510_v52 = vpop.permute.xlu1 %509 }
 0x235   :  { %v517_v26 = vsel %vm450_vm7, %v512_v25, 0 }
 0x236   :  { %526 = vmatpush.bf16.xpose.msrb.mxu3 %v517_v26 }
 0x23c   :  { %v713_v29 = vpop.permute.xlu0 %712 }
 0x23d   :  { %v718_v30 = vsel %vm450_vm7, %v713_v29, 0 }
 0x23e   :  { %727 = vmatpush.bf16.xpose.msra.mxu1 %v718_v30 }
 0x248   :  { %v466_v34 = vpop.f32.mrf.mxu0 }
 0x249   :  { %v470_v35 = vmul.f32 0.125, %v466_v34  ;;  %v692_v34 = vsel %vm489_vm8, %v446_v28, 0 }
 0x24b   :  { %v472_v36 = vadd.f32 %v4046_v33, %v470_v35 }
 0x24d   :  { %v474_v37 = vsel %vm473_vm9, %v472_v36, -inf }
 0x24e   :  { %475 = vmax.xlane.f32.xlu2 %v474_v37 }
 0x250   :  { %v468_v38 = vpop.f32.mrf.mxu0 }
 0x2c1   :  { %v476_v39 = vpop.xlane.xlu2 %475 }
 0x2c2   :  { %v477_v40 = vsub.f32 %v472_v36, %v476_v39 }
 0x2c4   :  { %v478_v41 = vmul.f32 1.442695, %v477_v40 }
 0x2c6   :  { %3607 = vpow2.f32 %v478_v41 }
 0x2cc   :  { %v3608_v42 = vpop.eup %3607 }
 0x2cd   :  { %v480_v43 = vsel %vm473_vm9, %v3608_v42, 0.0 }
 0x2ce   :  { %481 = vadd.xlane.f32.xlu2 %v480_v43 }
 0x341   :  { %v482_v44 = vpop.xlane.xlu2 %481 }
 0x342   :  { %3609 = vrcp.f32 %v482_v44 }
 0x348   :  { %v3610_v45 = vpop.eup %3609 }
 0x349   :  { %v484_v46 = vmul.f32 %v3610_v45, %v3608_v42 }
 0x34b   :  { %v485_v47 = vpack.c.bf16 %v484_v46, %v484_v46 }
 0x34d   :  { %2781 = vmatmul.msk.bf16.vlgmr.msra.gmra.mxu3 %vm473_vm9, %v485_v47 }
 0x34e   :  { %667 = vmatpush.bf16.xpose.msra.mxu3 %v658_v48 }
 0x35d   :  { %2782 = vmatmul.msk.bf16.vlgmr.msrb.gmra.mxu3 %vm450_vm7, %v510_v52  ;;  %v748_v52 = vunpack.c.l.b16 %v446_v28 }
 0x35e   :  { %779 = vmatpush.bf16.msrb.mxu3 %v4009_v15 }
 0x362   :  { %780 = vmatpush.bf16.msrb.mxu3 %v3410_v22 }
 0x366   :  { %781 = vmatpush.bf16.msrb.mxu3 %v3409_v23 }
 0x36a   :  { %782 = vmatpush.bf16.msrb.mxu3 %v3408_v24  ;;  %v547_v24 = vunpack.c.l.b16 %v4025_v14 }
 0x36c   :  { %v548_v25 = vpack.c.b16 %v547_v24, %v547_v24  ;;  %v3451_v24 = vld [vmem:[#allocation5 + $0x74] sm:$0xf0] }
 0x36d   :  { %2818 = vmatmul.msk.bf16.vlgmr.msra.gmra.mxu3 %vm450_vm7, %v445_v16  ;;  %v711_v16 = vpop.permute.xlu1 %710 }
 0x3d0   :  { %v502_v11 = vpop.f32.mrf.mxu3 }
 0x3d1   :  { %v506_v57 = vpack.c.bf16 %v502_v11, %v502_v11 }
 0x3d3   :  { %2817 = vmatmul.msk.bf16.vlgmr.msrb.gmra.mxu2 %vm450_vm7, %v506_v57 }
 0x3d8   :  { %v504_v58 = vpop.f32.mrf.mxu3 }
 0x3e0   :  { %v528_v59 = vpop.f32.mrf.mxu3 }
 0x3e1   :  { %v532_v60 = vmul.f32 0.125, %v528_v59 }
 0x3e3   :  { %v533_v61 = vadd.f32 %v532_v60, %v4046_v33 }
 0x3e5   :  { %v534_v15 = vsel %vm473_vm9, %v533_v61, -inf }
 0x3e6   :  { %535 = vmax.xlane.f32.xlu2 %v534_v15 }
 0x3e8   :  { %v530_v62 = vpop.f32.mrf.mxu3 }
 0x3f0   :  { %v669_v1 = vpop.f32.mrf.mxu3 }
 0x3f1   :  { %v673_v2 = vmul.f32 0.125, %v669_v1 }
 0x3f3   :  { %v675_v3 = vadd.f32 %v4080_v63, %v673_v2 }
 0x3f5   :  { %v676_v4 = vsel %vm473_vm9, %v675_v3, -inf }
 0x3f6   :  { %677 = vmax.xlane.f32.xlu1 %v676_v4 }
 0x3f8   :  { %v671_v5 = vpop.f32.mrf.mxu3 }
 0x456   :  { %v4084_v7 = vpop.f32.mrf.mxu2 }
 0x459   :  { %v536_v9 = vpop.xlane.xlu2 %535 }
 0x45a   :  { %v537_v10 = vsub.f32 %v533_v61, %v536_v9  ;;  %v3587_v61 = vld [vmem:[%s4349_s7] ss:$0 sm:$0xff] }
 0x45c   :  { %v538_v12 = vmul.f32 1.442695, %v537_v10 }
 0x45e   :  { %3611 = vpow2.f32 %v538_v12  ;;  %v649_v13 = vpop.f32.mrf.mxu2 }
 0x464   :  { %v3612_v17 = vpop.eup %3611 }
 0x465   :  { %v540_v18 = vsel %vm473_vm9, %v3612_v17, 0.0 }
 0x466   :  { %541 = vadd.xlane.f32.xlu2 %v540_v18 }
 0x469   :  { %v678_v19 = vpop.xlane.xlu1 %677 }
 0x46a   :  { %v679_v20 = vsub.f32 %v675_v3, %v678_v19 }
 0x46c   :  { %v680_v21 = vmul.f32 1.442695, %v679_v20 }
 0x46e   :  { %3613 = vpow2.f32 %v680_v21 }
 0x474   :  { %v3614_v22 = vpop.eup %3613 }
 0x475   :  { %v682_v23 = vsel %vm473_vm9, %v3614_v22, 0.0 }
 0x476   :  { %683 = vadd.xlane.f32.xlu1 %v682_v23  ;;  %v2882_v23 = vld [vmem:[#allocation5 + $0x70] sm:$0xf] }
 0x47e   :  { %549 = vrot.lane.b32.xlu2 %v548_v25, %s3833_s6  ;;  %v3450_v25 = vld [vmem:[#allocation5 + $0x74] sm:$0xf] }
 0x47f   :  { %v2887_v28 = vor.u32 %v3450_v25, %v2884_v27 }
 0x4d9   :  { %v542_v26 = vpop.xlane.xlu2 %541 }
 0x4da   :  { %3615 = vrcp.f32 %v542_v26  ;;  %v2883_v26 = vor.u32 %v3451_v24, %v2882_v23 }
 0x4e0   :  { %v3616_v29 = vpop.eup %3615 }
 0x4e1   :  { %v544_v30 = vmul.f32 %v3616_v29, %v3612_v17  ;;  %v550_v31 = vpop.permute.xlu2 %549 }
 0x4e2   :  { %v555_v32 = vsel %vm489_vm8, %v550_v31, 0 }
 0x4e3   :  { %v545_v35 = vpack.c.bf16 %v544_v30, %v544_v30  ;;  %564 = vmatpush.bf16.msra.mxu0 %v555_v32 }
 0x4e6   :  { %2783 = vmatmul.msk.bf16.vlgmr.msra.gmra.mxu0 %vm473_vm9, %v545_v35  ;;  %v3448_v35 = vld [vmem:[#allocation5 + $0x64] sm:$0xf] }
 0x4e7   :  { %701 = vmatpush.bf16.msrb.mxu0 %v692_v34  ;;  %v3449_v34 = vld [vmem:[#allocation5 + $0x64] sm:$0xf0] }
 0x4e9   :  { %v684_v14 = vpop.xlane.xlu1 %683 }
 0x4ea   :  { %3617 = vrcp.f32 %v684_v14 }
 0x4eb   :  { %795 = vmatpush.bf16.msra.mxu0 %v4056_v49 }
 0x4ef   :  { %796 = vmatpush.bf16.msra.mxu0 %v4062_v50 }
 0x4f0   :  { %v3618_v56 = vpop.eup %3617 }
 0x4f1   :  { %v686_v0 = vmul.f32 %v3618_v56, %v3614_v22  ;;  %v2876_v56 = vld [vmem:[#allocation5 + $0x68] sm:$0xf0] }
 0x4f3   :  { %797 = vmatpush.bf16.msra.mxu0 %v4068_v51  ;;  %v687_v36 = vpack.c.bf16 %v686_v0, %v686_v0  ;;  %v2879_v0 = vor.u32 %v3448_v35, %v2876_v56  ;;  %v3588_v35 = vld [vmem:[%s4350_s8] ss:$0 sm:$0xff] }
 0x4f6   :  { %2819 = vmatmul.msk.bf16.vlgmr.msrb.gmra.mxu0 %vm473_vm9, %v687_v36  ;;  %v2866_v36 = vld [vmem:[#allocation5 + $0x50] sm:$0xf] }
 0x4f7   :  { %798 = vmatpush.bf16.msra.mxu0 %v3404_v53  ;;  %v749_v53 = vpack.c.b16 %v748_v52, %v748_v52  ;;  %v3442_v52 = vld [vmem:[#allocation5 + $0x34] sm:$0xf] }
 0x563   :  { %v566_v37 = vpop.f32.mrf.mxu0 }
 0x564   :  { %v570_v38 = vpack.c.bf16 %v566_v37, %v566_v37  ;;  %v3447_v37 = vld [vmem:[#allocation5 + $0x54] sm:$0xf0] }
 0x566   :  { %2800 = vmatmul.msk.bf16.vlgmr.msrb.gmra.mxu1 %vm450_vm7, %v570_v38  ;;  %v3446_v38 = vld [vmem:[#allocation5 + $0x54] sm:$0xf] }
 0x567   :  { %967 = vmatpush.bf16.msrb.mxu1 %v2883_v26 }
 0x56b   :  { %v568_v39 = vpop.f32.mrf.mxu0 }
 0x56c   :  { %v2867_v39 = vor.u32 %v3447_v37, %v2866_v36  ;;  %v3589_v37 = vld [vmem:[%s4351_s9] ss:$0 sm:$0xff] }
 0x573   :  { %v703_v40 = vpop.f32.mrf.mxu0 }
 0x574   :  { %v707_v41 = vpack.c.bf16 %v703_v40, %v703_v40  ;;  %v2868_v40 = vld [vmem:[#allocation5 + $0x58] sm:$0xf0] }
 0x576   :  { %2820 = vmatmul.msk.bf16.vlgmr.msra.gmra.mxu1 %vm450_vm7, %v711_v16  ;;  %2823 = vmatmul.msk.bf16.vlgmr.msra.gmra.mxu0 %vm450_vm7, %v707_v41 }
 0x57b   :  { %v705_v42 = vpop.f32.mrf.mxu0 }
 0x57c   :  { %v2871_v42 = vor.u32 %v3446_v38, %v2868_v40 }
 0x5e3   :  { %v607_v43 = vpop.f32.mrf.mxu1 }
 0x5e4   :  { %v648_v60 = vadd.f32 %v4084_v7, %v607_v43  ;;  %v2858_v43 = vld [vmem:[#allocation5 + $0x40] sm:$0xf] }
 0x5e6   :  { %v808_v62 = vadd.f32 %v3587_v61, %v648_v60  ;;  %v3441_v60 = vld [vmem:[#allocation5 + $0x24] sm:$0xf0] }
 0x5e8   :  { %v810_v2 = vadd.f32 %v808_v62, %v4000_v54  ;;  %v2844_v62 = vld [vmem:[#allocation5 + $0x28] sm:$0xf0] }
 0x5eb   :  { %v609_v44 = vpop.f32.mrf.mxu1 }
 0x5ec   :  { %v3445_v44 = vld [vmem:[#allocation5 + $0x44] sm:$0xf0] }
 0x5f3   :  { %v729_v45 = vpop.f32.mrf.mxu1  ;;  %v800_v46 = vpop.f32.mrf.mxu0 }
 0x5f4   :  { %v733_v47 = vmul.f32 0.125, %v729_v45  ;;  %v3444_v45 = vld [vmem:[#allocation5 + $0x44] sm:$0xf] }
 0x5f6   :  { %v734_v48 = vadd.f32 %v733_v47, %v4080_v63  ;;  %v2859_v47 = vor.u32 %v3445_v44, %v2858_v43  ;;  %v3457_v43 = vld [vmem:[#allocation7 + $0x28] sm:$0xff]  ;;  %v3466_v44 = vld [vmem:[#allocation7 + $0x70] sm:$0xff] }
 0x5f8   :  { %v735_v49 = vsel %vm473_vm9, %v734_v48, -inf }
 0x5f9   :  { %736 = vmax.xlane.f32.xlu0 %v735_v49 }
 0x5fb   :  { %v731_v50 = vpop.f32.mrf.mxu1  ;;  %v802_v51 = vpop.f32.mrf.mxu0 }
 0x5fc   :  { %v2850_v50 = vld [vmem:[#allocation5 + $0x30] sm:$0xf]  ;;  %v3443_v51 = vld [vmem:[#allocation5 + $0x34] sm:$0xf0] }
 0x60d   :  { %750 = vrot.lane.b32.xlu0 %v749_v53, %s3833_s6 }
 0x66c   :  { %v737_v11 = vpop.xlane.xlu0 %736 }
 0x66d   :  { %v738_v57 = vsub.f32 %v734_v48, %v737_v11  ;;  %v2860_v48 = vld [vmem:[#allocation5 + $0x48] sm:$0xf0]  ;;  %v2851_v11 = vor.u32 %v3443_v51, %v2850_v50  ;;  %v881_v50 = vld [vmem:[%s4353_s11] sm:$0x3]  ;;  %v3463_v51 = vld [vmem:[#allocation7 + $0x58] sm:$0xff] }
 0x66e   :  { %v2863_v49 = vor.u32 %v3444_v45, %v2860_v48  ;;  %v3456_v45 = vld [vmem:[#allocation7 + $0x20] sm:$0xff] }
 0x66f   :  { %v739_v58 = vmul.f32 1.442695, %v738_v57  ;;  %v2852_v57 = vld [vmem:[#allocation5 + $0x38] sm:$0xf0]  ;;  %v3464_v48 = vld [vmem:[#allocation7 + $0x60] sm:$0xff] }
 0x671   :  { %3619 = vpow2.f32 %v739_v58  ;;  %v2855_v58 = vor.u32 %v3442_v52, %v2852_v57  ;;  %v3453_v52 = vld [vmem:[#allocation7 + $0x8] sm:$0xff] }
 0x677   :  { %v3620_v59 = vpop.eup %3619 }
 0x678   :  { %v741_v15 = vsel %vm473_vm9, %v3620_v59, 0.0 }
 0x679   :  { %742 = vadd.xlane.f32.xlu2 %v741_v15 }
 0x67f   :  { %v751_v1 = vpop.permute.xlu0 %750 }
 0x680   :  { %v756_v3 = vsel %vm489_vm8, %v751_v1, 0 }
 0x681   :  { %814 = vadd.xlane.f32.xlu2 %v810_v2  ;;  %765 = vmatpush.bf16.msra.mxu2 %v756_v3  ;;  %v3439_v3 = vld [vmem:[#allocation5 + $0x14] sm:$0xf0] }
 0x685   :  { %981 = vmatpush.bf16.msrb.mxu2 %v2887_v28 }
 0x689   :  { %982 = vmatpush.bf16.msrb.mxu2 %v2879_v0 }
 0x68d   :  { %983 = vmatpush.bf16.msrb.mxu2 %v2871_v42  ;;  %v3458_v42 = vld [vmem:[#allocation7 + $0x30] sm:$0xff] }
 0x691   :  { %984 = vmatpush.bf16.msrb.mxu2 %v2863_v49  ;;  %v3454_v49 = vld [vmem:[#allocation7 + $0x10] sm:$0xff] }
 0x695   :  { %985 = vmatpush.bf16.msrb.mxu2 %v2855_v58  ;;  %v3452_v58 = vld [vmem:[#allocation7] sm:$0xff] }
 0x6ec   :  { %v743_v4 = vpop.xlane.xlu2 %742 }
 0x6ed   :  { %3621 = vrcp.f32 %v743_v4  ;;  %v3438_v4 = vld [vmem:[#allocation5 + $0x14] sm:$0xf] }
 0x6f3   :  { %v3622_v5 = vpop.eup %3621 }
 0x6f4   :  { %v745_v6 = vmul.f32 %v3622_v5, %v3620_v59  ;;  %v815_v7 = vpop.xlane.xlu2 %814  ;;  %v2842_v59 = vld [vmem:[#allocation5 + $0x20] sm:$0xf] }
 0x6f5   :  { %v818_v9 = vmul.f32 %v815_v7, %v3978_v8  ;;  %v2843_v15 = vor.u32 %v3441_v60, %v2842_v59  ;;  %v2826_v7 = vld [vmem:[#allocation5] sm:$0xf]  ;;  %v3461_v60 = vld [vmem:[#allocation7 + $0x48] sm:$0xff] }
 0x6f6   :  { %v746_v10 = vpack.c.bf16 %v745_v6, %v745_v6  ;;  %v2836_v6 = vld [vmem:[#allocation5 + $0x18] sm:$0xf0] }
 0x6f7   :  { %v4113_v12 = vsub.f32 %v810_v2, %v818_v9  ;;  %v2834_v2 = vld [vmem:[#allocation5 + $0x10] sm:$0xf]  ;;  %v3437_v9 = vld [vmem:[#allocation5 + $0x4] sm:$0xf0] }
 0x6f8   :  { %2821 = vmatmul.msk.bf16.vlgmr.msra.gmra.mxu2 %vm473_vm9, %v746_v10  ;;  %v2835_v5 = vor.u32 %v3439_v3, %v2834_v2  ;;  %v2839_v10 = vor.u32 %v3438_v4, %v2836_v6  ;;  %v3460_v2 = vld [vmem:[#allocation7 + $0x40] sm:$0xff] }
 0x6f9   :  { %v822_v13 = vmul.f32 %v4113_v12, %v4113_v12 }
 0x6fb   :  { %824 = vadd.xlane.f32.xlu2 %v822_v13  ;;  %v3436_v13 = vld [vmem:[#allocation5 + $0x4] sm:$0xf] }
 0x76e   :  { %v825_v41 = vpop.xlane.xlu2 %824 }
 0x77b   :  { %v767_v54 = vpop.f32.mrf.mxu2 }
 0x77c   :  { %v771_v16 = vpack.c.bf16 %v767_v54, %v767_v54  ;;  %v2828_v54 = vld [vmem:[#allocation5 + $0x8] sm:$0xf0] }
 0x77e   :  { %2822 = vmatmul.msk.bf16.vlgmr.msrb.gmra.mxu3 %vm450_vm7, %v771_v16 }
 0x783   :  { %v769_v17 = vpop.f32.mrf.mxu2 }
 0x784   :  { %v2827_v17 = vor.u32 %v3437_v9, %v2826_v7 }
 0x801   :  { %v784_v18 = vpop.f32.mrf.mxu3 }
 0x802   :  { %v801_v19 = vadd.f32 %v800_v46, %v784_v18  ;;  %v828_v46 = vmul.f32 %v825_v41, %v3978_v8  ;;  %v2831_v18 = vor.u32 %v3436_v13, %v2828_v54  ;;  %v3459_v41 = vld [vmem:[#allocation7 + $0x38] sm:$0xff] }
 0x803   :  { %1165 = vmatpush.bf16.msra.mxu3 %v3459_v41 }
 0x804   :  { %v809_v20 = vadd.f32 %v3587_v61, %v801_v19  ;;  %v830_v53 = vadd.f32 1e-05, %v828_v46  ;;  %v3440_v61 = vld [vmem:[#allocation5 + $0x24] sm:$0xf]  ;;  %v3465_v46 = vld [vmem:[#allocation7 + $0x68] sm:$0xff] }
 0x805   :  { %v2847_v1 = vor.u32 %v3440_v61, %v2844_v62 }
 0x806   :  { %v811_v21 = vadd.f32 %v809_v20, %v4002_v55  ;;  %v2874_v55 = vld [vmem:[#allocation5 + $0x60] sm:$0xf]  ;;  %3623 = vrsqrt.f32 %v830_v53  ;;  %vm838_vm11 = vweird.f32 %v830_v53 }
 0x807   :  { %v2875_v14 = vor.u32 %v3449_v34, %v2874_v55  ;;  %986 = vmatpush.bf16.msrb.mxu2 %v2847_v1  ;;  %1166 = vmatpush.bf16.msra.mxu3 %v3458_v42 }
 0x808   :  { %816 = vadd.xlane.f32.xlu1 %v811_v21 }
 0x809   :  { %v786_v22 = vpop.f32.mrf.mxu3  ;;  %968 = vmatpush.bf16.msrb.mxu1 %v2875_v14 }
 0x80b   :  { %987 = vmatpush.bf16.msrb.mxu2 %v2839_v10  ;;  %1167 = vmatpush.bf16.msra.mxu3 %v3457_v43 }
 0x80c   :  { %v3624_v16 = vpop.eup %3623 }
 0x80d   :  { %969 = vmatpush.bf16.msrb.mxu1 %v2867_v39  ;;  %v833_v19 = vmul.f32 %v3624_v16, %v830_v53  ;;  %vm839_vm10 = vweird.f32 %v3624_v16  ;;  %v883_v53 = vperm.slane %v881_v50, 0 }
 0x80e   :  { %vm840_vm12 = vmor %vm838_vm11, %vm839_vm10 }
 0x80f   :  { %988 = vmatpush.bf16.msrb.mxu2 %v2831_v18  ;;  %v834_v20 = vmul.f32 %v3624_v16, %v833_v19  ;;  %1168 = vmatpush.bf16.msra.mxu3 %v3456_v45 }
 0x811   :  { %970 = vmatpush.bf16.msrb.mxu1 %v2859_v47  ;;  %v835_v24 = vmul.f32 0.5, %v834_v20  ;;  %v3455_v47 = vld [vmem:[#allocation7 + $0x18] sm:$0xff] }
 0x813   :  { %v836_v25 = vsub.f32 1.5, %v835_v24  ;;  %1169 = vmatpush.bf16.msra.mxu3 %v3455_v47 }
 0x815   :  { %971 = vmatpush.bf16.msrb.mxu1 %v2851_v11  ;;  %v837_v27 = vmul.f32 %v3624_v16, %v836_v25  ;;  %v3462_v11 = vld [vmem:[#allocation7 + $0x50] sm:$0xff] }
 0x817   :  { %1170 = vmatpush.bf16.msra.mxu3 %v3454_v49 }
 0x819   :  { %972 = vmatpush.bf16.msrb.mxu1 %v2843_v15  ;;  %v884_v15 = vperm.slane %v881_v50, 1 }
 0x81b   :  { %1171 = vmatpush.bf16.msra.mxu3 %v3453_v52 }
 0x81d   :  { %973 = vmatpush.bf16.msrb.mxu1 %v2835_v5 }
 0x81f   :  { %1172 = vmatpush.bf16.msra.mxu3 %v3452_v58 }
 0x821   :  { %974 = vmatpush.bf16.msrb.mxu1 %v2827_v17 }
 0x87b   :  { %v817_v29 = vpop.xlane.xlu1 %816 }
 0x87c   :  { %v819_v30 = vmul.f32 %v817_v29, %v3978_v8 }
 0x87e   :  { %v4121_v31 = vsub.f32 %v811_v21, %v819_v30  ;;  %v841_v30 = vsel %vm840_vm12, %v3624_v16, %v837_v27 }
 0x87f   :  { %v852_v34 = vmul.f32 %v841_v30, %v4113_v12 }
 0x880   :  { %v823_v32 = vmul.f32 %v4121_v31, %v4121_v31 }
 0x881   :  { %v857_v36 = vmul.f32 %v3588_v35, %v852_v34 }
 0x882   :  { %826 = vadd.xlane.f32.xlu0 %v823_v32 }
 0x883   :  { %v4135_v39 = vadd.f32 %v3589_v37, %v857_v36 }
 0x8f5   :  { %v827_v21 = vpop.xlane.xlu0 %826 }
 0x8f6   :  { %v829_v22 = vmul.f32 %v827_v21, %v3978_v8 }
 0x8f8   :  { %v831_v23 = vadd.f32 1e-05, %v829_v22 }
 0x8fa   :  { %3625 = vrsqrt.f32 %v831_v23  ;;  %vm848_vm14 = vweird.f32 %v831_v23 }
 0x900   :  { %v3626_v26 = vpop.eup %3625 }
 0x901   :  { %v843_v28 = vmul.f32 %v3626_v26, %v831_v23  ;;  %vm849_vm13 = vweird.f32 %v3626_v26 }
 0x902   :  { %vm850_vm15 = vmor %vm848_vm14, %vm849_vm13 }
 0x903   :  { %v844_v29 = vmul.f32 %v3626_v26, %v843_v28 }
 0x905   :  { %v845_v32 = vmul.f32 0.5, %v844_v29 }
 0x907   :  { %v846_v55 = vsub.f32 1.5, %v845_v32 }
 0x909   :  { %v847_v14 = vmul.f32 %v3626_v26, %v846_v55 }
 0x90b   :  { %v851_v56 = vsel %vm850_vm15, %v3626_v26, %v847_v14 }
 0x90c   :  { %v853_v0 = vmul.f32 %v851_v56, %v4121_v31  ;;  %v3467_v31 = vld [vmem:[#allocation7 + $0x78] sm:$0xff] }
 0x90d   :  { %1179 = vmatpush.bf16.msrb.mxu0 %v3467_v31 }
 0x90e   :  { %v858_v38 = vmul.f32 %v3588_v35, %v853_v0 }
 0x910   :  { %v4137_v40 = vadd.f32 %v3589_v37, %v858_v38 }
 0x911   :  { %1180 = vmatpush.bf16.msrb.mxu0 %v3466_v44 }
 0x912   :  { %v864_v12 = vpack.c.bf16 %v4137_v40, %v4135_v39 }
 0x914   :  { %975 = vmatmul.bf16.vlgmr.msrb.gmra.mxu1 %v864_v12  ;;  %989 = vmatmul.bf16.vlgmr.msrb.gmra.mxu2 %v864_v12 }
 0x915   :  { %1181 = vmatpush.bf16.msrb.mxu0 %v3465_v46  ;;  %v3590_v46 = vld [vmem:[%s4355_s13] ss:$0 sm:$0xff] }
 0x919   :  { %1182 = vmatpush.bf16.msrb.mxu0 %v3464_v48 }
 0x91d   :  { %1183 = vmatpush.bf16.msrb.mxu0 %v3463_v51 }
 0x921   :  { %1184 = vmatpush.bf16.msrb.mxu0 %v3462_v11 }
 0x925   :  { %1185 = vmatpush.bf16.msrb.mxu0 %v3461_v60 }
 0x929   :  { %1186 = vmatpush.bf16.msrb.mxu0 %v3460_v2 }
 0x991   :  { %v976_v57 = vpop.f32.mrf.mxu1 }
 0x992   :  { %v977_v59 = vadd.f32 %v976_v57, %v883_v53 }
 0x994   :  { %v995_v61 = vmul.f32 %v977_v59, %v977_v59 }
 0x996   :  { %v999_v62 = vmul.f32 %v995_v61, %v977_v59 }
 0x997   :  { %v990_v1 = vpop.f32.mrf.mxu2 }
 0x998   :  { %v1003_v3 = vmul.f32 0.044715, %v999_v62  ;;  %v991_v4 = vadd.f32 %v990_v1, %v884_v15 }
 0x999   :  { %v978_v5 = vpop.f32.mrf.mxu1 }
 0x99a   :  { %v1007_v6 = vadd.f32 %v1003_v3, %v977_v59  ;;  %v996_v7 = vmul.f32 %v991_v4, %v991_v4  ;;  %v979_v9 = vadd.f32 %v978_v5, %v883_v53  ;;  %v3498_v3 = vld [vmem:[#allocation2 + $0x170] sm:$0xf0] }
 0x99c   :  { %v1011_v10 = vmul.f32 0.7978846, %v1007_v6  ;;  %v1000_v13 = vmul.f32 %v996_v7, %v991_v4  ;;  %v997_v54 = vmul.f32 %v979_v9, %v979_v9  ;;  %v3057_v6 = vld [vmem:[#allocation2 + $0x174] sm:$0xf0]  ;;  %v3063_v7 = vld [vmem:[#allocation2 + $0x170] sm:$0xf] }
 0x99e   :  { %v1004_v16 = vmul.f32 0.044715, %v1000_v13  ;;  %v1001_v17 = vmul.f32 %v997_v54, %v979_v9  ;;  %3627 = vtanh.f32 %v1011_v10  ;;  %v3043_v54 = vld [vmem:[#allocation2 + $0x150] sm:$0xf] }
 0x99f   :  { %v992_v18 = vpop.f32.mrf.mxu2 }
 0x9a0   :  { %v1008_v19 = vadd.f32 %v1004_v16, %v991_v4  ;;  %v1005_v20 = vmul.f32 0.044715, %v1001_v17  ;;  %v993_v21 = vadd.f32 %v992_v18, %v884_v15  ;;  %v3495_v16 = vld [vmem:[#allocation2 + $0x158] sm:$0xf0]  ;;  %v3494_v17 = vld [vmem:[#allocation2 + $0x154] sm:$0xf] }
 0x9a1   :  { %v3044_v18 = vor.u32 %v3495_v16, %v3043_v54  ;;  %v2973_v16 = vld [vmem:[#allocation2 + $0xcc] sm:$0xf0] }
 0x9a2   :  { %v1012_v22 = vmul.f32 0.7978846, %v1008_v19  ;;  %v1009_v23 = vadd.f32 %v1005_v20, %v979_v9  ;;  %v998_v24 = vmul.f32 %v993_v21, %v993_v21  ;;  %v3045_v19 = vld [vmem:[#allocation2 + $0x15c] sm:$0xf0]  ;;  %v3051_v20 = vld [vmem:[#allocation2 + $0x158] sm:$0xf] }
 0x9a4   :  { %v1013_v25 = vmul.f32 0.7978846, %v1009_v23  ;;  %v1002_v26 = vmul.f32 %v998_v24, %v993_v21  ;;  %3629 = vtanh.f32 %v1012_v22  ;;  %v3628_v27 = vpop.eup %3627  ;;  %v3048_v22 = vor.u32 %v3494_v17, %v3045_v19  ;;  %v3031_v24 = vld [vmem:[#allocation2 + $0x138] sm:$0xf]  ;;  %v2979_v17 = vld [vmem:[#allocation2 + $0xc8] sm:$0xf] }
 0x9a5   :  { %v1019_v30 = vadd.f32 1.0, %v3628_v27 }
 0x9a6   :  { %3631 = vtanh.f32 %v1013_v25  ;;  %v1006_v28 = vmul.f32 0.044715, %v1002_v26  ;;  %v3492_v25 = vld [vmem:[#allocation2 + $0x140] sm:$0xf0]  ;;  %v3491_v26 = vld [vmem:[#allocation2 + $0x13c] sm:$0xf] }
 0x9a7   :  { %v1023_v35 = vmul.f32 0.5, %v1019_v30  ;;  %v3032_v27 = vor.u32 %v3492_v25, %v3031_v24  ;;  %v3493_v30 = vld [vmem:[#allocation2 + $0x148] sm:$0xf0] }
 0x9a8   :  { %v1010_v29 = vadd.f32 %v1006_v28, %v993_v21  ;;  %v3033_v28 = vld [vmem:[#allocation2 + $0x144] sm:$0xf0] }
 0x9a9   :  { %v1027_v36 = vmul.f32 %v1023_v35, %v977_v59  ;;  %v3489_v35 = vld [vmem:[#allocation2 + $0x128] sm:$0xf0] }
 0x9aa   :  { %v1014_v32 = vmul.f32 0.7978846, %v1010_v29  ;;  %v3630_v55 = vpop.eup %3629  ;;  %v3039_v29 = vld [vmem:[#allocation2 + $0x140] sm:$0xf] }
 0x9ab   :  { %v1020_v56 = vadd.f32 1.0, %v3630_v55  ;;  %v3040_v55 = vor.u32 %v3493_v30, %v3039_v29 }
 0x9ac   :  { %v3632_v34 = vpop.eup %3631  ;;  %3633 = vtanh.f32 %v1014_v32  ;;  %v3036_v32 = vor.u32 %v3491_v26, %v3033_v28 }
 0x9ad   :  { %v1021_v14 = vadd.f32 1.0, %v3632_v34  ;;  %v1024_v12 = vmul.f32 0.5, %v1020_v56  ;;  %v3019_v34 = vld [vmem:[#allocation2 + $0x120] sm:$0xf] }
 0x9ae   :  { %v3020_v56 = vor.u32 %v3489_v35, %v3019_v34 }
 0x9af   :  { %v1025_v0 = vmul.f32 0.5, %v1021_v14  ;;  %v1028_v43 = vmul.f32 %v1024_v12, %v991_v4  ;;  %v3497_v4 = vld [vmem:[#allocation2 + $0x16c] sm:$0xf]  ;;  %v3488_v14 = vld [vmem:[#allocation2 + $0x124] sm:$0xf] }
 0x9b0   :  { %v3060_v10 = vor.u32 %v3497_v4, %v3057_v6 }
 0x9b1   :  { %v1029_v37 = vmul.f32 %v1025_v0, %v979_v9  ;;  %v3499_v9 = vld [vmem:[#allocation2 + $0x178] sm:$0xf0]  ;;  %v3021_v0 = vld [vmem:[#allocation2 + $0x12c] sm:$0xf0] }
 0x9b2   :  { %v3634_v38 = vpop.eup %3633  ;;  %v3064_v13 = vor.u32 %v3499_v9, %v3063_v7  ;;  %1449 = vmatpush.bf16.msra.mxu2 %v3060_v10  ;;  %v2971_v7 = vld [vmem:[#allocation2 + $0xc0] sm:$0xf]  ;;  %v3477_v9 = vld [vmem:[#allocation2 + $0xc8] sm:$0xf0]  ;;  %v3476_v10 = vld [vmem:[#allocation2 + $0xc4] sm:$0xf] }
 0x9b3   :  { %v1022_v41 = vadd.f32 1.0, %v3634_v38  ;;  %v1031_v42 = vpack.c.bf16 %v1029_v37, %v1027_v36  ;;  %v3027_v36 = vld [vmem:[#allocation2 + $0x128] sm:$0xf]  ;;  %v3490_v37 = vld [vmem:[#allocation2 + $0x130] sm:$0xf0]  ;;  %v3024_v38 = vor.u32 %v3488_v14, %v3021_v0  ;;  %v2972_v54 = vor.u32 %v3477_v9, %v2971_v7 }
 0x9b4   :  { %1463 = vmatpush.bf16.msrb.mxu3 %v3064_v13  ;;  %v3028_v12 = vor.u32 %v3490_v37, %v3027_v36  ;;  %v2976_v19 = vor.u32 %v3476_v10, %v2973_v16  ;;  %v3591_v36 = vld [vmem:[%s4356_s14] ss:$0 sm:$0xff] }
 0x9b5   :  { %v1026_v31 = vmul.f32 0.5, %v1022_v41  ;;  %1173 = vmatmul.bf16.vlgmr.msra.gmra.mxu3 %v1031_v42  ;;  %v3007_v41 = vld [vmem:[#allocation2 + $0x108] sm:$0xf]  ;;  %v3486_v42 = vld [vmem:[#allocation2 + $0x110] sm:$0xf0] }
 0x9b6   :  { %1450 = vmatpush.bf16.msra.mxu2 %v3048_v22 }
 0x9b7   :  { %v1030_v44 = vmul.f32 %v1026_v31, %v993_v21  ;;  %v3496_v21 = vld [vmem:[#allocation2 + $0x160] sm:$0xf0]  ;;  %v3485_v31 = vld [vmem:[#allocation2 + $0x10c] sm:$0xf] }
 0x9b8   :  { %v3052_v23 = vor.u32 %v3496_v21, %v3051_v20 }
 0x9b9   :  { %v1032_v45 = vpack.c.bf16 %v1030_v44, %v1028_v43  ;;  %v3008_v43 = vor.u32 %v3486_v42, %v3007_v41  ;;  %v3009_v44 = vld [vmem:[#allocation2 + $0x114] sm:$0xf0]  ;;  %v3592_v42 = vld [vmem:[%s4357_s15] ss:$0 sm:$0xff] }
 0x9ba   :  { %1464 = vmatpush.bf16.msrb.mxu3 %v3052_v23  ;;  %1451 = vmatpush.bf16.msra.mxu2 %v3036_v32 }
 0x9bb   :  { %1187 = vmatmul.bf16.vlgmr.msrb.gmra.mxu0 %v1032_v45  ;;  %v3015_v45 = vld [vmem:[#allocation2 + $0x110] sm:$0xf] }
 0x9be   :  { %1465 = vmatpush.bf16.msrb.mxu3 %v3040_v55  ;;  %1452 = vmatpush.bf16.msra.mxu2 %v3024_v38 }
 0x9c2   :  { %1466 = vmatpush.bf16.msrb.mxu3 %v3028_v12 }
 0xa38   :  { %v1174_v47 = vpop.f32.mrf.mxu3  ;;  %v1188_v48 = vpop.f32.mrf.mxu0 }
 0xa39   :  { %v1175_v49 = vadd.f32 %v3590_v46, %v1174_v47  ;;  %v3012_v47 = vor.u32 %v3485_v31, %v3009_v44 }
 0xa3b   :  { %v1189_v50 = vadd.f32 %v1188_v48, %v1175_v49  ;;  %1453 = vmatpush.bf16.msra.mxu2 %v3012_v47  ;;  %v2995_v49 = vld [vmem:[#allocation2 + $0xf0] sm:$0xf] }
 0xa3d   :  { %v1193_v51 = vadd.f32 %v1189_v50, %v4135_v39  ;;  %v3483_v50 = vld [vmem:[#allocation2 + $0xf8] sm:$0xf0] }
 0xa3f   :  { %1197 = vadd.xlane.f32.xlu1 %v1193_v51 }
 0xa40   :  { %v1176_v52 = vpop.f32.mrf.mxu3  ;;  %v1190_v11 = vpop.f32.mrf.mxu0 }
 0xa41   :  { %v1177_v53 = vadd.f32 %v3590_v46, %v1176_v52  ;;  %v3487_v46 = vld [vmem:[#allocation2 + $0x118] sm:$0xf0]  ;;  %v2996_v52 = vor.u32 %v3483_v50, %v2995_v49 }
 0xa42   :  { %v3016_v48 = vor.u32 %v3487_v46, %v3015_v45 }
 0xa43   :  { %v1191_v57 = vadd.f32 %v1190_v11, %v1177_v53  ;;  %v2997_v53 = vld [vmem:[#allocation2 + $0xfc] sm:$0xf0]  ;;  %v3003_v11 = vld [vmem:[#allocation2 + $0xf8] sm:$0xf] }
 0xa44   :  { %1467 = vmatpush.bf16.msrb.mxu3 %v3016_v48 }
 0xa45   :  { %v1194_v58 = vadd.f32 %v1191_v57, %v4137_v40  ;;  %v3055_v40 = vld [vmem:[#allocation2 + $0x168] sm:$0xf]  ;;  %v3484_v57 = vld [vmem:[#allocation2 + $0x100] sm:$0xf0] }
 0xa46   :  { %v3056_v5 = vor.u32 %v3498_v3, %v3055_v40  ;;  %v2991_v40 = vld [vmem:[#allocation2 + $0xe0] sm:$0xf]  ;;  %v3481_v3 = vld [vmem:[#allocation2 + $0xe8] sm:$0xf0] }
 0xa47   :  { %1199 = vadd.xlane.f32.xlu2 %v1194_v58  ;;  %v2992_v6 = vor.u32 %v3481_v3, %v2991_v40 }
 0xa48   :  { %1435 = vmatpush.bf16.msra.mxu1 %v3056_v5 }
 0xa4c   :  { %1436 = vmatpush.bf16.msra.mxu1 %v3044_v18  ;;  %v3478_v18 = vld [vmem:[#allocation2 + $0xd0] sm:$0xf0] }
 0xa4d   :  { %v2980_v20 = vor.u32 %v3478_v18, %v2979_v17 }
 0xa50   :  { %1437 = vmatpush.bf16.msra.mxu1 %v3032_v27 }
 0xa54   :  { %1438 = vmatpush.bf16.msra.mxu1 %v3020_v56 }
 0xa58   :  { %1439 = vmatpush.bf16.msra.mxu1 %v3008_v43 }
 0xa5c   :  { %1440 = vmatpush.bf16.msra.mxu1 %v2996_v52 }
 0xab2   :  { %v1198_v59 = vpop.xlane.xlu1 %1197 }
 0xab3   :  { %v1201_v60 = vmul.f32 %v1198_v59, %v3978_v8  ;;  %v3004_v59 = vor.u32 %v3484_v57, %v3003_v11 }
 0xab5   :  { %v4150_v61 = vsub.f32 %v1193_v51, %v1201_v60  ;;  %v3482_v51 = vld [vmem:[#allocation2 + $0xf4] sm:$0xf]  ;;  %1468 = vmatpush.bf16.msrb.mxu3 %v3004_v59  ;;  %v2983_v60 = vld [vmem:[#allocation2 + $0xd8] sm:$0xf] }
 0xab7   :  { %v1205_v15 = vmul.f32 %v4150_v61, %v4150_v61 }
 0xab9   :  { %1207 = vadd.xlane.f32.xlu1 %v1205_v15  ;;  %v3480_v15 = vld [vmem:[#allocation2 + $0xe0] sm:$0xf0]  ;;  %1469 = vmatpush.bf16.msrb.mxu3 %v2992_v6 }
 0xaba   :  { %v1200_v62 = vpop.xlane.xlu2 %1199 }
 0xabb   :  { %v1202_v39 = vmul.f32 %v1200_v62, %v3978_v8  ;;  %v3479_v62 = vld [vmem:[#allocation2 + $0xdc] sm:$0xf] }
 0xabd   :  { %v4155_v1 = vsub.f32 %v1194_v58, %v1202_v39  ;;  %v3000_v58 = vor.u32 %v3482_v51, %v2997_v53  ;;  %v2984_v39 = vor.u32 %v3480_v15, %v2983_v60  ;;  %1470 = vmatpush.bf16.msrb.mxu3 %v2980_v20 }
 0xabf   :  { %v1206_v2 = vmul.f32 %v4155_v1, %v4155_v1  ;;  %1454 = vmatpush.bf16.msra.mxu2 %v3000_v58  ;;  %1441 = vmatpush.bf16.msra.mxu1 %v2984_v39 }
 0xac1   :  { %1209 = vadd.xlane.f32.xlu2 %v1206_v2  ;;  %v2985_v2 = vld [vmem:[#allocation2 + $0xe4] sm:$0xf0] }
 0xac2   :  { %v2988_v5 = vor.u32 %v3479_v62, %v2985_v2 }
 0xac3   :  { %1442 = vmatpush.bf16.msra.mxu1 %v2972_v54 }
 0xac4   :  { %1455 = vmatpush.bf16.msra.mxu2 %v2988_v5 }
 0xac8   :  { %1456 = vmatpush.bf16.msra.mxu2 %v2976_v19 }
 0xb2c   :  { %v1208_v4 = vpop.xlane.xlu1 %1207 }
 0xb2d   :  { %v1211_v13 = vmul.f32 %v1208_v4, %v3978_v8 }
 0xb2f   :  { %v1213_v21 = vadd.f32 1e-05, %v1211_v13 }
 0xb31   :  { %3635 = vrsqrt.f32 %v1213_v21  ;;  %vm1221_vm1 = vweird.f32 %v1213_v21 }
 0xb34   :  { %v1210_v22 = vpop.xlane.xlu2 %1209 }
 0xb35   :  { %v1212_v23 = vmul.f32 %v1210_v22, %v3978_v8 }
 0xb37   :  { %v3636_v24 = vpop.eup %3635  ;;  %v1214_v25 = vadd.f32 1e-05, %v1212_v23 }
 0xb38   :  { %v1216_v26 = vmul.f32 %v3636_v24, %v1213_v21  ;;  %vm1222_vm0 = vweird.f32 %v3636_v24 }
 0xb39   :  { %3637 = vrsqrt.f32 %v1214_v25  ;;  %vm1223_vm2 = vmor %vm1221_vm1, %vm1222_vm0  ;;  %vm1231_vm4 = vweird.f32 %v1214_v25 }
 0xb3a   :  { %v1217_v27 = vmul.f32 %v3636_v24, %v1216_v26 }
 0xb3c   :  { %v1218_v28 = vmul.f32 0.5, %v1217_v27 }
 0xb3e   :  { %v1219_v29 = vsub.f32 1.5, %v1218_v28 }
 0xb3f   :  { %v3638_v30 = vpop.eup %3637 }
 0xb40   :  { %v1220_v32 = vmul.f32 %v3636_v24, %v1219_v29  ;;  %v1226_v55 = vmul.f32 %v3638_v30, %v1214_v25  ;;  %vm1232_vm3 = vweird.f32 %v3638_v30 }
 0xb41   :  { %vm1233_vm5 = vmor %vm1231_vm4, %vm1232_vm3 }
 0xb42   :  { %v1227_v34 = vmul.f32 %v3638_v30, %v1226_v55  ;;  %v1224_v35 = vsel %vm1223_vm2, %v3636_v24, %v1220_v32  ;;  %vm2288_vm2 = vcmask 1040384  }
 0xb43   :  { %v1235_v0 = vmul.f32 %v1224_v35, %v4150_v61 }
 0xb44   :  { %v1228_v14 = vmul.f32 0.5, %v1227_v34 }
 0xb45   :  { %v1240_v41 = vmul.f32 %v3591_v36, %v1235_v0 }
 0xb46   :  { %v1229_v56 = vsub.f32 1.5, %v1228_v14 }
 0xb47   :  { %v4169_v43 = vadd.f32 %v3592_v42, %v1240_v41 }
 0xb48   :  { %v1230_v37 = vmul.f32 %v3638_v30, %v1229_v56 }
 0xb4a   :  { %v1234_v38 = vsel %vm1233_vm5, %v3638_v30, %v1230_v37 }
 0xb4b   :  { %v1236_v12 = vmul.f32 %v1234_v38, %v4155_v1  ;;  %v2968_v1 = vld [vmem:[%s4381_s24 + $0x3] sm:$0x7] }
 0xb4c   :  { %v1301_v45 = vperm.slane %v2968_v1, 0  ;;  %v1302_v46 = vperm.slane %v2968_v1, 1  ;;  %v1303_v48 = vperm.slane %v2968_v1, 2  ;;  %v3472_v1 = vld [vmem:[%s4380_s26 + $0x60] sm:$0xff] }
 0xb4d   :  { %v1241_v31 = vmul.f32 %v3591_v36, %v1236_v12 }
 0xb4f   :  { %v4171_v44 = vadd.f32 %v3592_v42, %v1241_v31  ;;  %v3474_v31 = vld [vmem:[%s4380_s26 + $0x70] sm:$0xff] }
 0xb51   :  { %v1264_v61 = vpack.c.bf16 %v4171_v44, %v4169_v43 }
 0xb53   :  { %1443 = vmatmul.bf16.vlgmr.msra.gmra.mxu1 %v1264_v61  ;;  %1457 = vmatmul.bf16.vlgmr.msra.gmra.mxu2 %v1264_v61 }
 0xb54   :  { %1471 = vmatmul.bf16.vlgmr.msrb.gmra.mxu3 %v1264_v61  ;;  %v3473_v61 = vld [vmem:[%s4380_s26 + $0x68] sm:$0xff] }
 0xbd0   :  { %v1444_v47 = vpop.f32.mrf.mxu1 }
 0xbd1   :  { %v1445_v50 = vadd.f32 %v1444_v47, %v1301_v45 }
 0xbd6   :  { %v1458_v49 = vpop.f32.mrf.mxu2 }
 0xbd7   :  { %v1459_v51 = vadd.f32 %v1458_v49, %v1302_v46  ;;  %v1472_v52 = vpop.f32.mrf.mxu3 }
 0xbd8   :  { %v1473_v53 = vadd.f32 %v1472_v52, %v1303_v48  ;;  %v1446_v40 = vpop.f32.mrf.mxu1 }
 0xbd9   :  { %v1477_v11 = vpack.c.bf16 %v1459_v51, %v1445_v50  ;;  %v1447_v5 = vadd.f32 %v1446_v40, %v1301_v45 }
 0xbda   :  { %v1478_v59 = vpack.c.bf16 %v1473_v53, %v1473_v53 }
 0xbdb   :  { %v1537_v57 = vunpack.c.l.b16 %v1477_v11  ;;  %v1482_v58 = vunpack.c.h.b16 %v1477_v11 }
 0xbdc   :  { %v1521_v2 = vsel %vm489_vm8, %v1478_v59, 0  ;;  %v1577_v4 = vunpack.c.l.b16 %v1478_v59 }
 0xbdd   :  { %v1538_v60 = vpack.c.b16 %v1537_v57, %v1537_v57  ;;  %v1483_v15 = vpack.c.b16 %v1482_v58, %v1482_v58 }
 0xbde   :  { %v1460_v62 = vpop.f32.mrf.mxu2  ;;  %v1578_v7 = vpack.c.b16 %v1577_v4, %v1577_v4 }
 0xbdf   :  { %1539 = vrot.lane.b32.xlu2 %v1538_v60, %s3833_s6  ;;  %1541 = vrot.lane.b32.xlu1 %v1483_v15, %s3833_s6  ;;  %v1488_v39 = vsel %vm450_vm7, %v1483_v15, 0  ;;  %v1461_v3 = vadd.f32 %v1460_v62, %v1302_v46  ;;  %v1474_v13 = vpop.f32.mrf.mxu3  ;;  %v3471_v15 = vld [vmem:[%s4380_s26 + $0x58] sm:$0xff]  ;;  %v3470_v62 = vld [vmem:[%s4380_s26 + $0x50] sm:$0xff] }
 0xbe0   :  { %1497 = vmatpush.bf16.xpose.msra.mxu0 %v1488_v39  ;;  %v1475_v16 = vadd.f32 %v1474_v13, %v1303_v48  ;;  %v3469_v39 = vld [vmem:[%s4380_s26 + $0x48] sm:$0xff] }
 0xbe1   :  { %v1479_v6 = vpack.c.bf16 %v1461_v3, %v1447_v5  ;;  %v3468_v5 = vld [vmem:[%s4380_s26 + $0x40] sm:$0xff] }
 0xbe2   :  { %v4185_v17 = vpack.c.bf16 %v1475_v16, %v1475_v16 }
 0xbe3   :  { %v1737_v9 = vunpack.c.l.b16 %v1479_v6  ;;  %v1682_v21 = vunpack.c.h.b16 %v1479_v6 }
 0xbe4   :  { %v1721_v20 = vsel %vm489_vm8, %v4185_v17, 0 }
 0xbe5   :  { %v1738_v10 = vpack.c.b16 %v1737_v9, %v1737_v9  ;;  %v1683_v22 = vpack.c.b16 %v1682_v21, %v1682_v21 }
 0xbe7   :  { %1579 = vrot.lane.b32.xlu2 %v1578_v7, %s3833_s6  ;;  %3065 = vmatmul.msk.bf16.vlgmr.msra.gmra.mxu0 %vm450_vm7, %v1477_v11  ;;  %v1688_v25 = vsel %vm450_vm7, %v1683_v22, 0 }
 0xbe8   :  { %1530 = vmatpush.bf16.msrb.mxu0 %v1521_v2 }
 0xbec   :  { %1672 = vmatpush.bf16.msra.mxu0 %v3471_v15 }
 0xbef   :  { %1739 = vrot.lane.b32.xlu2 %v1738_v10, %s3833_s6 }
 0xbf0   :  { %1673 = vmatpush.bf16.msra.mxu0 %v3470_v62 }
 0xbf4   :  { %1674 = vmatpush.bf16.msra.mxu0 %v3469_v39 }
 0xbf8   :  { %1675 = vmatpush.bf16.msra.mxu0 %v3468_v5 }
 0xc39   :  { %v1540_v54 = vpop.permute.xlu2 %1539 }
 0xc41   :  { %v1580_v18 = vpop.permute.xlu2 %1579 }
 0xc42   :  { %v1585_v19 = vsel %vm489_vm8, %v1580_v18, 0 }
 0xc43   :  { %1594 = vmatpush.bf16.msrb.mxu2 %v1585_v19  ;;  %v3593_v19 = vld [vmem:[%s4349_s7 + $0x1] ss:$0 sm:$0xff] }
 0xc47   :  { %1730 = vmatpush.bf16.msra.mxu2 %v1721_v20 }
 0xc49   :  { %v4199_v36 = vpop.permute.xlu2 %1739 }
 0xc51   :  { %v1542_v23 = vpop.permute.xlu1 %1541 }
 0xc52   :  { %v1547_v24 = vsel %vm450_vm7, %v1542_v23, 0 }
 0xc53   :  { %1556 = vmatpush.bf16.xpose.msrb.mxu1 %v1547_v24 }
 0xc5a   :  { %3067 = vmatmul.msk.bf16.vlgmr.msrb.gmra.mxu1 %vm450_vm7, %v1540_v54 }
 0xc5b   :  { %1697 = vmatpush.bf16.xpose.msra.mxu1 %v1688_v25 }
 0xc64   :  { %v1499_v26 = vpop.f32.mrf.mxu0 }
 0xc65   :  { %v1503_v27 = vmul.f32 0.125, %v1499_v26 }
 0xc67   :  { %v1504_v28 = vadd.f32 %v1503_v27, %v4046_v33 }
 0xc69   :  { %v1505_v29 = vsel %vm473_vm9, %v1504_v28, -inf }
 0xc6a   :  { %3103 = vmatmul.msk.bf16.vlgmr.msra.gmra.mxu1 %vm450_vm7, %v1479_v6  ;;  %1506 = vmax.xlane.f32.xlu2 %v1505_v29 }
 0xc6c   :  { %v1501_v30 = vpop.f32.mrf.mxu0 }
 0xcd7   :  { %v1558_v32 = vpop.f32.mrf.mxu1 }
 0xcd8   :  { %v1562_v55 = vmul.f32 0.125, %v1558_v32 }
 0xcda   :  { %v1563_v34 = vadd.f32 %v1562_v55, %v4046_v33  ;;  %v3475_v33 = vld [vmem:[%s4380_s26 + $0x78] sm:$0xff] }
 0xcdb   :  { %1632 = vmatpush.bf16.msra.mxu3 %v3475_v33  ;;  %1808 = vmatpush.bf16.msrb.mxu1 %v3475_v33 }
 0xcdc   :  { %v1564_v35 = vsel %vm473_vm9, %v1563_v34, -inf }
 0xcdd   :  { %1565 = vmax.xlane.f32.xlu0 %v1564_v35  ;;  %v1507_v37 = vpop.xlane.xlu2 %1506 }
 0xcde   :  { %v1508_v38 = vsub.f32 %v1504_v28, %v1507_v37 }
 0xcdf   :  { %v1560_v14 = vpop.f32.mrf.mxu1  ;;  %1633 = vmatpush.bf16.msra.mxu3 %v3474_v31  ;;  %1809 = vmatpush.bf16.msrb.mxu1 %v3474_v31 }
 0xce0   :  { %v1509_v12 = vmul.f32 1.442695, %v1508_v38 }
 0xce2   :  { %3639 = vpow2.f32 %v1509_v12 }
 0xce3   :  { %1634 = vmatpush.bf16.msra.mxu3 %v3473_v61  ;;  %1810 = vmatpush.bf16.msrb.mxu1 %v3473_v61 }
 0xce7   :  { %v1699_v56 = vpop.f32.mrf.mxu1  ;;  %1635 = vmatpush.bf16.msra.mxu3 %v3472_v1  ;;  %1811 = vmatpush.bf16.msrb.mxu1 %v3472_v1 }
 0xce8   :  { %v3640_v41 = vpop.eup %3639  ;;  %v1703_v49 = vmul.f32 0.125, %v1699_v56 }
 0xce9   :  { %v1511_v42 = vsel %vm473_vm9, %v3640_v41, 0.0 }
 0xcea   :  { %v1704_v51 = vadd.f32 %v1703_v49, %v4080_v63 }
 0xcec   :  { %v1705_v11 = vsel %vm473_vm9, %v1704_v51, -inf }
 0xcef   :  { %v1701_v0 = vpop.f32.mrf.mxu1 }
 0xcf1   :  { %1741 = vrot.lane.b32.xlu0 %v1683_v22, %s3833_s6 }
 0xd1b   :  { %1512 = vadd.xlane.f32.xlu0 %v1511_v42 }
 0xd50   :  { %v1566_v45 = vpop.xlane.xlu0 %1565 }
 0xd51   :  { %v1567_v46 = vsub.f32 %v1563_v34, %v1566_v45 }
 0xd53   :  { %v1568_v47 = vmul.f32 1.442695, %v1567_v46 }
 0xd55   :  { %3641 = vpow2.f32 %v1568_v47 }
 0xd5b   :  { %v3642_v48 = vpop.eup %3641 }
 0xd5c   :  { %v1570_v50 = vsel %vm473_vm9, %v3642_v48, 0.0 }
 0xd5d   :  { %1571 = vadd.xlane.f32.xlu1 %v1570_v50 }
 0xd63   :  { %v1742_v52 = vpop.permute.xlu0 %1741 }
 0xd64   :  { %v1747_v53 = vsel %vm450_vm7, %v1742_v52, 0 }
 0xd65   :  { %1756 = vmatpush.bf16.xpose.msrb.mxu3 %v1747_v53  ;;  %1706 = vmax.xlane.f32.xlu1 %v1705_v11 }
 0xd8e   :  { %v1513_v57 = vpop.xlane.xlu0 %1512 }
 0xd8f   :  { %3643 = vrcp.f32 %v1513_v57 }
 0xd95   :  { %v3644_v58 = vpop.eup %3643 }
 0xd96   :  { %v1515_v59 = vmul.f32 %v3644_v58, %v3640_v41 }
 0xd98   :  { %v1516_v60 = vpack.c.bf16 %v1515_v59, %v1515_v59 }
 0xd9a   :  { %3066 = vmatmul.msk.bf16.vlgmr.msrb.gmra.mxu0 %vm473_vm9, %v1516_v60 }
 0xdd0   :  { %v1572_v2 = vpop.xlane.xlu1 %1571 }
 0xdd1   :  { %3645 = vrcp.f32 %v1572_v2 }
 0xdd7   :  { %v3646_v40 = vpop.eup %3645 }
 0xdd8   :  { %v1574_v3 = vmul.f32 %v3646_v40, %v3642_v48  ;;  %v1707_v25 = vpop.xlane.xlu1 %1706  ;;  %v3171_v40 = vld [vmem:[#allocation5 + $0xf0] sm:$0xf] }
 0xdd9   :  { %v1708_v26 = vsub.f32 %v1704_v51, %v1707_v25 }
 0xdda   :  { %v1575_v4 = vpack.c.bf16 %v1574_v3, %v1574_v3  ;;  %v3515_v3 = vld [vmem:[#allocation5 + $0xf4] sm:$0xf0] }
 0xddb   :  { %v1709_v27 = vmul.f32 1.442695, %v1708_v26  ;;  %v3157_v26 = vld [vmem:[#allocation5 + $0xd8] sm:$0xf0] }
 0xddc   :  { %3068 = vmatmul.msk.bf16.vlgmr.msrb.gmra.mxu2 %vm473_vm9, %v1575_v4  ;;  %v3514_v4 = vld [vmem:[#allocation5 + $0xf4] sm:$0xf] }
 0xddd   :  { %1824 = vmatpush.bf16.msrb.mxu2 %v3471_v15  ;;  %3647 = vpow2.f32 %v1709_v27 }
 0xde1   :  { %1825 = vmatpush.bf16.msrb.mxu2 %v3470_v62 }
 0xde3   :  { %v3648_v34 = vpop.eup %3647 }
 0xde4   :  { %v1711_v35 = vsel %vm473_vm9, %v3648_v34, 0.0 }
 0xde5   :  { %1826 = vmatpush.bf16.msrb.mxu2 %v3469_v39 }
 0xde9   :  { %1827 = vmatpush.bf16.msrb.mxu2 %v3468_v5  ;;  %v3172_v5 = vor.u32 %v3515_v3, %v3171_v40 }
 0xe17   :  { %v1532_v6 = vpop.f32.mrf.mxu0 }
 0xe18   :  { %v1536_v7 = vpack.c.bf16 %v1532_v6, %v1532_v6  ;;  %v3173_v6 = vld [vmem:[#allocation5 + $0xf8] sm:$0xf0] }
 0xe1a   :  { %3102 = vmatmul.msk.bf16.vlgmr.msra.gmra.mxu0 %vm450_vm7, %v1536_v7  ;;  %v3176_v7 = vor.u32 %v3514_v4, %v3173_v6 }
 0xe1f   :  { %v1534_v9 = vpop.f32.mrf.mxu0 }
 0xe5f   :  { %v1596_v10 = vpop.f32.mrf.mxu2 }
 0xe60   :  { %v1600_v13 = vpack.c.bf16 %v1596_v10, %v1596_v10 }
 0xe62   :  { %3085 = vmatmul.msk.bf16.vlgmr.msra.gmra.mxu3 %vm450_vm7, %v1600_v13 }
 0xe63   :  { %2001 = vmatpush.bf16.msra.mxu3 %v3172_v5 }
 0xe67   :  { %v1598_v54 = vpop.f32.mrf.mxu2 }
 0xe72   :  { %3105 = vmatmul.msk.bf16.vlgmr.msrb.gmra.mxu3 %vm450_vm7, %v4199_v36 }
 0xe97   :  { %v1677_v16 = vpop.f32.mrf.mxu0 }
 0xe9f   :  { %v1679_v18 = vpop.f32.mrf.mxu0 }
 0xea0   :  { %v3512_v18 = vld [vmem:[#allocation5 + $0xe4] sm:$0xf] }
 0xee5   :  { %v1637_v20 = vpop.f32.mrf.mxu3 }
 0xee6   :  { %v1678_v21 = vadd.f32 %v1677_v16, %v1637_v20  ;;  %v3513_v16 = vld [vmem:[#allocation5 + $0xe4] sm:$0xf0]  ;;  %v3165_v20 = vld [vmem:[#allocation5 + $0xe8] sm:$0xf0] }
 0xee8   :  { %v1838_v22 = vadd.f32 %v3593_v19, %v1678_v21  ;;  %v3168_v21 = vor.u32 %v3512_v18, %v3165_v20 }
 0xeea   :  { %v1840_v23 = vadd.f32 %v1838_v22, %v4169_v43  ;;  %v1777_v43 = vunpack.c.l.b16 %v4185_v17  ;;  %v3155_v22 = vld [vmem:[#allocation5 + $0xd0] sm:$0xf] }
 0xeec   :  { %1846 = vadd.xlane.f32.xlu0 %v1840_v23  ;;  %v1778_v14 = vpack.c.b16 %v1777_v43, %v1777_v43 }
 0xeed   :  { %v1639_v24 = vpop.f32.mrf.mxu3 }
 0xeee   :  { %v3510_v24 = vld [vmem:[#allocation5 + $0xd4] sm:$0xf] }
 0xef5   :  { %v1758_v28 = vpop.f32.mrf.mxu3 }
 0xef6   :  { %v1762_v29 = vmul.f32 0.125, %v1758_v28  ;;  %v3160_v28 = vor.u32 %v3510_v24, %v3157_v26  ;;  %v3530_v26 = vld [vmem:[#allocation7 + $0xf0] sm:$0xff] }
 0xef8   :  { %v1763_v30 = vadd.f32 %v1762_v29, %v4080_v63  ;;  %v3147_v29 = vld [vmem:[#allocation5 + $0xc0] sm:$0xf] }
 0xefa   :  { %v1764_v32 = vsel %vm473_vm9, %v1763_v30, -inf }
 0xefb   :  { %1765 = vmax.xlane.f32.xlu1 %v1764_v32  ;;  %v3508_v32 = vld [vmem:[#allocation5 + $0xc4] sm:$0xf] }
 0xefd   :  { %v1760_v55 = vpop.f32.mrf.mxu3 }
 0xf03   :  { %1712 = vadd.xlane.f32.xlu1 %v1711_v35  ;;  %v3149_v35 = vld [vmem:[#allocation5 + $0xc8] sm:$0xf0] }
 0xf04   :  { %v3152_v43 = vor.u32 %v3508_v32, %v3149_v35  ;;  %v3527_v32 = vld [vmem:[#allocation7 + $0xd8] sm:$0xff]  ;;  %v3112_v35 = vld [vmem:[%s4353_s11 + $0x2] sm:$0x3] }
 0xf1c   :  { %1779 = vrot.lane.b32.xlu1 %v1778_v14, %s3833_s6  ;;  %v3139_v14 = vld [vmem:[#allocation5 + $0xb0] sm:$0xf] }
 0xf5f   :  { %v1847_v56 = vpop.xlane.xlu0 %1846 }
 0xf60   :  { %v1850_v0 = vmul.f32 %v1847_v56, %v3978_v8  ;;  %v3507_v56 = vld [vmem:[#allocation5 + $0xb4] sm:$0xf0] }
 0xf62   :  { %v4246_v36 = vsub.f32 %v1840_v23, %v1850_v0  ;;  %v3511_v23 = vld [vmem:[#allocation5 + $0xd4] sm:$0xf0]  ;;  %v3506_v0 = vld [vmem:[#allocation5 + $0xb4] sm:$0xf] }
 0xf63   :  { %v3156_v25 = vor.u32 %v3511_v23, %v3155_v22 }
 0xf64   :  { %v1854_v63 = vmul.f32 %v4246_v36, %v4246_v36 }
 0xf66   :  { %1856 = vadd.xlane.f32.xlu0 %v1854_v63 }
 0xf6e   :  { %v1766_v37 = vpop.xlane.xlu1 %1765 }
 0xf6f   :  { %v1767_v38 = vsub.f32 %v1763_v30, %v1766_v37  ;;  %v3509_v30 = vld [vmem:[#allocation5 + $0xc4] sm:$0xf0]  ;;  %v3140_v37 = vor.u32 %v3507_v56, %v3139_v14  ;;  %v1918_v56 = vperm.slane %v3112_v35, 1 }
 0xf70   :  { %v3525_v14 = vld [vmem:[#allocation7 + $0xc8] sm:$0xff] }
 0xf71   :  { %v1768_v12 = vmul.f32 1.442695, %v1767_v38  ;;  %v3141_v38 = vld [vmem:[#allocation5 + $0xb8] sm:$0xf0] }
 0xf73   :  { %3649 = vpow2.f32 %v1768_v12  ;;  %v3144_v12 = vor.u32 %v3506_v0, %v3141_v38  ;;  %v3518_v0 = vld [vmem:[#allocation7 + $0x90] sm:$0xff] }
 0xf76   :  { %v1713_v41 = vpop.xlane.xlu1 %1712 }
 0xf77   :  { %3651 = vrcp.f32 %v1713_v41  ;;  %v3131_v41 = vld [vmem:[#allocation5 + $0xa0] sm:$0xf] }
 0xf79   :  { %v3650_v42 = vpop.eup %3649 }
 0xf7a   :  { %v1770_v17 = vsel %vm473_vm9, %v3650_v42, 0.0 }
 0xf7b   :  { %1771 = vadd.xlane.f32.xlu2 %v1770_v17  ;;  %v3504_v17 = vld [vmem:[#allocation5 + $0xa4] sm:$0xf] }
 0xf7d   :  { %v3652_v33 = vpop.eup %3651 }
 0xf7e   :  { %v1715_v31 = vmul.f32 %v3652_v33, %v3648_v34  ;;  %v3148_v34 = vor.u32 %v3509_v30, %v3147_v29  ;;  %v3528_v29 = vld [vmem:[#allocation7 + $0xe0] sm:$0xff]  ;;  %v3521_v30 = vld [vmem:[#allocation7 + $0xa8] sm:$0xff] }
 0xf80   :  { %v1716_v61 = vpack.c.bf16 %v1715_v31, %v1715_v31  ;;  %v3133_v31 = vld [vmem:[#allocation5 + $0xa8] sm:$0xf0] }
 0xf82   :  { %3104 = vmatmul.msk.bf16.vlgmr.msra.gmra.mxu2 %vm473_vm9, %v1716_v61  ;;  %v3136_v61 = vor.u32 %v3504_v17, %v3133_v31  ;;  %v3516_v31 = vld [vmem:[#allocation7 + $0x80] sm:$0xff] }
 0xf8e   :  { %v1780_v1 = vpop.permute.xlu1 %1779 }
 0xf8f   :  { %v1785_v45 = vsel %vm489_vm8, %v1780_v1, 0  ;;  %v3123_v1 = vld [vmem:[#allocation5 + $0x90] sm:$0xf] }
 0xf90   :  { %1794 = vmatpush.bf16.msrb.mxu0 %v1785_v45  ;;  %v3503_v45 = vld [vmem:[#allocation5 + $0x94] sm:$0xf0] }
 0xf94   :  { %2015 = vmatpush.bf16.msra.mxu0 %v3176_v7 }
 0xf98   :  { %2016 = vmatpush.bf16.msra.mxu0 %v3168_v21  ;;  %v3595_v21 = vld [vmem:[%s4351_s9 + $0x1] ss:$0 sm:$0xff] }
 0xf9c   :  { %2017 = vmatpush.bf16.msra.mxu0 %v3160_v28  ;;  %v3522_v28 = vld [vmem:[#allocation7 + $0xb0] sm:$0xff] }
 0xfa0   :  { %2018 = vmatpush.bf16.msra.mxu0 %v3152_v43  ;;  %v3519_v43 = vld [vmem:[#allocation7 + $0x98] sm:$0xff] }
 0xfa4   :  { %2019 = vmatpush.bf16.msra.mxu0 %v3144_v12  ;;  %v3517_v12 = vld [vmem:[#allocation7 + $0x88] sm:$0xff] }
 0xfa8   :  { %2020 = vmatpush.bf16.msra.mxu0 %v3136_v61 }
 0xfd9   :  { %v1857_v27 = vpop.xlane.xlu0 %1856 }
 0xfda   :  { %v1860_v55 = vmul.f32 %v1857_v27, %v3978_v8  ;;  %v3529_v27 = vld [vmem:[#allocation7 + $0xe8] sm:$0xff] }
 0xfdc   :  { %v1862_v63 = vadd.f32 1e-05, %v1860_v55  ;;  %v3520_v55 = vld [vmem:[#allocation7 + $0xa0] sm:$0xff] }
 0xfee   :  { %v1772_v46 = vpop.xlane.xlu2 %1771 }
 0xfef   :  { %3653 = vrcp.f32 %v1772_v46  ;;  %v3502_v46 = vld [vmem:[#allocation5 + $0x94] sm:$0xf] }
 0xff0   :  { %3655 = vrsqrt.f32 %v1862_v63 }
 0xff5   :  { %v3654_v47 = vpop.eup %3653 }
 0xff6   :  { %v1774_v48 = vmul.f32 %v3654_v47, %v3650_v42  ;;  %v3505_v42 = vld [vmem:[#allocation5 + $0xa4] sm:$0xf0]  ;;  %v3124_v47 = vor.u32 %v3503_v45, %v3123_v1 }
 0xff7   :  { %v3132_v33 = vor.u32 %v3505_v42, %v3131_v41  ;;  %v1917_v42 = vperm.slane %v3112_v35, 0 }
 0xff8   :  { %v1775_v49 = vpack.c.bf16 %v1774_v48, %v1774_v48  ;;  %v3125_v48 = vld [vmem:[#allocation5 + $0x98] sm:$0xf0] }
 0xffa   :  { %3106 = vmatmul.msk.bf16.vlgmr.msrb.gmra.mxu0 %vm473_vm9, %v1775_v49  ;;  %v3115_v49 = vld [vmem:[#allocation5 + $0x80] sm:$0xf] }
0x1005   :  { %v1732_v50 = vpop.f32.mrf.mxu2 }
0x1006   :  { %v1736_v51 = vpack.c.bf16 %v1732_v50, %v1732_v50  ;;  %v3501_v50 = vld [vmem:[#allocation5 + $0x84] sm:$0xf0] }
0x1008   :  { %3108 = vmatmul.msk.bf16.vlgmr.msrb.gmra.mxu2 %vm450_vm7, %v1736_v51  ;;  %v3128_v51 = vor.u32 %v3502_v46, %v3125_v48 }
0x100a   :  { %2021 = vmatpush.bf16.msra.mxu0 %v3128_v51 }
0x100d   :  { %v1734_v52 = vpop.f32.mrf.mxu2 }
0x100e   :  { %v3500_v52 = vld [vmem:[#allocation5 + $0x84] sm:$0xf] }
0x1077   :  { %v1796_v53 = vpop.f32.mrf.mxu0 }
0x1078   :  { %v1800_v11 = vpack.c.bf16 %v1796_v53, %v1796_v53  ;;  %v3117_v53 = vld [vmem:[#allocation5 + $0x88] sm:$0xf0] }
0x107a   :  { %3107 = vmatmul.msk.bf16.vlgmr.msrb.gmra.mxu1 %vm450_vm7, %v1800_v11  ;;  %v3656_v11 = vpop.eup %3655  ;;  %vm1870_vm7 = vweird.f32 %v1862_v63 }
0x107b   :  { %vm1871_vm6 = vweird.f32 %v3656_v11 }
0x107c   :  { %vm1872_vm8 = vmor %vm1870_vm7, %vm1871_vm6 }
0x107f   :  { %v1798_v57 = vpop.f32.mrf.mxu0 }
0x1080   :  { %v3116_v57 = vor.u32 %v3501_v50, %v3115_v49 }
0x108b   :  { %v1829_v58 = vpop.f32.mrf.mxu2 }
0x1093   :  { %v1831_v59 = vpop.f32.mrf.mxu2 }
0x1094   :  { %v1865_v59 = vmul.f32 %v3656_v11, %v1862_v63 }
0x10f7   :  { %v1813_v60 = vpop.f32.mrf.mxu1 }
0x10f8   :  { %v1830_v15 = vadd.f32 %v1829_v58, %v1813_v60  ;;  %v3120_v58 = vor.u32 %v3500_v52, %v3117_v53  ;;  %v1866_v60 = vmul.f32 %v3656_v11, %v1865_v59 }
0x10fa   :  { %v1839_v62 = vadd.f32 %v3593_v19, %v1830_v15  ;;  %2022 = vmatpush.bf16.msra.mxu0 %v3120_v58 }
0x10fc   :  { %v1841_v39 = vadd.f32 %v1839_v62, %v4171_v44  ;;  %v3163_v44 = vld [vmem:[#allocation5 + $0xe0] sm:$0xf] }
0x10fd   :  { %v3164_v19 = vor.u32 %v3513_v16, %v3163_v44  ;;  %v3594_v44 = vld [vmem:[%s4350_s8 + $0x1] ss:$0 sm:$0xff] }
0x10fe   :  { %1848 = vadd.xlane.f32.xlu2 %v1841_v39 }
0x10ff   :  { %v1815_v2 = vpop.f32.mrf.mxu1  ;;  %2002 = vmatpush.bf16.msra.mxu3 %v3164_v19 }
0x1100   :  { %v1867_v2 = vmul.f32 0.5, %v1866_v60 }
0x1102   :  { %v1868_v40 = vsub.f32 1.5, %v1867_v2 }
0x1103   :  { %2003 = vmatpush.bf16.msra.mxu3 %v3156_v25  ;;  %v3531_v25 = vld [vmem:[#allocation7 + $0xf8] sm:$0xff] }
0x1104   :  { %v1869_v4 = vmul.f32 %v3656_v11, %v1868_v40  ;;  %2215 = vmatpush.bf16.msra.mxu2 %v3531_v25 }
0x1106   :  { %v1873_v7 = vsel %vm1872_vm8, %v3656_v11, %v1869_v4 }
0x1107   :  { %2004 = vmatpush.bf16.msra.mxu3 %v3148_v34  ;;  %v3526_v34 = vld [vmem:[#allocation7 + $0xd0] sm:$0xff] }
0x1108   :  { %2216 = vmatpush.bf16.msra.mxu2 %v3530_v26 }
0x110b   :  { %2005 = vmatpush.bf16.msra.mxu3 %v3140_v37  ;;  %v3524_v37 = vld [vmem:[#allocation7 + $0xc0] sm:$0xff] }
0x110c   :  { %2217 = vmatpush.bf16.msra.mxu2 %v3529_v27 }
0x110f   :  { %2006 = vmatpush.bf16.msra.mxu3 %v3132_v33 }
0x1110   :  { %2218 = vmatpush.bf16.msra.mxu2 %v3528_v29 }
0x1113   :  { %2007 = vmatpush.bf16.msra.mxu3 %v3124_v47 }
0x1114   :  { %2219 = vmatpush.bf16.msra.mxu2 %v3527_v32 }
0x1117   :  { %2008 = vmatpush.bf16.msra.mxu3 %v3116_v57 }
0x1118   :  { %2220 = vmatpush.bf16.msra.mxu2 %v3526_v34 }
0x111c   :  { %2221 = vmatpush.bf16.msra.mxu2 %v3525_v14 }
0x1120   :  { %2222 = vmatpush.bf16.msra.mxu2 %v3524_v37 }
0x1171   :  { %v1849_v9 = vpop.xlane.xlu2 %1848 }
0x1172   :  { %v1851_v10 = vmul.f32 %v1849_v9, %v3978_v8 }
0x1174   :  { %v4258_v13 = vsub.f32 %v1841_v39, %v1851_v10 }
0x1176   :  { %v1855_v54 = vmul.f32 %v4258_v13, %v4258_v13 }
0x1178   :  { %1858 = vadd.xlane.f32.xlu2 %v1855_v54  ;;  %v1884_v54 = vmul.f32 %v1873_v7, %v4246_v36 }
0x117a   :  { %v1889_v20 = vmul.f32 %v3594_v44, %v1884_v54 }
0x117c   :  { %v4272_v23 = vadd.f32 %v3595_v21, %v1889_v20 }
0x11eb   :  { %v1859_v15 = vpop.xlane.xlu2 %1858 }
0x11ec   :  { %v1861_v62 = vmul.f32 %v1859_v15, %v3978_v8 }
0x11ee   :  { %v1863_v39 = vadd.f32 1e-05, %v1861_v62 }
0x11f0   :  { %3657 = vrsqrt.f32 %v1863_v39  ;;  %vm1880_vm10 = vweird.f32 %v1863_v39 }
0x11f6   :  { %v3658_v3 = vpop.eup %3657 }
0x11f7   :  { %v1875_v5 = vmul.f32 %v3658_v3, %v1863_v39  ;;  %vm1881_vm9 = vweird.f32 %v3658_v3 }
0x11f8   :  { %vm1882_vm11 = vmor %vm1880_vm10, %vm1881_vm9 }
0x11f9   :  { %v1876_v6 = vmul.f32 %v3658_v3, %v1875_v5 }
0x11fb   :  { %v1877_v9 = vmul.f32 0.5, %v1876_v6 }
0x11fd   :  { %v1878_v10 = vsub.f32 1.5, %v1877_v9 }
0x11ff   :  { %v1879_v16 = vmul.f32 %v3658_v3, %v1878_v10 }
0x1201   :  { %v1883_v18 = vsel %vm1882_vm11, %v3658_v3, %v1879_v16 }
0x1202   :  { %v1885_v19 = vmul.f32 %v1883_v18, %v4258_v13  ;;  %v3523_v13 = vld [vmem:[#allocation7 + $0xb8] sm:$0xff] }
0x1203   :  { %2201 = vmatpush.bf16.msra.mxu1 %v3523_v13 }
0x1204   :  { %v1890_v22 = vmul.f32 %v3594_v44, %v1885_v19 }
0x1206   :  { %v4274_v24 = vadd.f32 %v3595_v21, %v1890_v22 }
0x1207   :  { %2202 = vmatpush.bf16.msra.mxu1 %v3522_v28  ;;  %v3596_v28 = vld [vmem:[%s4355_s13 + $0x1] ss:$0 sm:$0xff]  ;;  %s4383_s13 = sld [smem:[#allocation23_spill]] }
0x1208   :  { %v1896_v36 = vpack.c.bf16 %v4274_v24, %v4272_v23 }
0x120a   :  { %2009 = vmatmul.bf16.vlgmr.msra.gmra.mxu3 %v1896_v36  ;;  %2023 = vmatmul.bf16.vlgmr.msra.gmra.mxu0 %v1896_v36 }
0x120b   :  { %2203 = vmatpush.bf16.msra.mxu1 %v3521_v30 }
0x120d   :  { %s2672_s25 = sshll.u32 %s4383_s13, 4  ;;  %s2673_s25 = int_to_ptr.hbm [resolvable:$true] %s2672_s25 }
0x120f   :  { %2204 = vmatpush.bf16.msra.mxu1 %v3520_v55 }
0x1213   :  { %2205 = vmatpush.bf16.msra.mxu1 %v3519_v43 }
0x1217   :  { %2206 = vmatpush.bf16.msra.mxu1 %v3518_v0 }
0x121b   :  { %2207 = vmatpush.bf16.msra.mxu1 %v3517_v12 }
0x121f   :  { %2208 = vmatpush.bf16.msra.mxu1 %v3516_v31  ;;  %v3537_v31 = vld [vmem:[%s4358_s16 + $0x28] sm:$0xff] }
0x1287   :  { %v2024_v63 = vpop.f32.mrf.mxu0 }
0x1288   :  { %v2025_v38 = vadd.f32 %v2024_v63, %v1918_v56 }
0x128a   :  { %v2030_v41 = vmul.f32 %v2025_v38, %v2025_v38 }
0x128c   :  { %v2034_v17 = vmul.f32 %v2030_v41, %v2025_v38 }
0x128d   :  { %v2010_v33 = vpop.f32.mrf.mxu3 }
0x128e   :  { %v2038_v61 = vmul.f32 0.044715, %v2034_v17  ;;  %v2011_v1 = vadd.f32 %v2010_v33, %v1917_v42  ;;  %v3538_v33 = vld [vmem:[%s4358_s16 + $0x30] sm:$0xff] }
0x128f   :  { %v2026_v45 = vpop.f32.mrf.mxu0 }
0x1290   :  { %v2042_v46 = vadd.f32 %v2038_v61, %v2025_v38  ;;  %v2029_v47 = vmul.f32 %v2011_v1, %v2011_v1  ;;  %v2027_v48 = vadd.f32 %v2026_v45, %v1918_v56  ;;  %v3536_v61 = vld [vmem:[%s4358_s16 + $0x20] sm:$0xff]  ;;  %v3534_v45 = vld [vmem:[%s4358_s16 + $0x10] sm:$0xff] }
0x1292   :  { %v2046_v49 = vmul.f32 0.7978846, %v2042_v46  ;;  %v2033_v50 = vmul.f32 %v2029_v47, %v2011_v1  ;;  %v2032_v51 = vmul.f32 %v2027_v48, %v2027_v48 }
0x1294   :  { %v2037_v52 = vmul.f32 0.044715, %v2033_v50  ;;  %v2036_v53 = vmul.f32 %v2032_v51, %v2027_v48  ;;  %3659 = vtanh.f32 %v2046_v49  ;;  %v3532_v50 = vld [vmem:[%s4358_s16] sm:$0xff] }
0x1295   :  { %v2012_v11 = vpop.f32.mrf.mxu3 }
0x1296   :  { %v2041_v57 = vadd.f32 %v2037_v52, %v2011_v1  ;;  %v2040_v58 = vmul.f32 0.044715, %v2036_v53  ;;  %v2013_v59 = vadd.f32 %v2012_v11, %v1917_v42  ;;  %v3334_v53 = vld [vmem:[#allocation8 + $0x70] sm:$0xf]  ;;  %v3555_v11 = vld [vmem:[#allocation8 + $0x74] sm:$0xf0] }
0x1298   :  { %v2045_v60 = vmul.f32 0.7978846, %v2041_v57  ;;  %v2044_v15 = vadd.f32 %v2040_v58, %v2027_v48  ;;  %v2031_v62 = vmul.f32 %v2013_v59, %v2013_v59  ;;  %v3554_v57 = vld [vmem:[#allocation8 + $0x74] sm:$0xf] }
0x129a   :  { %v2048_v39 = vmul.f32 0.7978846, %v2044_v15  ;;  %v2035_v2 = vmul.f32 %v2031_v62, %v2013_v59  ;;  %3661 = vtanh.f32 %v2045_v60  ;;  %v3660_v40 = vpop.eup %3659  ;;  %v3335_v60 = vor.u32 %v3555_v11, %v3334_v53  ;;  %v3336_v15 = vld [vmem:[#allocation8 + $0x78] sm:$0xf0]  ;;  %v3326_v62 = vld [vmem:[#allocation8 + $0x60] sm:$0xf] }
0x129b   :  { %v2054_v5 = vadd.f32 1.0, %v3660_v40  ;;  %v3553_v40 = vld [vmem:[#allocation8 + $0x64] sm:$0xf0]  ;;  %v3542_v53 = vld [vmem:[#allocation8 + $0x14] sm:$0xf] }
0x129c   :  { %3663 = vtanh.f32 %v2048_v39  ;;  %v2039_v3 = vmul.f32 0.044715, %v2035_v2  ;;  %v3339_v2 = vor.u32 %v3554_v57, %v3336_v15  ;;  %2476 = vmatpush.bf16.msrb.mxu0 %v3335_v60  ;;  %v3288_v57 = vld [vmem:[#allocation8 + $0x18] sm:$0xf0]  ;;  %v3541_v60 = vld [vmem:[#allocation8 + $0x4] sm:$0xf0] }
0x129d   :  { %v2058_v10 = vmul.f32 0.5, %v2054_v5  ;;  %v3327_v5 = vor.u32 %v3553_v40, %v3326_v62  ;;  %v3540_v15 = vld [vmem:[#allocation8 + $0x4] sm:$0xf]  ;;  %v3563_v40 = vld [vmem:[#allocation10 + $0x38] sm:$0xff] }
0x129e   :  { %v2043_v4 = vadd.f32 %v2039_v3, %v2013_v59  ;;  %v3552_v3 = vld [vmem:[#allocation8 + $0x64] sm:$0xf]  ;;  %2489 = vmatpush.bf16.msrb.mxu1 %v3339_v2  ;;  %2638 = vmatpush.bf16.msrb.mxu2 %v3563_v40 }
0x129f   :  { %v2062_v18 = vmul.f32 %v2058_v10, %v2025_v38  ;;  %v3550_v10 = vld [vmem:[#allocation8 + $0x54] sm:$0xf] }
0x12a0   :  { %v2047_v6 = vmul.f32 0.7978846, %v2043_v4  ;;  %v3662_v7 = vpop.eup %3661  ;;  %v3328_v4 = vld [vmem:[#allocation8 + $0x68] sm:$0xf0]  ;;  %2477 = vmatpush.bf16.msrb.mxu0 %v3327_v5  ;;  %v3570_v5 = vld [vmem:[#allocation10 + $0x70] sm:$0xff] }
0x12a1   :  { %v2053_v44 = vadd.f32 1.0, %v3662_v7  ;;  %v3331_v7 = vor.u32 %v3552_v3, %v3328_v4  ;;  %v3571_v3 = vld [vmem:[#allocation10 + $0x78] sm:$0xff]  ;;  %v3562_v4 = vld [vmem:[#allocation10 + $0x30] sm:$0xff] }
0x12a2   :  { %v3664_v9 = vpop.eup %3663  ;;  %3665 = vtanh.f32 %v2047_v6  ;;  %2639 = vmatpush.bf16.msrb.mxu2 %v3562_v4 }
0x12a3   :  { %v2056_v54 = vadd.f32 1.0, %v3664_v9  ;;  %v2057_v21 = vmul.f32 0.5, %v2053_v44  ;;  %v3551_v9 = vld [vmem:[#allocation8 + $0x54] sm:$0xf0]  ;;  %2490 = vmatpush.bf16.msrb.mxu1 %v3331_v7  ;;  %v3569_v7 = vld [vmem:[#allocation10 + $0x68] sm:$0xff] }
0x12a5   :  { %v2060_v16 = vmul.f32 0.5, %v2056_v54  ;;  %v2061_v26 = vmul.f32 %v2057_v21, %v2011_v1  ;;  %v3535_v1 = vld [vmem:[%s4358_s16 + $0x18] sm:$0xff]  ;;  %v3549_v21 = vld [vmem:[#allocation8 + $0x44] sm:$0xf0] }
0x12a6   :  { %v3320_v54 = vld [vmem:[#allocation8 + $0x58] sm:$0xf0] }
0x12a7   :  { %v2064_v19 = vmul.f32 %v2060_v16, %v2027_v48  ;;  %v3533_v48 = vld [vmem:[%s4358_s16 + $0x8] sm:$0xff] }
0x12a8   :  { %v3666_v20 = vpop.eup %3665 }
0x12a9   :  { %v2055_v22 = vadd.f32 1.0, %v3666_v20  ;;  %v2066_v36 = vpack.c.bf16 %v2064_v19, %v2062_v18  ;;  %v3323_v19 = vor.u32 %v3550_v10, %v3320_v54  ;;  %v3310_v20 = vld [vmem:[#allocation8 + $0x40] sm:$0xf]  ;;  %v3559_v10 = vld [vmem:[#allocation10 + $0x18] sm:$0xff] }
0x12aa   :  { %v3567_v54 = vld [vmem:[#allocation10 + $0x58] sm:$0xff] }
0x12ab   :  { %v2059_v25 = vmul.f32 0.5, %v2055_v22  ;;  %2223 = vmatmul.bf16.vlgmr.msra.gmra.mxu2 %v2066_v36  ;;  %v3548_v36 = vld [vmem:[#allocation8 + $0x44] sm:$0xf]  ;;  %2491 = vmatpush.bf16.msrb.mxu1 %v3323_v19 }
0x12ad   :  { %v2063_v13 = vmul.f32 %v2059_v25, %v2013_v59  ;;  %v3312_v25 = vld [vmem:[#allocation8 + $0x48] sm:$0xf0] }
0x12af   :  { %v2065_v27 = vpack.c.bf16 %v2063_v13, %v2061_v26  ;;  %v3311_v13 = vor.u32 %v3549_v21, %v3310_v20 }
0x12b1   :  { %2209 = vmatmul.bf16.vlgmr.msra.gmra.mxu1 %v2065_v27 }
0x132e   :  { %v2210_v29 = vpop.f32.mrf.mxu1  ;;  %v2224_v30 = vpop.f32.mrf.mxu2 }
0x132f   :  { %v2211_v32 = vadd.f32 %v3596_v28, %v2210_v29  ;;  %v3315_v29 = vor.u32 %v3548_v36, %v3312_v25  ;;  %v3557_v25 = vld [vmem:[#allocation10 + $0x8] sm:$0xff] }
0x1331   :  { %v2225_v55 = vadd.f32 %v2224_v30, %v2211_v32  ;;  %v3302_v30 = vld [vmem:[#allocation8 + $0x30] sm:$0xf]  ;;  %v3547_v32 = vld [vmem:[#allocation8 + $0x34] sm:$0xf0]  ;;  %2492 = vmatpush.bf16.msrb.mxu1 %v3315_v29 }
0x1333   :  { %v2229_v34 = vadd.f32 %v2225_v55, %v4272_v23  ;;  %v3546_v55 = vld [vmem:[#allocation8 + $0x34] sm:$0xf] }
0x1335   :  { %2235 = vadd.xlane.f32.xlu2 %v2229_v34 }
0x1336   :  { %v2212_v35 = vpop.f32.mrf.mxu1  ;;  %v2226_v14 = vpop.f32.mrf.mxu2 }
0x1337   :  { %v2213_v43 = vadd.f32 %v3596_v28, %v2212_v35 }
0x1339   :  { %v2227_v56 = vadd.f32 %v2226_v14, %v2213_v43  ;;  %v3303_v43 = vor.u32 %v3547_v32, %v3302_v30 }
0x133b   :  { %v2230_v0 = vadd.f32 %v2227_v56, %v4274_v24  ;;  %v3539_v24 = vld [vmem:[%s4358_s16 + $0x38] sm:$0xff] }
0x133c   :  { %2359 = vmatpush.bf16.msrb.mxu3 %v3539_v24 }
0x133d   :  { %2237 = vadd.xlane.f32.xlu0 %v2230_v0 }
0x1340   :  { %2360 = vmatpush.bf16.msrb.mxu3 %v3538_v33  ;;  %v3598_v33 = vld [vmem:[%s4357_s15 + $0x1] ss:$0 sm:$0xff] }
0x1344   :  { %2361 = vmatpush.bf16.msrb.mxu3 %v3537_v31 }
0x1348   :  { %2362 = vmatpush.bf16.msrb.mxu3 %v3536_v61 }
0x134c   :  { %2363 = vmatpush.bf16.msrb.mxu3 %v3535_v1 }
0x1350   :  { %2364 = vmatpush.bf16.msrb.mxu3 %v3534_v45 }
0x1354   :  { %2365 = vmatpush.bf16.msrb.mxu3 %v3533_v48  ;;  %v3544_v48 = vld [vmem:[#allocation8 + $0x24] sm:$0xf] }
0x1358   :  { %2366 = vmatpush.bf16.msrb.mxu3 %v3532_v50  ;;  %v3296_v50 = vld [vmem:[#allocation8 + $0x28] sm:$0xf0] }
0x135c   :  { %2651 = vmatpush.bf16.msra.mxu3 %v3571_v3 }
0x1360   :  { %2652 = vmatpush.bf16.msra.mxu3 %v3570_v5 }
0x1364   :  { %2653 = vmatpush.bf16.msra.mxu3 %v3569_v7 }
0x13a8   :  { %v2236_v63 = vpop.xlane.xlu2 %2235 }
0x13a9   :  { %v2239_v37 = vmul.f32 %v2236_v63, %v3978_v8 }
0x13ab   :  { %v4287_v38 = vsub.f32 %v2229_v34, %v2239_v37  ;;  %v3304_v34 = vld [vmem:[#allocation8 + $0x38] sm:$0xf0]  ;;  %v3597_v37 = vld [vmem:[%s4356_s14 + $0x1] ss:$0 sm:$0xff] }
0x13ad   :  { %v2243_v12 = vmul.f32 %v4287_v38, %v4287_v38 }
0x13af   :  { %2245 = vadd.xlane.f32.xlu0 %v2243_v12 }
0x13b0   :  { %v2238_v41 = vpop.xlane.xlu0 %2237 }
0x13b1   :  { %v2240_v23 = vmul.f32 %v2238_v41, %v3978_v8 }
0x13b3   :  { %v4292_v42 = vsub.f32 %v2230_v0, %v2240_v23  ;;  %v3307_v0 = vor.u32 %v3546_v55, %v3304_v34 }
0x13b5   :  { %v2244_v17 = vmul.f32 %v4292_v42, %v4292_v42  ;;  %2493 = vmatpush.bf16.msrb.mxu1 %v3307_v0 }
0x13b7   :  { %2247 = vadd.xlane.f32.xlu1 %v2244_v17 }
0x1422   :  { %v2246_v46 = vpop.xlane.xlu0 %2245 }
0x1423   :  { %v2249_v47 = vmul.f32 %v2246_v46, %v3978_v8 }
0x1425   :  { %v2251_v49 = vadd.f32 1e-05, %v2249_v47  ;;  %v3545_v47 = vld [vmem:[#allocation8 + $0x24] sm:$0xf0] }
0x1427   :  { %3667 = vrsqrt.f32 %v2251_v49  ;;  %vm2259_vm13 = vweird.f32 %v2251_v49 }
0x142a   :  { %v2248_v51 = vpop.xlane.xlu1 %2247 }
0x142b   :  { %v2250_v52 = vmul.f32 %v2248_v51, %v3978_v8  ;;  %v3318_v8 = vld [vmem:[#allocation8 + $0x50] sm:$0xf]  ;;  %v3299_v51 = vor.u32 %v3544_v48, %v3296_v50 }
0x142c   :  { %v3319_v16 = vor.u32 %v3551_v9, %v3318_v8  ;;  %v3560_v8 = vld [vmem:[#allocation10 + $0x20] sm:$0xff] }
0x142d   :  { %v3668_v58 = vpop.eup %3667  ;;  %v2252_v59 = vadd.f32 1e-05, %v2250_v52  ;;  %2494 = vmatpush.bf16.msrb.mxu1 %v3299_v51  ;;  %v3543_v52 = vld [vmem:[#allocation8 + $0x14] sm:$0xf0]  ;;  %v3568_v9 = vld [vmem:[#allocation10 + $0x60] sm:$0xff] }
0x142e   :  { %v2254_v39 = vmul.f32 %v3668_v58, %v2251_v49  ;;  %2478 = vmatpush.bf16.msrb.mxu0 %v3319_v16  ;;  %vm2260_vm12 = vweird.f32 %v3668_v58  ;;  %2654 = vmatpush.bf16.msra.mxu3 %v3568_v9  ;;  %v3558_v16 = vld [vmem:[#allocation10 + $0x10] sm:$0xff] }
0x142f   :  { %3669 = vrsqrt.f32 %v2252_v59  ;;  %vm2261_vm14 = vmor %vm2259_vm13, %vm2260_vm12  ;;  %vm2269_vm0 = vweird.f32 %v2252_v59 }
0x1430   :  { %v2255_v6 = vmul.f32 %v3668_v58, %v2254_v39  ;;  %v3280_v39 = vld [vmem:[#allocation8 + $0x8] sm:$0xf0] }
0x1431   :  { %v3283_v2 = vor.u32 %v3540_v15, %v3280_v39 }
0x1432   :  { %v2256_v44 = vmul.f32 0.5, %v2255_v6  ;;  %2479 = vmatpush.bf16.msrb.mxu0 %v3311_v13  ;;  %v3561_v6 = vld [vmem:[#allocation10 + $0x28] sm:$0xff]  ;;  %2655 = vmatpush.bf16.msra.mxu3 %v3567_v54  ;;  %v3556_v13 = vld [vmem:[#allocation10] sm:$0xff] }
0x1433   :  { %2640 = vmatpush.bf16.msrb.mxu2 %v3561_v6 }
0x1434   :  { %v2257_v18 = vsub.f32 1.5, %v2256_v44  ;;  %v3599_v44 = vld [vmem:[%s4359_s17] ss:$0 sm:$0xff] }
0x1435   :  { %v3670_v22 = vpop.eup %3669 }
0x1436   :  { %v2264_v26 = vmul.f32 %v3670_v22, %v2252_v59  ;;  %v2258_v27 = vmul.f32 %v3668_v58, %v2257_v18  ;;  %vm2270_vm15 = vweird.f32 %v3670_v22  ;;  %2480 = vmatpush.bf16.msrb.mxu0 %v3303_v43  ;;  %v3278_v59 = vld [vmem:[#allocation8] sm:$0xf]  ;;  %v3566_v18 = vld [vmem:[#allocation10 + $0x50] sm:$0xff] }
0x1437   :  { %vm2271_vm1 = vmor %vm2269_vm0, %vm2270_vm15  ;;  %v3279_v62 = vor.u32 %v3541_v60, %v3278_v59  ;;  %2641 = vmatpush.bf16.msrb.mxu2 %v3560_v8  ;;  %2656 = vmatpush.bf16.msra.mxu3 %v3566_v18 }
0x1438   :  { %v2265_v28 = vmul.f32 %v3670_v22, %v2264_v26  ;;  %v2262_v14 = vsel %vm2261_vm14, %v3668_v58, %v2258_v27  ;;  %v3291_v58 = vor.u32 %v3542_v53, %v3288_v57  ;;  %v3565_v26 = vld [vmem:[#allocation10 + $0x48] sm:$0xff]  ;;  %v3564_v27 = vld [vmem:[#allocation10 + $0x40] sm:$0xff] }
0x1439   :  { %v2273_v12 = vmul.f32 %v2262_v14, %v4287_v38  ;;  %v3294_v38 = vld [vmem:[#allocation8 + $0x20] sm:$0xf] }
0x143a   :  { %v2266_v35 = vmul.f32 0.5, %v2265_v28  ;;  %v3295_v49 = vor.u32 %v3545_v47, %v3294_v38  ;;  %2495 = vmatpush.bf16.msrb.mxu1 %v3291_v58  ;;  %v2390_v28 = vld [vmem:[%s4361_s19] sm:$0x3]  ;;  %s3837_s19 = smov [#allocation11]  }
0x143b   :  { %v2278_v17 = vmul.f32 %v3597_v37, %v2273_v12  ;;  %2642 = vmatpush.bf16.msrb.mxu2 %v3559_v10  ;;  %2657 = vmatpush.bf16.msra.mxu3 %v3565_v26  ;;  %v2392_v29 = vperm.slane %v2390_v28, 0  ;;  %v2393_v30 = vperm.slane %v2390_v28, 1  ;;  %v3600_v12 = vld [vmem:[%s4363_s21] ss:$0 sm:$0xff]  ;;  %s2670_s9 = sshll.u32 %s3837_s19, 4  ;;  %s2671_s9 = int_to_ptr.vmem [resolvable:$true] %s2670_s9 }
0x143c   :  { %v2267_v56 = vsub.f32 1.5, %v2266_v35  ;;  %2481 = vmatpush.bf16.msrb.mxu0 %v3295_v49 }
0x143d   :  { %v2283_v61 = vadd.f32 %v3598_v33, %v2278_v17 }
0x143e   :  { %v2268_v63 = vmul.f32 %v3670_v22, %v2267_v56  ;;  %2496 = vmatpush.bf16.msrb.mxu1 %v3283_v2 }
0x143f   :  { %2643 = vmatpush.bf16.msrb.mxu2 %v3558_v16  ;;  %2658 = vmatpush.bf16.msra.mxu3 %v3564_v27 }
0x1440   :  { %v2272_v41 = vsel %vm2271_vm1, %v3670_v22, %v2268_v63 }
0x1441   :  { %v2274_v23 = vmul.f32 %v2272_v41, %v4292_v42  ;;  %v3286_v42 = vld [vmem:[#allocation8 + $0x10] sm:$0xf] }
0x1442   :  { %v3287_v11 = vor.u32 %v3543_v52, %v3286_v42 }
0x1443   :  { %v2279_v24 = vmul.f32 %v3597_v37, %v2274_v23  ;;  %2644 = vmatpush.bf16.msrb.mxu2 %v3557_v25 }
0x1444   :  { %2482 = vmatpush.bf16.msrb.mxu0 %v3287_v11 }
0x1445   :  { %v2284_v31 = vadd.f32 %v3598_v33, %v2279_v24 }
0x1447   :  { %v2286_v1 = vrot.slane %v2284_v31, 7  ;;  %2645 = vmatpush.bf16.msrb.mxu2 %v3556_v13 }
0x1448   :  { %2483 = vmatpush.bf16.msrb.mxu0 %v3279_v62 }
0x1449   :  { %v2289_v45 = vsel %vm2288_vm2, %v2283_v61, %v2286_v1 }
0x144a   :  { %v2290_v46 = vpack.c.bf16 %v2289_v45, %v2289_v45 }
0x144c   :  { %2367 = vmatmul.bf16.vlgmr.msrb.gmra.mxu3 %v2290_v46 }
0x14cf   :  { %v2368_v19 = vpop.f32.mrf.mxu3 }
0x14d0   :  { %v2369_v20 = vadd.f32 %v3599_v44, %v2368_v19 }
0x14d2   :  { %3671 = vtanh.f32 %v2369_v20 }
0x14d7   :  { %v2370_v21 = vpop.f32.mrf.mxu3 }
0x14d8   :  { %v3672_v22 = vpop.eup %3671 }
0x14d9   :  { %v2373_v36 = vpack.c.bf16 %v3672_v22, %v3672_v22 }
0x14db   :  { %2484 = vmatmul.bf16.vlgmr.msrb.gmra.mxu0 %v2373_v36  ;;  %2497 = vmatmul.bf16.vlgmr.msrb.gmra.mxu1 %v2373_v36 }
0x1558   :  { %v2485_v32 = vpop.f32.mrf.mxu0  ;;  %v2498_v55 = vpop.f32.mrf.mxu1 }
0x1559   :  { %v2486_v34 = vadd.f32 %v2485_v32, %v2392_v29  ;;  %v2499_v35 = vadd.f32 %v2498_v55, %v2393_v30 }
0x155b   :  { %v2502_v43 = vmax.f32 %v2486_v34, 0.0  ;;  %v2503_v14 = vmax.f32 %v2499_v35, 0.0 }
0x155d   :  { %v2504_v56 = vpack.c.bf16 %v2502_v43, %v2502_v43  ;;  %v2505_v0 = vpack.c.bf16 %v2503_v14, %v2503_v14 }
0x155f   :  { %2646 = vmatmul.bf16.vlgmr.msrb.gmra.mxu2 %v2504_v56  ;;  %2659 = vmatmul.bf16.vlgmr.msra.gmra.mxu3 %v2505_v0 }
0x1560   :  { %v2487_v63 = vpop.f32.mrf.mxu0  ;;  %v2500_v37 = vpop.f32.mrf.mxu1 }
0x15e2   :  { %v2647_v41 = vpop.f32.mrf.mxu2  ;;  %v2660_v23 = vpop.f32.mrf.mxu3 }
0x15e3   :  { %v2648_v17 = vadd.f32 %v3600_v12, %v2647_v41 }
0x15e5   :  { %v2661_v24 = vadd.f32 %v2660_v23, %v2648_v17 }
0x15e7   :  { %2664 = vst [vmem:[#allocation11] sm:$0x3] %v2661_v24 }
0x15e8   :  { %2675 = dma.vmem_to_hbm [thread:$0]  %s2671_s9, 32, %s2673_s25, [#allocation4]  }
0x15ea   :  { %v2649_v33 = vpop.f32.mrf.mxu2  ;;  %v2662_v31 = vpop.f32.mrf.mxu3 }
0x15eb   :  { %3823 = dma.done.wait [#allocation4], 32  }
0x15ec   :  { %3824 = vsyncadd [#allocation4], 4294967264 }
0x15ed   :  { %2680 = vsyncpa [#allocation3], 1 }
0x15ee   :  { %2681 = vsyncpa [#allocation6], 1 }
0x15ef   :  { %2682 = vsyncpa [#allocation9], 1 }
0x15f0   :  { %2683 = vsyncpa [#allocation4], 1 }

</bundles_post_ra>
